<compile_context>
chip_gen: v7x
topology: tpu7x:2x2x1
jax: 0.10.0
libtpu: 0.0.40
codegen_flags: <defaults>
</compile_context>

<pallas_src>
import functools

import jax
import jax.numpy as jnp
from jax.experimental import pallas as pl
from jax.experimental.pallas import tpu as pltpu


# ----------------------------------------------------------------------------
# small helpers
# ----------------------------------------------------------------------------
def _round_up(x, m):
    return (x + m - 1) // m * m


def _pick_tile(M, target):
    """Largest t <= target with t % 8 == 0 and M % t == 0 (None if impossible)."""
    t = min(target, M)
    t -= t % 8
    while t >= 8:
        if M % t == 0:
            return t
        t -= 8
    return None


def _cparams(sem):
    return pltpu.CompilerParams(dimension_semantics=sem,
                                vmem_limit_bytes=48 * 1024 * 1024)


# ----------------------------------------------------------------------------
# Pallas kernel 1: full-K matmul (bf16 -> f32 acc) + fused per-channel BN stats
# ----------------------------------------------------------------------------
def _mm_stats_kernel(a_ref, b_ref, y_ref, s_ref, q_ref):
    acc = jnp.dot(a_ref[...], b_ref[...], preferred_element_type=jnp.float32)
    y_ref[...] = acc.astype(y_ref.dtype)
    s_ref[...] = jnp.sum(acc, axis=0).reshape(s_ref.shape)
    q_ref[...] = jnp.sum(acc * acc, axis=0).reshape(q_ref.shape)


def matmul_stats(a, b, out_dtype=jnp.bfloat16, row_target=2048):
    """(M,K)@(K,O) -> (y, col_sum, col_sumsq).  Full K / full O blocks."""
    M, K = a.shape
    K2, O = b.shape
    assert K == K2
    tm = _pick_tile(M, row_target)
    pad = 0
    if tm is None:
        pad = _round_up(M, 8) - M
        a = jnp.pad(a, ((0, pad), (0, 0)))          # zero rows: stats unaffected
        tm = _pick_tile(M + pad, row_target)
    Mp = M + pad
    grid = (Mp // tm,)
    y, ps, pq = pl.pallas_call(
        _mm_stats_kernel,
        out_shape=(jax.ShapeDtypeStruct((Mp, O), out_dtype),
                   jax.ShapeDtypeStruct((grid[0], 1, O), jnp.float32),
                   jax.ShapeDtypeStruct((grid[0], 1, O), jnp.float32)),
        grid=grid,
        in_specs=[pl.BlockSpec((tm, K), lambda i: (i, 0)),
                  pl.BlockSpec((K, O), lambda i: (0, 0))],
        out_specs=(pl.BlockSpec((tm, O), lambda i: (i, 0)),
                   pl.BlockSpec((1, 1, O), lambda i: (i, 0, 0)),
                   pl.BlockSpec((1, 1, O), lambda i: (i, 0, 0))),
        compiler_params=_cparams(("parallel",)),
    )(a.astype(jnp.bfloat16), b.astype(jnp.bfloat16))
    if pad:
        y = y[:M]
    return y, jnp.sum(ps, axis=(0, 1)), jnp.sum(pq, axis=(0, 1))


# ----------------------------------------------------------------------------
# Pallas kernel 2: fused 3x3 (dilated) conv, im2col done in-VMEM per row tile,
#                  per-channel BN partial stats emitted from the f32 accumulator
# ----------------------------------------------------------------------------
def _conv3x3_kernel(x_ref, w_ref, y_ref, s_ref, q_ref, *, d, th, ow, oc):
    _, _, thp, wp, cin = x_ref.shape
    xa = x_ref[...].reshape(thp, wp, cin)
    acc = jnp.zeros((th * ow, oc), jnp.float32)
    for dy in range(3):
        for dx in range(3):
            win = xa[dy * d:dy * d + th, dx * d:dx * d + ow, :]
            acc = acc + jnp.dot(win.reshape(th * ow, cin), w_ref[dy * 3 + dx],
                                preferred_element_type=jnp.float32)
    y_ref[...] = acc.reshape(1, 1, th * ow, oc).astype(y_ref.dtype)
    s_ref[...] = jnp.sum(acc, axis=0).reshape(1, 1, 1, oc)
    q_ref[...] = jnp.sum(acc * acc, axis=0).reshape(1, 1, 1, oc)


def _pick_row_tile(H, W, Wp, Cin, O, d, budget=20 * 1024 * 1024):
    """Largest row tile dividing H whose working set fits the VMEM budget."""
    best = 1
    for th in range(1, H + 1):
        if H % th:
            continue
        need = (2 * (th + 2 * d) * Wp * Cin * 2   # double-buffered input tile (bf16)
                + 2 * th * W * O * 2              # double-buffered output tile (bf16)
                + th * W * (O + Cin) * 4          # f32 accumulator + tap staging
                + 2 * 9 * Cin * O * 2)            # weights (bf16)
        if need <= budget:
            best = th
    return best


def conv3x3_bn_relu(x, p, *, padding, dilation, eps=1e-5):
    """Conv2d(3x3, stride 1, pad==dilation) -> BN(batch stats) -> ReLU (NHWC)."""
    N, H, W, Cin = x.shape
    O = p["w"].shape[0]
    d = dilation
    assert padding == d                      # holds for every 3x3 conv in this model
    xp = jnp.pad(x, ((0, 0), (d, d), (d, d), (0, 0)))
    Wp = W + 2 * d
    TH = _pick_row_tile(H, W, Wp, Cin, O, d)
    T = H // TH
    THp = TH + 2 * d
    if T == 1:
        tiles = xp[:, None]                                       # (N,1,Hp,Wp,Cin)
    else:
        # overlapping row tiles: halo duplicated once in HBM (<< 9x im2col)
        tiles = jnp.stack([xp[:, t * TH:t * TH + THp] for t in range(T)], axis=1)
    w9 = jnp.transpose(p["w"], (2, 3, 1, 0)).reshape(9, Cin, O)   # (kh*kw, Cin, O)
    kern = functools.partial(_conv3x3_kernel, d=d, th=TH, ow=W, oc=O)
    y, ps, pq = pl.pallas_call(
        kern,
        out_shape=(jax.ShapeDtypeStruct((N, T, TH * W, O), jnp.bfloat16),
                   jax.ShapeDtypeStruct((N, T, 1, O), jnp.float32),
                   jax.ShapeDtypeStruct((N, T, 1, O), jnp.float32)),
        grid=(N, T),
        in_specs=[pl.BlockSpec((1, 1, THp, Wp, Cin), lambda n, t: (n, t, 0, 0, 0)),
                  pl.BlockSpec((9, Cin, O), lambda n, t: (0, 0, 0))],
        out_specs=(pl.BlockSpec((1, 1, TH * W, O), lambda n, t: (n, t, 0, 0)),
                   pl.BlockSpec((1, 1, 1, O), lambda n, t: (n, t, 0, 0)),
                   pl.BlockSpec((1, 1, 1, O), lambda n, t: (n, t, 0, 0))),
        compiler_params=_cparams(("parallel", "parallel")),
    )(tiles.astype(jnp.bfloat16), w9.astype(jnp.bfloat16))
    count = N * H * W
    out = _bn_relu(y.reshape(count, O), jnp.sum(ps, axis=(0, 1, 2)),
                   jnp.sum(pq, axis=(0, 1, 2)), count, p["g"], p["be"], eps)
    return out.reshape(N, H, W, O)


def conv1x1_bn_relu(x, p, eps=1e-5):
    """Conv2d(1x1) -> BN(batch stats) -> ReLU via the fused matmul+stats kernel."""
    N, H, W, Cin = x.shape
    O = p["w"].shape[0]
    wmat = p["w"].reshape(O, Cin).T
    y, cs, cq = matmul_stats(x.reshape(N * H * W, Cin), wmat)
    out = _bn_relu(y, cs, cq, N * H * W, p["g"], p["be"], eps)
    return out.reshape(N, H, W, O)


# ----------------------------------------------------------------------------
# Pallas kernel 3: fused per-channel affine (BatchNorm) + ReLU, lane-dense
# ----------------------------------------------------------------------------
def _affine_relu_kernel(x_ref, s_ref, t_ref, o_ref):
    x = x_ref[...].astype(jnp.float32)                 # math stays f32 (v5e VPU)
    o_ref[...] = jnp.maximum(x * s_ref[...] + t_ref[...], 0.0).astype(o_ref.dtype)


def affine_relu(y2d, scale, shift, out_dtype=jnp.bfloat16, row_target=2048):
    M0, C0 = y2d.shape
    scale = scale.astype(jnp.float32)
    shift = shift.astype(jnp.float32)
    # lane-dense repack: present 64-wide channels as 128-wide rows
    f = 1
    if C0 < 128 and 128 % C0 == 0:
        f = 128 // C0
        while f > 1 and M0 % f != 0:
            f //= 2
    if f > 1:
        y2d = y2d.reshape(M0 // f, C0 * f)
        scale = jnp.tile(scale, f)
        shift = jnp.tile(shift, f)
    M, C = y2d.shape
    tm = _pick_tile(M, row_target)
    pad = 0
    if tm is None:
        pad = _round_up(M, 8) - M
        y2d = jnp.pad(y2d, ((0, pad), (0, 0)))
        tm = _pick_tile(M + pad, row_target)
    Mp = M + pad
    out = pl.pallas_call(
        _affine_relu_kernel,
        out_shape=jax.ShapeDtypeStruct((Mp, C), out_dtype),
        grid=(Mp // tm,),
        in_specs=[pl.BlockSpec((tm, C), lambda i: (i, 0)),
                  pl.BlockSpec((1, C), lambda i: (0, 0)),
                  pl.BlockSpec((1, C), lambda i: (0, 0))],
        out_specs=pl.BlockSpec((tm, C), lambda i: (i, 0)),
        compiler_params=_cparams(("parallel",)),
    )(y2d, scale.reshape(1, C), shift.reshape(1, C))
    if pad:
        out = out[:M]
    return out.reshape(M0, C0)


def _bn_relu(y2d, colsum, colsumsq, count, gamma, beta, eps=1e-5):
    mean = colsum / count
    var = jnp.maximum(colsumsq / count - mean * mean, 0.0)      # biased, as torch BN
    scale = gamma / jnp.sqrt(var + eps)
    shift = beta - mean * scale
    return affine_relu(y2d, scale, shift)


# ----------------------------------------------------------------------------
# Pallas kernel 4: batched matmul (per-batch attention-scaled 1x1 prediction)
# ----------------------------------------------------------------------------
def _bmm_kernel(a_ref, b_ref, o_ref):
    o_ref[0] = jnp.dot(a_ref[0], b_ref[0],
                       preferred_element_type=jnp.float32).astype(o_ref.dtype)


def batched_matmul(a, b, out_dtype=jnp.float32, row_target=512):
    """(B,M,K)@(B,K,O) -> (B,M,O) in a single pallas_call (grid over batch)."""
    B, M, K = a.shape
    _, K2, O = b.shape
    assert K == K2
    tm = _pick_tile(M, row_target)
    pad = 0
    if tm is None:
        pad = _round_up(M, 8) - M
        a = jnp.pad(a, ((0, 0), (0, pad), (0, 0)))
        tm = _pick_tile(M + pad, row_target)
    Mp = M + pad
    y = pl.pallas_call(
        _bmm_kernel,
        out_shape=jax.ShapeDtypeStruct((B, Mp, O), out_dtype),
        grid=(B, Mp // tm),
        in_specs=[pl.BlockSpec((1, tm, K), lambda b, i: (b, i, 0)),
                  pl.BlockSpec((1, K, O), lambda b, i: (b, 0, 0))],
        out_specs=pl.BlockSpec((1, tm, O), lambda b, i: (b, i, 0)),
        compiler_params=_cparams(("parallel", "parallel")),
    )(a.astype(jnp.bfloat16), b.astype(jnp.bfloat16))
    return y[:, :M] if pad else y


# ----------------------------------------------------------------------------
# plain-JAX glue: pooling and gather-free bilinear upsampling
# ----------------------------------------------------------------------------
# TODO(synk): max/avg pooling kept as plain-JAX reshapes (memory-bound glue).
def maxpool2(x):
    N, H, W, C = x.shape
    return x.reshape(N, H // 2, 2, W // 2, 2, C).max(axis=(2, 4))


def avgpool(x, k):
    N, H, W, C = x.shape
    return x.reshape(N, H // k, k, W // k, k, C).mean(axis=(2, 4))


def _upsample_axis(x, s, axis):
    """bilinear, align_corners=False, integer scale s — 2-tap blend, no gathers."""
    n = x.shape[axis]

    def take(lo, hi):
        idx = [slice(None)] * x.ndim
        idx[axis] = slice(lo, hi)
        return x[tuple(idx)]

    xl = jnp.concatenate([take(0, 1), take(0, n - 1)], axis=axis)   # x[i-1], clamped
    xr = jnp.concatenate([take(1, n), take(n - 1, n)], axis=axis)   # x[i+1], clamped
    outs = []
    for r in range(s):
        frac = (2 * r + 1 - s) / (2.0 * s)
        if frac < 0:
            outs.append((-frac) * xl + (1.0 + frac) * x)
        else:
            outs.append((1.0 - frac) * x + frac * xr)
    y = jnp.stack(outs, axis=axis + 1)
    shp = list(x.shape)
    shp[axis] = n * s
    return y.reshape(shp)


def upsample_bilinear(x, s):
    xf = x.astype(jnp.float32)
    y = _upsample_axis(xf, s, 1)
    y = _upsample_axis(y, s, 2)
    return y.astype(x.dtype)


# ----------------------------------------------------------------------------
# Parameters (deterministic synthetic init, shapes from the module __init__)
# ----------------------------------------------------------------------------
def make_params(seed, landmark_num, pooled_spatial):
    keys = iter(jax.random.split(jax.random.PRNGKey(seed), 256))

    def nrm(shape, s=0.05):
        return jax.random.normal(next(keys), shape, jnp.float32) * s

    def conv_bn(cin, cout, k):
        # conv bias omitted: with track_running_stats=False BatchNorm the
        # batch-mean subtraction cancels it exactly.
        return dict(w=nrm((cout, cin, k, k)),
                    g=jnp.ones((cout,), jnp.float32),
                    be=jnp.zeros((cout,), jnp.float32))

    # VGG19-bn features split as [:14], [14:27], [27:40], [40:]
    vgg_cfg = [
        [(3, 64), (64, 64), "M", (64, 128), (128, 128), "M"],
        [(128, 256), (256, 256), (256, 256), (256, 256), "M"],
        [(256, 512), (512, 512), (512, 512), (512, 512), "M"],
        [(512, 512), (512, 512), (512, 512), (512, 512), "M"],
    ]
    vgg = []
    for block in vgg_cfg:
        ops = []
        for item in block:
            ops.append(None if item == "M" else conv_bn(item[0], item[1], 3))
        vgg.append(ops)

    fnum = 64
    f_convs = [conv_bn(c, fnum, 1) for c in (128, 256, 512, 512)]
    dil = [conv_bn(fnum * 4, fnum, 1), conv_bn(fnum * 4, fnum, 3),
           conv_bn(fnum * 4, fnum, 3), conv_bn(fnum * 4, fnum, 3)]
    L3 = landmark_num * 3
    # NOTE: original attentionLayer1 hardcodes Linear(500, ...) (640x800 input);
    # here in_features = pooled spatial size so the small test is consistent.
    att = dict(lin1=nrm((pooled_spatial, 128)),
               bn_g=jnp.ones((), jnp.float32),
               bn_b=jnp.zeros((), jnp.float32),
               lin2=nrm((128, L3)))
    mlist = dict(w=nrm((L3, fnum * 4)), b=nrm((L3,)))
    return dict(vgg=vgg, f_convs=f_convs, dil=dil, att=att, mlist=mlist)


# ----------------------------------------------------------------------------
# fusionVGG19.forward
# ----------------------------------------------------------------------------
def fusion_vgg19_forward(params, x_nchw):
    L3 = params["mlist"]["w"].shape[0]
    x = jnp.transpose(x_nchw, (0, 2, 3, 1)).astype(jnp.bfloat16)   # NCHW -> NHWC
    fs = []
    for bi, block in enumerate(params["vgg"]):
        for p in block:
            x = maxpool2(x) if p is None else conv3x3_bn_relu(x, p, padding=1, dilation=1)
        fs.append(conv1x1_bn_relu(x, params["f_convs"][bi]))
    f1, f2, f3, f4 = fs
    f2 = upsample_bilinear(f2, 2)
    f3 = upsample_bilinear(f3, 4)
    f4 = upsample_bilinear(f4, 8)
    bone = jnp.concatenate([f1, f2, f3, f4], axis=-1)              # torch.cat(dim=1)

    # dilationInceptionModule
    branches = [conv1x1_bn_relu(bone, params["dil"][0])]
    for p, (pad, d) in zip(params["dil"][1:], [(1, 1), (2, 2), (4, 4)]):
        branches.append(conv3x3_bn_relu(bone, p, padding=pad, dilation=d))
    bone = jnp.concatenate(branches, axis=-1)

    # getAttention
    N, Hb, Wb, C = bone.shape
    pooled = avgpool(bone.astype(jnp.float32), 8)                  # AvgPool2d(8,8)
    S = pooled.shape[1] * pooled.shape[2]
    v = jnp.transpose(pooled, (0, 3, 1, 2)).reshape(N * C, S)
    h, hs, hq = matmul_stats(v, params["att"]["lin1"], out_dtype=jnp.float32)
    cnt = float(N * C * params["att"]["lin1"].shape[1])
    mean = jnp.sum(hs) / cnt                                       # BatchNorm2d(1), batch stats
    var = jnp.maximum(jnp.sum(hq) / cnt - mean * mean, 0.0)
    h = (h - mean) * (params["att"]["bn_g"] / jnp.sqrt(var + 1e-5)) + params["att"]["bn_b"]
    h = jnp.tanh(h)
    h2, _, _ = matmul_stats(h, params["att"]["lin2"], out_dtype=jnp.float32)
    h2 = h2.reshape(N, C, L3)
    att = jax.nn.softmax(h2, axis=1)         # torch Softmax(dim=2) over C of (B,1,C,L3)
    att = jnp.transpose(att, (0, 2, 1))      # (N, L3, C)

    # predictionWithAttention: conv1x1_i(att[:,i]*bone*C) folded into one batched matmul
    wb = jnp.transpose(att * float(C) * params["mlist"]["w"][None, :, :], (0, 2, 1))
    wbp = jnp.pad(wb, ((0, 0), (0, 0), (0, 128 - L3)))             # lane-dense output
    y = batched_matmul(bone.reshape(N, Hb * Wb, C), wbp)           # (N, HW, 128) f32
    y = y[:, :, :L3] + params["mlist"]["b"][None, None, :]
    y = y.reshape(N, Hb, Wb, L3)
    y = upsample_bilinear(y, 4)
    return [jnp.transpose(y, (0, 3, 1, 2))]                        # back to NCHW


# ----------------------------------------------------------------------------
if __name__ == "__main__":
    B, Cin, H, W = 2, 3, 64, 64              # small but consistent: VGG needs 3-ch input
    landmark_num = 2
    pooled_spatial = (H // 32) * (W // 32)
    params = make_params(0, landmark_num, pooled_spatial)
    x = jax.random.normal(jax.random.PRNGKey(0), (B, Cin, H, W), jnp.float32)
    fwd = jax.jit(fusion_vgg19_forward)
    out = fwd(params, x)
    y = jax.block_until_ready(out[0])
    assert y.shape == (B, landmark_num * 3, H, W), y.shape
    assert bool(jnp.all(jnp.isfinite(y)))
    print("KERNEL_OK")
</pallas_src>

<mosaic_0001>
module attributes {stable_mosaic.version = 11 : i64} {
  func.func @_conv3x3_kernel(%arg0: i32, %arg1: i32, %arg2: memref<1x1x66x66x3xbf16, #tpu.memory_space<vmem>>, %arg3: memref<9x3x64xbf16, #tpu.memory_space<vmem>>, %arg4: memref<1x1x4096x64xbf16, #tpu.memory_space<vmem>>, %arg5: memref<1x1x1x64xf32, #tpu.memory_space<vmem>>, %arg6: memref<1x1x1x64xf32, #tpu.memory_space<vmem>>) attributes {dimension_semantics = [#tpu.dimension_semantics<parallel>, #tpu.dimension_semantics<parallel>], iteration_bounds = array<i64: 2, 1>, scalar_prefetch = 0 : i64, scratch_operands = 0 : i64, tpu.core_type = #tpu.core_type<tc>, window_params = [{transform_indices = @transform_0, window_bounds = array<i64: 1, 1, 66, 66, 3>}, {pipeline_mode = #tpu.pipeline_mode<synchronous>, transform_indices = @transform_1, window_bounds = array<i64: 9, 3, 64>}, {transform_indices = @transform_2, window_bounds = array<i64: 1, 1, 4096, 64>}, {transform_indices = @transform_3, window_bounds = array<i64: 1, 1, 1, 64>}, {transform_indices = @transform_4, window_bounds = array<i64: 1, 1, 1, 64>}]} {
    %c0 = arith.constant 0 : index
    %c0_0 = arith.constant 0 : index
    %c0_1 = arith.constant 0 : index
    %c0_2 = arith.constant 0 : index
    %c0_3 = arith.constant 0 : index
    %0 = vector.load %arg2[%c0, %c0_0, %c0_1, %c0_2, %c0_3] : memref<1x1x66x66x3xbf16, #tpu.memory_space<vmem>>, vector<1x1x66x66x3xbf16>
    %1 = vector.shape_cast %0 : vector<1x1x66x66x3xbf16> to vector<66x66x3xbf16>
    %cst = arith.constant 0.000000e+00 : f32
    %2 = vector.broadcast %cst : f32 to vector<4096x64xf32>
    %3 = vector.extract_strided_slice %1 {offsets = [0, 0, 0], sizes = [64, 64, 3], strides = [1, 1, 1]} : vector<66x66x3xbf16> to vector<64x64x3xbf16>
    %4 = vector.shape_cast %3 : vector<64x64x3xbf16> to vector<4096x3xbf16>
    %c0_4 = arith.constant 0 : index
    %c0_5 = arith.constant 0 : index
    %c0_6 = arith.constant 0 : index
    %5 = vector.load %arg3[%c0_4, %c0_5, %c0_6] : memref<9x3x64xbf16, #tpu.memory_space<vmem>>, vector<1x3x64xbf16>
    %6 = vector.shape_cast %5 : vector<1x3x64xbf16> to vector<3x64xbf16>
    %cst_7 = arith.constant dense<0.000000e+00> : vector<4096x64xf32>
    %7 = tpu.matmul %4, %6, %cst_7 {dimension_numbers = #tpu.dot_dimension_numbers<[1], [0], [0], [1], [0, 0, 1, 1], [], []>} : vector<4096x3xbf16>, vector<3x64xbf16>, vector<4096x64xf32> -> vector<4096x64xf32>
    %8 = arith.addf %2, %7 : vector<4096x64xf32>
    %9 = vector.extract_strided_slice %1 {offsets = [0, 1, 0], sizes = [64, 64, 3], strides = [1, 1, 1]} : vector<66x66x3xbf16> to vector<64x64x3xbf16>
    %10 = vector.shape_cast %9 : vector<64x64x3xbf16> to vector<4096x3xbf16>
    %c1 = arith.constant 1 : index
    %c0_8 = arith.constant 0 : index
    %c0_9 = arith.constant 0 : index
    %11 = vector.load %arg3[%c1, %c0_8, %c0_9] : memref<9x3x64xbf16, #tpu.memory_space<vmem>>, vector<1x3x64xbf16>
    %12 = vector.shape_cast %11 : vector<1x3x64xbf16> to vector<3x64xbf16>
    %cst_10 = arith.constant dense<0.000000e+00> : vector<4096x64xf32>
    %13 = tpu.matmul %10, %12, %cst_10 {dimension_numbers = #tpu.dot_dimension_numbers<[1], [0], [0], [1], [0, 0, 1, 1], [], []>} : vector<4096x3xbf16>, vector<3x64xbf16>, vector<4096x64xf32> -> vector<4096x64xf32>
    %14 = arith.addf %8, %13 : vector<4096x64xf32>
    %15 = vector.extract_strided_slice %1 {offsets = [0, 2, 0], sizes = [64, 64, 3], strides = [1, 1, 1]} : vector<66x66x3xbf16> to vector<64x64x3xbf16>
    %16 = vector.shape_cast %15 : vector<64x64x3xbf16> to vector<4096x3xbf16>
    %c2 = arith.constant 2 : index
    %c0_11 = arith.constant 0 : index
    %c0_12 = arith.constant 0 : index
    %17 = vector.load %arg3[%c2, %c0_11, %c0_12] : memref<9x3x64xbf16, #tpu.memory_space<vmem>>, vector<1x3x64xbf16>
    %18 = vector.shape_cast %17 : vector<1x3x64xbf16> to vector<3x64xbf16>
    %cst_13 = arith.constant dense<0.000000e+00> : vector<4096x64xf32>
    %19 = tpu.matmul %16, %18, %cst_13 {dimension_numbers = #tpu.dot_dimension_numbers<[1], [0], [0], [1], [0, 0, 1, 1], [], []>} : vector<4096x3xbf16>, vector<3x64xbf16>, vector<4096x64xf32> -> vector<4096x64xf32>
    %20 = arith.addf %14, %19 : vector<4096x64xf32>
    %21 = vector.extract_strided_slice %1 {offsets = [1, 0, 0], sizes = [64, 64, 3], strides = [1, 1, 1]} : vector<66x66x3xbf16> to vector<64x64x3xbf16>
    %22 = vector.shape_cast %21 : vector<64x64x3xbf16> to vector<4096x3xbf16>
    %c3 = arith.constant 3 : index
    %c0_14 = arith.constant 0 : index
    %c0_15 = arith.constant 0 : index
    %23 = vector.load %arg3[%c3, %c0_14, %c0_15] : memref<9x3x64xbf16, #tpu.memory_space<vmem>>, vector<1x3x64xbf16>
    %24 = vector.shape_cast %23 : vector<1x3x64xbf16> to vector<3x64xbf16>
    %cst_16 = arith.constant dense<0.000000e+00> : vector<4096x64xf32>
    %25 = tpu.matmul %22, %24, %cst_16 {dimension_numbers = #tpu.dot_dimension_numbers<[1], [0], [0], [1], [0, 0, 1, 1], [], []>} : vector<4096x3xbf16>, vector<3x64xbf16>, vector<4096x64xf32> -> vector<4096x64xf32>
    %26 = arith.addf %20, %25 : vector<4096x64xf32>
    %27 = vector.extract_strided_slice %1 {offsets = [1, 1, 0], sizes = [64, 64, 3], strides = [1, 1, 1]} : vector<66x66x3xbf16> to vector<64x64x3xbf16>
    %28 = vector.shape_cast %27 : vector<64x64x3xbf16> to vector<4096x3xbf16>
    %c4 = arith.constant 4 : index
    %c0_17 = arith.constant 0 : index
    %c0_18 = arith.constant 0 : index
    %29 = vector.load %arg3[%c4, %c0_17, %c0_18] : memref<9x3x64xbf16, #tpu.memory_space<vmem>>, vector<1x3x64xbf16>
    %30 = vector.shape_cast %29 : vector<1x3x64xbf16> to vector<3x64xbf16>
    %cst_19 = arith.constant dense<0.000000e+00> : vector<4096x64xf32>
    %31 = tpu.matmul %28, %30, %cst_19 {dimension_numbers = #tpu.dot_dimension_numbers<[1], [0], [0], [1], [0, 0, 1, 1], [], []>} : vector<4096x3xbf16>, vector<3x64xbf16>, vector<4096x64xf32> -> vector<4096x64xf32>
    %32 = arith.addf %26, %31 : vector<4096x64xf32>
    %33 = vector.extract_strided_slice %1 {offsets = [1, 2, 0], sizes = [64, 64, 3], strides = [1, 1, 1]} : vector<66x66x3xbf16> to vector<64x64x3xbf16>
    %34 = vector.shape_cast %33 : vector<64x64x3xbf16> to vector<4096x3xbf16>
    %c5 = arith.constant 5 : index
    %c0_20 = arith.constant 0 : index
    %c0_21 = arith.constant 0 : index
    %35 = vector.load %arg3[%c5, %c0_20, %c0_21] : memref<9x3x64xbf16, #tpu.memory_space<vmem>>, vector<1x3x64xbf16>
    %36 = vector.shape_cast %35 : vector<1x3x64xbf16> to vector<3x64xbf16>
    %cst_22 = arith.constant dense<0.000000e+00> : vector<4096x64xf32>
    %37 = tpu.matmul %34, %36, %cst_22 {dimension_numbers = #tpu.dot_dimension_numbers<[1], [0], [0], [1], [0, 0, 1, 1], [], []>} : vector<4096x3xbf16>, vector<3x64xbf16>, vector<4096x64xf32> -> vector<4096x64xf32>
    %38 = arith.addf %32, %37 : vector<4096x64xf32>
    %39 = vector.extract_strided_slice %1 {offsets = [2, 0, 0], sizes = [64, 64, 3], strides = [1, 1, 1]} : vector<66x66x3xbf16> to vector<64x64x3xbf16>
    %40 = vector.shape_cast %39 : vector<64x64x3xbf16> to vector<4096x3xbf16>
    %c6 = arith.constant 6 : index
    %c0_23 = arith.constant 0 : index
    %c0_24 = arith.constant 0 : index
    %41 = vector.load %arg3[%c6, %c0_23, %c0_24] : memref<9x3x64xbf16, #tpu.memory_space<vmem>>, vector<1x3x64xbf16>
    %42 = vector.shape_cast %41 : vector<1x3x64xbf16> to vector<3x64xbf16>
    %cst_25 = arith.constant dense<0.000000e+00> : vector<4096x64xf32>
    %43 = tpu.matmul %40, %42, %cst_25 {dimension_numbers = #tpu.dot_dimension_numbers<[1], [0], [0], [1], [0, 0, 1, 1], [], []>} : vector<4096x3xbf16>, vector<3x64xbf16>, vector<4096x64xf32> -> vector<4096x64xf32>
    %44 = arith.addf %38, %43 : vector<4096x64xf32>
    %45 = vector.extract_strided_slice %1 {offsets = [2, 1, 0], sizes = [64, 64, 3], strides = [1, 1, 1]} : vector<66x66x3xbf16> to vector<64x64x3xbf16>
    %46 = vector.shape_cast %45 : vector<64x64x3xbf16> to vector<4096x3xbf16>
    %c7 = arith.constant 7 : index
    %c0_26 = arith.constant 0 : index
    %c0_27 = arith.constant 0 : index
    %47 = vector.load %arg3[%c7, %c0_26, %c0_27] : memref<9x3x64xbf16, #tpu.memory_space<vmem>>, vector<1x3x64xbf16>
    %48 = vector.shape_cast %47 : vector<1x3x64xbf16> to vector<3x64xbf16>
    %cst_28 = arith.constant dense<0.000000e+00> : vector<4096x64xf32>
    %49 = tpu.matmul %46, %48, %cst_28 {dimension_numbers = #tpu.dot_dimension_numbers<[1], [0], [0], [1], [0, 0, 1, 1], [], []>} : vector<4096x3xbf16>, vector<3x64xbf16>, vector<4096x64xf32> -> vector<4096x64xf32>
    %50 = arith.addf %44, %49 : vector<4096x64xf32>
    %51 = vector.extract_strided_slice %1 {offsets = [2, 2, 0], sizes = [64, 64, 3], strides = [1, 1, 1]} : vector<66x66x3xbf16> to vector<64x64x3xbf16>
    %52 = vector.shape_cast %51 : vector<64x64x3xbf16> to vector<4096x3xbf16>
    %c8 = arith.constant 8 : index
    %c0_29 = arith.constant 0 : index
    %c0_30 = arith.constant 0 : index
    %53 = vector.load %arg3[%c8, %c0_29, %c0_30] : memref<9x3x64xbf16, #tpu.memory_space<vmem>>, vector<1x3x64xbf16>
    %54 = vector.shape_cast %53 : vector<1x3x64xbf16> to vector<3x64xbf16>
    %cst_31 = arith.constant dense<0.000000e+00> : vector<4096x64xf32>
    %55 = tpu.matmul %52, %54, %cst_31 {dimension_numbers = #tpu.dot_dimension_numbers<[1], [0], [0], [1], [0, 0, 1, 1], [], []>} : vector<4096x3xbf16>, vector<3x64xbf16>, vector<4096x64xf32> -> vector<4096x64xf32>
    %56 = arith.addf %50, %55 : vector<4096x64xf32>
    %57 = vector.shape_cast %56 : vector<4096x64xf32> to vector<1x1x4096x64xf32>
    %58 = arith.truncf %57 : vector<1x1x4096x64xf32> to vector<1x1x4096x64xbf16>
    %c0_32 = arith.constant 0 : index
    %c0_33 = arith.constant 0 : index
    %c0_34 = arith.constant 0 : index
    %c0_35 = arith.constant 0 : index
    %59 = vector.load %arg4[%c0_32, %c0_33, %c0_34, %c0_35] : memref<1x1x4096x64xbf16, #tpu.memory_space<vmem>>, vector<1x1x4096x64xbf16>
    tpu.vector_store %arg4[%c0_32, %c0_33, %c0_34, %c0_35], %58 {strides = array<i32>} : memref<1x1x4096x64xbf16, #tpu.memory_space<vmem>>, vector<1x1x4096x64xbf16>,
    %cst_36 = arith.constant dense<0.000000e+00> : vector<64xf32>
    %60 = vector.multi_reduction <add>, %56, %cst_36 [0] : vector<4096x64xf32> to vector<64xf32>
    %61 = vector.shape_cast %60 : vector<64xf32> to vector<1x1x1x64xf32>
    %c0_37 = arith.constant 0 : index
    %c0_38 = arith.constant 0 : index
    %c0_39 = arith.constant 0 : index
    %c0_40 = arith.constant 0 : index
    %62 = vector.load %arg5[%c0_37, %c0_38, %c0_39, %c0_40] : memref<1x1x1x64xf32, #tpu.memory_space<vmem>>, vector<1x1x1x64xf32>
    tpu.vector_store %arg5[%c0_37, %c0_38, %c0_39, %c0_40], %61 {strides = array<i32>} : memref<1x1x1x64xf32, #tpu.memory_space<vmem>>, vector<1x1x1x64xf32>,
    %63 = arith.mulf %56, %56 : vector<4096x64xf32>
    %cst_41 = arith.constant dense<0.000000e+00> : vector<64xf32>
    %64 = vector.multi_reduction <add>, %63, %cst_41 [0] : vector<4096x64xf32> to vector<64xf32>
    %65 = vector.shape_cast %64 : vector<64xf32> to vector<1x1x1x64xf32>
    %c0_42 = arith.constant 0 : index
    %c0_43 = arith.constant 0 : index
    %c0_44 = arith.constant 0 : index
    %c0_45 = arith.constant 0 : index
    %66 = vector.load %arg6[%c0_42, %c0_43, %c0_44, %c0_45] : memref<1x1x1x64xf32, #tpu.memory_space<vmem>>, vector<1x1x1x64xf32>
    tpu.vector_store %arg6[%c0_42, %c0_43, %c0_44, %c0_45], %65 {strides = array<i32>} : memref<1x1x1x64xf32, #tpu.memory_space<vmem>>, vector<1x1x1x64xf32>,
    return
  }
  func.func @transform_0(%arg0: i32, %arg1: i32) -> (i32, i32, i32, i32, i32) {
    %c0_i32 = arith.constant 0 : i32
    %c0_i32_0 = arith.constant 0 : i32
    %c0_i32_1 = arith.constant 0 : i32
    %c0_i32_2 = arith.constant 0 : i32
    return %arg0, %arg1, %c0_i32, %c0_i32_0, %c0_i32_1 : i32, i32, i32, i32, i32
  }
  func.func @transform_1(%arg0: i32, %arg1: i32) -> (i32, i32, i32) {
    %c0_i32 = arith.constant 0 : i32
    %c0_i32_0 = arith.constant 0 : i32
    %c0_i32_1 = arith.constant 0 : i32
    %c0_i32_2 = arith.constant 0 : i32
    return %c0_i32, %c0_i32_0, %c0_i32_1 : i32, i32, i32
  }
  func.func @transform_2(%arg0: i32, %arg1: i32) -> (i32, i32, i32, i32) {
    %c0_i32 = arith.constant 0 : i32
    %c0_i32_0 = arith.constant 0 : i32
    %c0_i32_1 = arith.constant 0 : i32
    return %arg0, %arg1, %c0_i32, %c0_i32_0 : i32, i32, i32, i32
  }
  func.func @transform_3(%arg0: i32, %arg1: i32) -> (i32, i32, i32, i32) {
    %c0_i32 = arith.constant 0 : i32
    %c0_i32_0 = arith.constant 0 : i32
    %c0_i32_1 = arith.constant 0 : i32
    return %arg0, %arg1, %c0_i32, %c0_i32_0 : i32, i32, i32, i32
  }
  func.func @transform_4(%arg0: i32, %arg1: i32) -> (i32, i32, i32, i32) {
    %c0_i32 = arith.constant 0 : i32
    %c0_i32_0 = arith.constant 0 : i32
    %c0_i32_1 = arith.constant 0 : i32
    return %arg0, %arg1, %c0_i32, %c0_i32_0 : i32, i32, i32, i32
  }
}

module attributes {stable_mosaic.version = 11 : i64} {
  func.func @_affine_relu_kernel(%arg0: i32, %arg1: memref<2048x128xbf16, #tpu.memory_space<vmem>>, %arg2: memref<1x128xf32, #tpu.memory_space<vmem>>, %arg3: memref<1x128xf32, #tpu.memory_space<vmem>>, %arg4: memref<2048x128xbf16, #tpu.memory_space<vmem>>) attributes {dimension_semantics = [#tpu.dimension_semantics<parallel>], iteration_bounds = array<i64: 2>, scalar_prefetch = 0 : i64, scratch_operands = 0 : i64, tpu.core_type = #tpu.core_type<tc>, window_params = [{transform_indices = @transform_0, window_bounds = array<i64: 2048, 128>}, {pipeline_mode = #tpu.pipeline_mode<synchronous>, transform_indices = @transform_1, window_bounds = array<i64: 1, 128>}, {pipeline_mode = #tpu.pipeline_mode<synchronous>, transform_indices = @transform_2, window_bounds = array<i64: 1, 128>}, {transform_indices = @transform_3, window_bounds = array<i64: 2048, 128>}]} {
    %c0 = arith.constant 0 : index
    %c0_0 = arith.constant 0 : index
    %0 = vector.load %arg1[%c0, %c0_0] : memref<2048x128xbf16, #tpu.memory_space<vmem>>, vector<2048x128xbf16>
    %1 = arith.extf %0 : vector<2048x128xbf16> to vector<2048x128xf32>
    %c0_1 = arith.constant 0 : index
    %c0_2 = arith.constant 0 : index
    %2 = vector.load %arg2[%c0_1, %c0_2] : memref<1x128xf32, #tpu.memory_space<vmem>>, vector<1x128xf32>
    %3 = vector.broadcast %2 : vector<1x128xf32> to vector<2048x128xf32>
    %4 = arith.mulf %1, %3 : vector<2048x128xf32>
    %c0_3 = arith.constant 0 : index
    %c0_4 = arith.constant 0 : index
    %5 = vector.load %arg3[%c0_3, %c0_4] : memref<1x128xf32, #tpu.memory_space<vmem>>, vector<1x128xf32>
    %6 = vector.broadcast %5 : vector<1x128xf32> to vector<2048x128xf32>
    %7 = arith.addf %4, %6 : vector<2048x128xf32>
    %cst = arith.constant 0.000000e+00 : f32
    %8 = vector.broadcast %cst : f32 to vector<2048x128xf32>
    %9 = arith.maximumf %7, %8 : vector<2048x128xf32>
    %10 = arith.truncf %9 : vector<2048x128xf32> to vector<2048x128xbf16>
    %c0_5 = arith.constant 0 : index
    %c0_6 = arith.constant 0 : index
    %11 = vector.load %arg4[%c0_5, %c0_6] : memref<2048x128xbf16, #tpu.memory_space<vmem>>, vector<2048x128xbf16>
    tpu.vector_store %arg4[%c0_5, %c0_6], %10 {strides = array<i32>} : memref<2048x128xbf16, #tpu.memory_space<vmem>>, vector<2048x128xbf16>,
    return
  }
  func.func @transform_0(%arg0: i32) -> (i32, i32) {
    %c0_i32 = arith.constant 0 : i32
    %c0_i32_0 = arith.constant 0 : i32
    return %arg0, %c0_i32 : i32, i32
  }
  func.func @transform_1(%arg0: i32) -> (i32, i32) {
    %c0_i32 = arith.constant 0 : i32
    %c0_i32_0 = arith.constant 0 : i32
    %c0_i32_1 = arith.constant 0 : i32
    return %c0_i32, %c0_i32_0 : i32, i32
  }
  func.func @transform_2(%arg0: i32) -> (i32, i32) {
    %c0_i32 = arith.constant 0 : i32
    %c0_i32_0 = arith.constant 0 : i32
    %c0_i32_1 = arith.constant 0 : i32
    return %c0_i32, %c0_i32_0 : i32, i32
  }
  func.func @transform_3(%arg0: i32) -> (i32, i32) {
    %c0_i32 = arith.constant 0 : i32
    %c0_i32_0 = arith.constant 0 : i32
    return %arg0, %c0_i32 : i32, i32
  }
}

module attributes {stable_mosaic.version = 11 : i64} {
  func.func @_conv3x3_kernel(%arg0: i32, %arg1: i32, %arg2: memref<1x1x66x66x64xbf16, #tpu.memory_space<vmem>>, %arg3: memref<9x64x64xbf16, #tpu.memory_space<vmem>>, %arg4: memref<1x1x4096x64xbf16, #tpu.memory_space<vmem>>, %arg5: memref<1x1x1x64xf32, #tpu.memory_space<vmem>>, %arg6: memref<1x1x1x64xf32, #tpu.memory_space<vmem>>) attributes {dimension_semantics = [#tpu.dimension_semantics<parallel>, #tpu.dimension_semantics<parallel>], iteration_bounds = array<i64: 2, 1>, scalar_prefetch = 0 : i64, scratch_operands = 0 : i64, tpu.core_type = #tpu.core_type<tc>, window_params = [{transform_indices = @transform_0, window_bounds = array<i64: 1, 1, 66, 66, 64>}, {pipeline_mode = #tpu.pipeline_mode<synchronous>, transform_indices = @transform_1, window_bounds = array<i64: 9, 64, 64>}, {transform_indices = @transform_2, window_bounds = array<i64: 1, 1, 4096, 64>}, {transform_indices = @transform_3, window_bounds = array<i64: 1, 1, 1, 64>}, {transform_indices = @transform_4, window_bounds = array<i64: 1, 1, 1, 64>}]} {
    %c0 = arith.constant 0 : index
    %c0_0 = arith.constant 0 : index
    %c0_1 = arith.constant 0 : index
    %c0_2 = arith.constant 0 : index
    %c0_3 = arith.constant 0 : index
    %0 = vector.load %arg2[%c0, %c0_0, %c0_1, %c0_2, %c0_3] : memref<1x1x66x66x64xbf16, #tpu.memory_space<vmem>>, vector<1x1x66x66x64xbf16>
    %1 = vector.shape_cast %0 : vector<1x1x66x66x64xbf16> to vector<66x66x64xbf16>
    %cst = arith.constant 0.000000e+00 : f32
    %2 = vector.broadcast %cst : f32 to vector<4096x64xf32>
    %3 = vector.extract_strided_slice %1 {offsets = [0, 0, 0], sizes = [64, 64, 64], strides = [1, 1, 1]} : vector<66x66x64xbf16> to vector<64x64x64xbf16>
    %4 = vector.shape_cast %3 : vector<64x64x64xbf16> to vector<4096x64xbf16>
    %c0_4 = arith.constant 0 : index
    %c0_5 = arith.constant 0 : index
    %c0_6 = arith.constant 0 : index
    %5 = vector.load %arg3[%c0_4, %c0_5, %c0_6] : memref<9x64x64xbf16, #tpu.memory_space<vmem>>, vector<1x64x64xbf16>
    %6 = vector.shape_cast %5 : vector<1x64x64xbf16> to vector<64x64xbf16>
    %cst_7 = arith.constant dense<0.000000e+00> : vector<4096x64xf32>
    %7 = tpu.matmul %4, %6, %cst_7 {dimension_numbers = #tpu.dot_dimension_numbers<[1], [0], [0], [1], [0, 0, 1, 1], [], []>} : vector<4096x64xbf16>, vector<64x64xbf16>, vector<4096x64xf32> -> vector<4096x64xf32>
    %8 = arith.addf %2, %7 : vector<4096x64xf32>
    %9 = vector.extract_strided_slice %1 {offsets = [0, 1, 0], sizes = [64, 64, 64], strides = [1, 1, 1]} : vector<66x66x64xbf16> to vector<64x64x64xbf16>
    %10 = vector.shape_cast %9 : vector<64x64x64xbf16> to vector<4096x64xbf16>
    %c1 = arith.constant 1 : index
    %c0_8 = arith.constant 0 : index
    %c0_9 = arith.constant 0 : index
    %11 = vector.load %arg3[%c1, %c0_8, %c0_9] : memref<9x64x64xbf16, #tpu.memory_space<vmem>>, vector<1x64x64xbf16>
    %12 = vector.shape_cast %11 : vector<1x64x64xbf16> to vector<64x64xbf16>
    %cst_10 = arith.constant dense<0.000000e+00> : vector<4096x64xf32>
    %13 = tpu.matmul %10, %12, %cst_10 {dimension_numbers = #tpu.dot_dimension_numbers<[1], [0], [0], [1], [0, 0, 1, 1], [], []>} : vector<4096x64xbf16>, vector<64x64xbf16>, vector<4096x64xf32> -> vector<4096x64xf32>
    %14 = arith.addf %8, %13 : vector<4096x64xf32>
    %15 = vector.extract_strided_slice %1 {offsets = [0, 2, 0], sizes = [64, 64, 64], strides = [1, 1, 1]} : vector<66x66x64xbf16> to vector<64x64x64xbf16>
    %16 = vector.shape_cast %15 : vector<64x64x64xbf16> to vector<4096x64xbf16>
    %c2 = arith.constant 2 : index
    %c0_11 = arith.constant 0 : index
    %c0_12 = arith.constant 0 : index
    %17 = vector.load %arg3[%c2, %c0_11, %c0_12] : memref<9x64x64xbf16, #tpu.memory_space<vmem>>, vector<1x64x64xbf16>
    %18 = vector.shape_cast %17 : vector<1x64x64xbf16> to vector<64x64xbf16>
    %cst_13 = arith.constant dense<0.000000e+00> : vector<4096x64xf32>
    %19 = tpu.matmul %16, %18, %cst_13 {dimension_numbers = #tpu.dot_dimension_numbers<[1], [0], [0], [1], [0, 0, 1, 1], [], []>} : vector<4096x64xbf16>, vector<64x64xbf16>, vector<4096x64xf32> -> vector<4096x64xf32>
    %20 = arith.addf %14, %19 : vector<4096x64xf32>
    %21 = vector.extract_strided_slice %1 {offsets = [1, 0, 0], sizes = [64, 64, 64], strides = [1, 1, 1]} : vector<66x66x64xbf16> to vector<64x64x64xbf16>
    %22 = vector.shape_cast %21 : vector<64x64x64xbf16> to vector<4096x64xbf16>
    %c3 = arith.constant 3 : index
    %c0_14 = arith.constant 0 : index
    %c0_15 = arith.constant 0 : index
    %23 = vector.load %arg3[%c3, %c0_14, %c0_15] : memref<9x64x64xbf16, #tpu.memory_space<vmem>>, vector<1x64x64xbf16>
    %24 = vector.shape_cast %23 : vector<1x64x64xbf16> to vector<64x64xbf16>
    %cst_16 = arith.constant dense<0.000000e+00> : vector<4096x64xf32>
    %25 = tpu.matmul %22, %24, %cst_16 {dimension_numbers = #tpu.dot_dimension_numbers<[1], [0], [0], [1], [0, 0, 1, 1], [], []>} : vector<4096x64xbf16>, vector<64x64xbf16>, vector<4096x64xf32> -> vector<4096x64xf32>
    %26 = arith.addf %20, %25 : vector<4096x64xf32>
    %27 = vector.extract_strided_slice %1 {offsets = [1, 1, 0], sizes = [64, 64, 64], strides = [1, 1, 1]} : vector<66x66x64xbf16> to vector<64x64x64xbf16>
    %28 = vector.shape_cast %27 : vector<64x64x64xbf16> to vector<4096x64xbf16>
    %c4 = arith.constant 4 : index
    %c0_17 = arith.constant 0 : index
    %c0_18 = arith.constant 0 : index
    %29 = vector.load %arg3[%c4, %c0_17, %c0_18] : memref<9x64x64xbf16, #tpu.memory_space<vmem>>, vector<1x64x64xbf16>
    %30 = vector.shape_cast %29 : vector<1x64x64xbf16> to vector<64x64xbf16>
    %cst_19 = arith.constant dense<0.000000e+00> : vector<4096x64xf32>
    %31 = tpu.matmul %28, %30, %cst_19 {dimension_numbers = #tpu.dot_dimension_numbers<[1], [0], [0], [1], [0, 0, 1, 1], [], []>} : vector<4096x64xbf16>, vector<64x64xbf16>, vector<4096x64xf32> -> vector<4096x64xf32>
    %32 = arith.addf %26, %31 : vector<4096x64xf32>
    %33 = vector.extract_strided_slice %1 {offsets = [1, 2, 0], sizes = [64, 64, 64], strides = [1, 1, 1]} : vector<66x66x64xbf16> to vector<64x64x64xbf16>
    %34 = vector.shape_cast %33 : vector<64x64x64xbf16> to vector<4096x64xbf16>
    %c5 = arith.constant 5 : index
    %c0_20 = arith.constant 0 : index
    %c0_21 = arith.constant 0 : index
    %35 = vector.load %arg3[%c5, %c0_20, %c0_21] : memref<9x64x64xbf16, #tpu.memory_space<vmem>>, vector<1x64x64xbf16>
    %36 = vector.shape_cast %35 : vector<1x64x64xbf16> to vector<64x64xbf16>
    %cst_22 = arith.constant dense<0.000000e+00> : vector<4096x64xf32>
    %37 = tpu.matmul %34, %36, %cst_22 {dimension_numbers = #tpu.dot_dimension_numbers<[1], [0], [0], [1], [0, 0, 1, 1], [], []>} : vector<4096x64xbf16>, vector<64x64xbf16>, vector<4096x64xf32> -> vector<4096x64xf32>
    %38 = arith.addf %32, %37 : vector<4096x64xf32>
    %39 = vector.extract_strided_slice %1 {offsets = [2, 0, 0], sizes = [64, 64, 64], strides = [1, 1, 1]} : vector<66x66x64xbf16> to vector<64x64x64xbf16>
    %40 = vector.shape_cast %39 : vector<64x64x64xbf16> to vector<4096x64xbf16>
    %c6 = arith.constant 6 : index
    %c0_23 = arith.constant 0 : index
    %c0_24 = arith.constant 0 : index
    %41 = vector.load %arg3[%c6, %c0_23, %c0_24] : memref<9x64x64xbf16, #tpu.memory_space<vmem>>, vector<1x64x64xbf16>
    %42 = vector.shape_cast %41 : vector<1x64x64xbf16> to vector<64x64xbf16>
    %cst_25 = arith.constant dense<0.000000e+00> : vector<4096x64xf32>
    %43 = tpu.matmul %40, %42, %cst_25 {dimension_numbers = #tpu.dot_dimension_numbers<[1], [0], [0], [1], [0, 0, 1, 1], [], []>} : vector<4096x64xbf16>, vector<64x64xbf16>, vector<4096x64xf32> -> vector<4096x64xf32>
    %44 = arith.addf %38, %43 : vector<4096x64xf32>
    %45 = vector.extract_strided_slice %1 {offsets = [2, 1, 0], sizes = [64, 64, 64], strides = [1, 1, 1]} : vector<66x66x64xbf16> to vector<64x64x64xbf16>
    %46 = vector.shape_cast %45 : vector<64x64x64xbf16> to vector<4096x64xbf16>
    %c7 = arith.constant 7 : index
    %c0_26 = arith.constant 0 : index
    %c0_27 = arith.constant 0 : index
    %47 = vector.load %arg3[%c7, %c0_26, %c0_27] : memref<9x64x64xbf16, #tpu.memory_space<vmem>>, vector<1x64x64xbf16>
    %48 = vector.shape_cast %47 : vector<1x64x64xbf16> to vector<64x64xbf16>
    %cst_28 = arith.constant dense<0.000000e+00> : vector<4096x64xf32>
    %49 = tpu.matmul %46, %48, %cst_28 {dimension_numbers = #tpu.dot_dimension_numbers<[1], [0], [0], [1], [0, 0, 1, 1], [], []>} : vector<4096x64xbf16>, vector<64x64xbf16>, vector<4096x64xf32> -> vector<4096x64xf32>
    %50 = arith.addf %44, %49 : vector<4096x64xf32>
    %51 = vector.extract_strided_slice %1 {offsets = [2, 2, 0], sizes = [64, 64, 64], strides = [1, 1, 1]} : vector<66x66x64xbf16> to vector<64x64x64xbf16>
    %52 = vector.shape_cast %51 : vector<64x64x64xbf16> to vector<4096x64xbf16>
    %c8 = arith.constant 8 : index
    %c0_29 = arith.constant 0 : index
    %c0_30 = arith.constant 0 : index
    %53 = vector.load %arg3[%c8, %c0_29, %c0_30] : memref<9x64x64xbf16, #tpu.memory_space<vmem>>, vector<1x64x64xbf16>
    %54 = vector.shape_cast %53 : vector<1x64x64xbf16> to vector<64x64xbf16>
    %cst_31 = arith.constant dense<0.000000e+00> : vector<4096x64xf32>
    %55 = tpu.matmul %52, %54, %cst_31 {dimension_numbers = #tpu.dot_dimension_numbers<[1], [0], [0], [1], [0, 0, 1, 1], [], []>} : vector<4096x64xbf16>, vector<64x64xbf16>, vector<4096x64xf32> -> vector<4096x64xf32>
    %56 = arith.addf %50, %55 : vector<4096x64xf32>
    %57 = vector.shape_cast %56 : vector<4096x64xf32> to vector<1x1x4096x64xf32>
    %58 = arith.truncf %57 : vector<1x1x4096x64xf32> to vector<1x1x4096x64xbf16>
    %c0_32 = arith.constant 0 : index
    %c0_33 = arith.constant 0 : index
    %c0_34 = arith.constant 0 : index
    %c0_35 = arith.constant 0 : index
    %59 = vector.load %arg4[%c0_32, %c0_33, %c0_34, %c0_35] : memref<1x1x4096x64xbf16, #tpu.memory_space<vmem>>, vector<1x1x4096x64xbf16>
    tpu.vector_store %arg4[%c0_32, %c0_33, %c0_34, %c0_35], %58 {strides = array<i32>} : memref<1x1x4096x64xbf16, #tpu.memory_space<vmem>>, vector<1x1x4096x64xbf16>,
    %cst_36 = arith.constant dense<0.000000e+00> : vector<64xf32>
    %60 = vector.multi_reduction <add>, %56, %cst_36 [0] : vector<4096x64xf32> to vector<64xf32>
    %61 = vector.shape_cast %60 : vector<64xf32> to vector<1x1x1x64xf32>
    %c0_37 = arith.constant 0 : index
    %c0_38 = arith.constant 0 : index
    %c0_39 = arith.constant 0 : index
    %c0_40 = arith.constant 0 : index
    %62 = vector.load %arg5[%c0_37, %c0_38, %c0_39, %c0_40] : memref<1x1x1x64xf32, #tpu.memory_space<vmem>>, vector<1x1x1x64xf32>
    tpu.vector_store %arg5[%c0_37, %c0_38, %c0_39, %c0_40], %61 {strides = array<i32>} : memref<1x1x1x64xf32, #tpu.memory_space<vmem>>, vector<1x1x1x64xf32>,
    %63 = arith.mulf %56, %56 : vector<4096x64xf32>
    %cst_41 = arith.constant dense<0.000000e+00> : vector<64xf32>
    %64 = vector.multi_reduction <add>, %63, %cst_41 [0] : vector<4096x64xf32> to vector<64xf32>
    %65 = vector.shape_cast %64 : vector<64xf32> to vector<1x1x1x64xf32>
    %c0_42 = arith.constant 0 : index
    %c0_43 = arith.constant 0 : index
    %c0_44 = arith.constant 0 : index
    %c0_45 = arith.constant 0 : index
    %66 = vector.load %arg6[%c0_42, %c0_43, %c0_44, %c0_45] : memref<1x1x1x64xf32, #tpu.memory_space<vmem>>, vector<1x1x1x64xf32>
    tpu.vector_store %arg6[%c0_42, %c0_43, %c0_44, %c0_45], %65 {strides = array<i32>} : memref<1x1x1x64xf32, #tpu.memory_space<vmem>>, vector<1x1x1x64xf32>,
    return
  }
  func.func @transform_0(%arg0: i32, %arg1: i32) -> (i32, i32, i32, i32, i32) {
    %c0_i32 = arith.constant 0 : i32
    %c0_i32_0 = arith.constant 0 : i32
    %c0_i32_1 = arith.constant 0 : i32
    %c0_i32_2 = arith.constant 0 : i32
    return %arg0, %arg1, %c0_i32, %c0_i32_0, %c0_i32_1 : i32, i32, i32, i32, i32
  }
  func.func @transform_1(%arg0: i32, %arg1: i32) -> (i32, i32, i32) {
    %c0_i32 = arith.constant 0 : i32
    %c0_i32_0 = arith.constant 0 : i32
    %c0_i32_1 = arith.constant 0 : i32
    %c0_i32_2 = arith.constant 0 : i32
    return %c0_i32, %c0_i32_0, %c0_i32_1 : i32, i32, i32
  }
  func.func @transform_2(%arg0: i32, %arg1: i32) -> (i32, i32, i32, i32) {
    %c0_i32 = arith.constant 0 : i32
    %c0_i32_0 = arith.constant 0 : i32
    %c0_i32_1 = arith.constant 0 : i32
    return %arg0, %arg1, %c0_i32, %c0_i32_0 : i32, i32, i32, i32
  }
  func.func @transform_3(%arg0: i32, %arg1: i32) -> (i32, i32, i32, i32) {
    %c0_i32 = arith.constant 0 : i32
    %c0_i32_0 = arith.constant 0 : i32
    %c0_i32_1 = arith.constant 0 : i32
    return %arg0, %arg1, %c0_i32, %c0_i32_0 : i32, i32, i32, i32
  }
  func.func @transform_4(%arg0: i32, %arg1: i32) -> (i32, i32, i32, i32) {
    %c0_i32 = arith.constant 0 : i32
    %c0_i32_0 = arith.constant 0 : i32
    %c0_i32_1 = arith.constant 0 : i32
    return %arg0, %arg1, %c0_i32, %c0_i32_0 : i32, i32, i32, i32
  }
}

module attributes {stable_mosaic.version = 11 : i64} {
  func.func @_conv3x3_kernel(%arg0: i32, %arg1: i32, %arg2: memref<1x1x34x34x64xbf16, #tpu.memory_space<vmem>>, %arg3: memref<9x64x128xbf16, #tpu.memory_space<vmem>>, %arg4: memref<1x1x1024x128xbf16, #tpu.memory_space<vmem>>, %arg5: memref<1x1x1x128xf32, #tpu.memory_space<vmem>>, %arg6: memref<1x1x1x128xf32, #tpu.memory_space<vmem>>) attributes {dimension_semantics = [#tpu.dimension_semantics<parallel>, #tpu.dimension_semantics<parallel>], iteration_bounds = array<i64: 2, 1>, scalar_prefetch = 0 : i64, scratch_operands = 0 : i64, tpu.core_type = #tpu.core_type<tc>, window_params = [{transform_indices = @transform_0, window_bounds = array<i64: 1, 1, 34, 34, 64>}, {pipeline_mode = #tpu.pipeline_mode<synchronous>, transform_indices = @transform_1, window_bounds = array<i64: 9, 64, 128>}, {transform_indices = @transform_2, window_bounds = array<i64: 1, 1, 1024, 128>}, {transform_indices = @transform_3, window_bounds = array<i64: 1, 1, 1, 128>}, {transform_indices = @transform_4, window_bounds = array<i64: 1, 1, 1, 128>}]} {
    %c0 = arith.constant 0 : index
    %c0_0 = arith.constant 0 : index
    %c0_1 = arith.constant 0 : index
    %c0_2 = arith.constant 0 : index
    %c0_3 = arith.constant 0 : index
    %0 = vector.load %arg2[%c0, %c0_0, %c0_1, %c0_2, %c0_3] : memref<1x1x34x34x64xbf16, #tpu.memory_space<vmem>>, vector<1x1x34x34x64xbf16>
    %1 = vector.shape_cast %0 : vector<1x1x34x34x64xbf16> to vector<34x34x64xbf16>
    %cst = arith.constant 0.000000e+00 : f32
    %2 = vector.broadcast %cst : f32 to vector<1024x128xf32>
    %3 = vector.extract_strided_slice %1 {offsets = [0, 0, 0], sizes = [32, 32, 64], strides = [1, 1, 1]} : vector<34x34x64xbf16> to vector<32x32x64xbf16>
    %4 = vector.shape_cast %3 : vector<32x32x64xbf16> to vector<1024x64xbf16>
    %c0_4 = arith.constant 0 : index
    %c0_5 = arith.constant 0 : index
    %c0_6 = arith.constant 0 : index
    %5 = vector.load %arg3[%c0_4, %c0_5, %c0_6] : memref<9x64x128xbf16, #tpu.memory_space<vmem>>, vector<1x64x128xbf16>
    %6 = vector.shape_cast %5 : vector<1x64x128xbf16> to vector<64x128xbf16>
    %cst_7 = arith.constant dense<0.000000e+00> : vector<1024x128xf32>
    %7 = tpu.matmul %4, %6, %cst_7 {dimension_numbers = #tpu.dot_dimension_numbers<[1], [0], [0], [1], [0, 0, 1, 1], [], []>} : vector<1024x64xbf16>, vector<64x128xbf16>, vector<1024x128xf32> -> vector<1024x128xf32>
    %8 = arith.addf %2, %7 : vector<1024x128xf32>
    %9 = vector.extract_strided_slice %1 {offsets = [0, 1, 0], sizes = [32, 32, 64], strides = [1, 1, 1]} : vector<34x34x64xbf16> to vector<32x32x64xbf16>
    %10 = vector.shape_cast %9 : vector<32x32x64xbf16> to vector<1024x64xbf16>
    %c1 = arith.constant 1 : index
    %c0_8 = arith.constant 0 : index
    %c0_9 = arith.constant 0 : index
    %11 = vector.load %arg3[%c1, %c0_8, %c0_9] : memref<9x64x128xbf16, #tpu.memory_space<vmem>>, vector<1x64x128xbf16>
    %12 = vector.shape_cast %11 : vector<1x64x128xbf16> to vector<64x128xbf16>
    %cst_10 = arith.constant dense<0.000000e+00> : vector<1024x128xf32>
    %13 = tpu.matmul %10, %12, %cst_10 {dimension_numbers = #tpu.dot_dimension_numbers<[1], [0], [0], [1], [0, 0, 1, 1], [], []>} : vector<1024x64xbf16>, vector<64x128xbf16>, vector<1024x128xf32> -> vector<1024x128xf32>
    %14 = arith.addf %8, %13 : vector<1024x128xf32>
    %15 = vector.extract_strided_slice %1 {offsets = [0, 2, 0], sizes = [32, 32, 64], strides = [1, 1, 1]} : vector<34x34x64xbf16> to vector<32x32x64xbf16>
    %16 = vector.shape_cast %15 : vector<32x32x64xbf16> to vector<1024x64xbf16>
    %c2 = arith.constant 2 : index
    %c0_11 = arith.constant 0 : index
    %c0_12 = arith.constant 0 : index
    %17 = vector.load %arg3[%c2, %c0_11, %c0_12] : memref<9x64x128xbf16, #tpu.memory_space<vmem>>, vector<1x64x128xbf16>
    %18 = vector.shape_cast %17 : vector<1x64x128xbf16> to vector<64x128xbf16>
    %cst_13 = arith.constant dense<0.000000e+00> : vector<1024x128xf32>
    %19 = tpu.matmul %16, %18, %cst_13 {dimension_numbers = #tpu.dot_dimension_numbers<[1], [0], [0], [1], [0, 0, 1, 1], [], []>} : vector<1024x64xbf16>, vector<64x128xbf16>, vector<1024x128xf32> -> vector<1024x128xf32>
    %20 = arith.addf %14, %19 : vector<1024x128xf32>
    %21 = vector.extract_strided_slice %1 {offsets = [1, 0, 0], sizes = [32, 32, 64], strides = [1, 1, 1]} : vector<34x34x64xbf16> to vector<32x32x64xbf16>
    %22 = vector.shape_cast %21 : vector<32x32x64xbf16> to vector<1024x64xbf16>
    %c3 = arith.constant 3 : index
    %c0_14 = arith.constant 0 : index
    %c0_15 = arith.constant 0 : index
    %23 = vector.load %arg3[%c3, %c0_14, %c0_15] : memref<9x64x128xbf16, #tpu.memory_space<vmem>>, vector<1x64x128xbf16>
    %24 = vector.shape_cast %23 : vector<1x64x128xbf16> to vector<64x128xbf16>
    %cst_16 = arith.constant dense<0.000000e+00> : vector<1024x128xf32>
    %25 = tpu.matmul %22, %24, %cst_16 {dimension_numbers = #tpu.dot_dimension_numbers<[1], [0], [0], [1], [0, 0, 1, 1], [], []>} : vector<1024x64xbf16>, vector<64x128xbf16>, vector<1024x128xf32> -> vector<1024x128xf32>
    %26 = arith.addf %20, %25 : vector<1024x128xf32>
    %27 = vector.extract_strided_slice %1 {offsets = [1, 1, 0], sizes = [32, 32, 64], strides = [1, 1, 1]} : vector<34x34x64xbf16> to vector<32x32x64xbf16>
    %28 = vector.shape_cast %27 : vector<32x32x64xbf16> to vector<1024x64xbf16>
    %c4 = arith.constant 4 : index
    %c0_17 = arith.constant 0 : index
    %c0_18 = arith.constant 0 : index
    %29 = vector.load %arg3[%c4, %c0_17, %c0_18] : memref<9x64x128xbf16, #tpu.memory_space<vmem>>, vector<1x64x128xbf16>
    %30 = vector.shape_cast %29 : vector<1x64x128xbf16> to vector<64x128xbf16>
    %cst_19 = arith.constant dense<0.000000e+00> : vector<1024x128xf32>
    %31 = tpu.matmul %28, %30, %cst_19 {dimension_numbers = #tpu.dot_dimension_numbers<[1], [0], [0], [1], [0, 0, 1, 1], [], []>} : vector<1024x64xbf16>, vector<64x128xbf16>, vector<1024x128xf32> -> vector<1024x128xf32>
    %32 = arith.addf %26, %31 : vector<1024x128xf32>
    %33 = vector.extract_strided_slice %1 {offsets = [1, 2, 0], sizes = [32, 32, 64], strides = [1, 1, 1]} : vector<34x34x64xbf16> to vector<32x32x64xbf16>
    %34 = vector.shape_cast %33 : vector<32x32x64xbf16> to vector<1024x64xbf16>
    %c5 = arith.constant 5 : index
    %c0_20 = arith.constant 0 : index
    %c0_21 = arith.constant 0 : index
    %35 = vector.load %arg3[%c5, %c0_20, %c0_21] : memref<9x64x128xbf16, #tpu.memory_space<vmem>>, vector<1x64x128xbf16>
    %36 = vector.shape_cast %35 : vector<1x64x128xbf16> to vector<64x128xbf16>
    %cst_22 = arith.constant dense<0.000000e+00> : vector<1024x128xf32>
    %37 = tpu.matmul %34, %36, %cst_22 {dimension_numbers = #tpu.dot_dimension_numbers<[1], [0], [0], [1], [0, 0, 1, 1], [], []>} : vector<1024x64xbf16>, vector<64x128xbf16>, vector<1024x128xf32> -> vector<1024x128xf32>
    %38 = arith.addf %32, %37 : vector<1024x128xf32>
    %39 = vector.extract_strided_slice %1 {offsets = [2, 0, 0], sizes = [32, 32, 64], strides = [1, 1, 1]} : vector<34x34x64xbf16> to vector<32x32x64xbf16>
    %40 = vector.shape_cast %39 : vector<32x32x64xbf16> to vector<1024x64xbf16>
    %c6 = arith.constant 6 : index
    %c0_23 = arith.constant 0 : index
    %c0_24 = arith.constant 0 : index
    %41 = vector.load %arg3[%c6, %c0_23, %c0_24] : memref<9x64x128xbf16, #tpu.memory_space<vmem>>, vector<1x64x128xbf16>
    %42 = vector.shape_cast %41 : vector<1x64x128xbf16> to vector<64x128xbf16>
    %cst_25 = arith.constant dense<0.000000e+00> : vector<1024x128xf32>
    %43 = tpu.matmul %40, %42, %cst_25 {dimension_numbers = #tpu.dot_dimension_numbers<[1], [0], [0], [1], [0, 0, 1, 1], [], []>} : vector<1024x64xbf16>, vector<64x128xbf16>, vector<1024x128xf32> -> vector<1024x128xf32>
    %44 = arith.addf %38, %43 : vector<1024x128xf32>
    %45 = vector.extract_strided_slice %1 {offsets = [2, 1, 0], sizes = [32, 32, 64], strides = [1, 1, 1]} : vector<34x34x64xbf16> to vector<32x32x64xbf16>
    %46 = vector.shape_cast %45 : vector<32x32x64xbf16> to vector<1024x64xbf16>
    %c7 = arith.constant 7 : index
    %c0_26 = arith.constant 0 : index
    %c0_27 = arith.constant 0 : index
    %47 = vector.load %arg3[%c7, %c0_26, %c0_27] : memref<9x64x128xbf16, #tpu.memory_space<vmem>>, vector<1x64x128xbf16>
    %48 = vector.shape_cast %47 : vector<1x64x128xbf16> to vector<64x128xbf16>
    %cst_28 = arith.constant dense<0.000000e+00> : vector<1024x128xf32>
    %49 = tpu.matmul %46, %48, %cst_28 {dimension_numbers = #tpu.dot_dimension_numbers<[1], [0], [0], [1], [0, 0, 1, 1], [], []>} : vector<1024x64xbf16>, vector<64x128xbf16>, vector<1024x128xf32> -> vector<1024x128xf32>
    %50 = arith.addf %44, %49 : vector<1024x128xf32>
    %51 = vector.extract_strided_slice %1 {offsets = [2, 2, 0], sizes = [32, 32, 64], strides = [1, 1, 1]} : vector<34x34x64xbf16> to vector<32x32x64xbf16>
    %52 = vector.shape_cast %51 : vector<32x32x64xbf16> to vector<1024x64xbf16>
    %c8 = arith.constant 8 : index
    %c0_29 = arith.constant 0 : index
    %c0_30 = arith.constant 0 : index
    %53 = vector.load %arg3[%c8, %c0_29, %c0_30] : memref<9x64x128xbf16, #tpu.memory_space<vmem>>, vector<1x64x128xbf16>
    %54 = vector.shape_cast %53 : vector<1x64x128xbf16> to vector<64x128xbf16>
    %cst_31 = arith.constant dense<0.000000e+00> : vector<1024x128xf32>
    %55 = tpu.matmul %52, %54, %cst_31 {dimension_numbers = #tpu.dot_dimension_numbers<[1], [0], [0], [1], [0, 0, 1, 1], [], []>} : vector<1024x64xbf16>, vector<64x128xbf16>, vector<1024x128xf32> -> vector<1024x128xf32>
    %56 = arith.addf %50, %55 : vector<1024x128xf32>
    %57 = vector.shape_cast %56 : vector<1024x128xf32> to vector<1x1x1024x128xf32>
    %58 = arith.truncf %57 : vector<1x1x1024x128xf32> to vector<1x1x1024x128xbf16>
    %c0_32 = arith.constant 0 : index
    %c0_33 = arith.constant 0 : index
    %c0_34 = arith.constant 0 : index
    %c0_35 = arith.constant 0 : index
    %59 = vector.load %arg4[%c0_32, %c0_33, %c0_34, %c0_35] : memref<1x1x1024x128xbf16, #tpu.memory_space<vmem>>, vector<1x1x1024x128xbf16>
    tpu.vector_store %arg4[%c0_32, %c0_33, %c0_34, %c0_35], %58 {strides = array<i32>} : memref<1x1x1024x128xbf16, #tpu.memory_space<vmem>>, vector<1x1x1024x128xbf16>,
    %cst_36 = arith.constant dense<0.000000e+00> : vector<128xf32>
    %60 = vector.multi_reduction <add>, %56, %cst_36 [0] : vector<1024x128xf32> to vector<128xf32>
    %61 = vector.shape_cast %60 : vector<128xf32> to vector<1x1x1x128xf32>
    %c0_37 = arith.constant 0 : index
    %c0_38 = arith.constant 0 : index
    %c0_39 = arith.constant 0 : index
    %c0_40 = arith.constant 0 : index
    %62 = vector.load %arg5[%c0_37, %c0_38, %c0_39, %c0_40] : memref<1x1x1x128xf32, #tpu.memory_space<vmem>>, vector<1x1x1x128xf32>
    tpu.vector_store %arg5[%c0_37, %c0_38, %c0_39, %c0_40], %61 {strides = array<i32>} : memref<1x1x1x128xf32, #tpu.memory_space<vmem>>, vector<1x1x1x128xf32>,
    %63 = arith.mulf %56, %56 : vector<1024x128xf32>
    %cst_41 = arith.constant dense<0.000000e+00> : vector<128xf32>
    %64 = vector.multi_reduction <add>, %63, %cst_41 [0] : vector<1024x128xf32> to vector<128xf32>
    %65 = vector.shape_cast %64 : vector<128xf32> to vector<1x1x1x128xf32>
    %c0_42 = arith.constant 0 : index
    %c0_43 = arith.constant 0 : index
    %c0_44 = arith.constant 0 : index
    %c0_45 = arith.constant 0 : index
    %66 = vector.load %arg6[%c0_42, %c0_43, %c0_44, %c0_45] : memref<1x1x1x128xf32, #tpu.memory_space<vmem>>, vector<1x1x1x128xf32>
    tpu.vector_store %arg6[%c0_42, %c0_43, %c0_44, %c0_45], %65 {strides = array<i32>} : memref<1x1x1x128xf32, #tpu.memory_space<vmem>>, vector<1x1x1x128xf32>,
    return
  }
  func.func @transform_0(%arg0: i32, %arg1: i32) -> (i32, i32, i32, i32, i32) {
    %c0_i32 = arith.constant 0 : i32
    %c0_i32_0 = arith.constant 0 : i32
    %c0_i32_1 = arith.constant 0 : i32
    %c0_i32_2 = arith.constant 0 : i32
    return %arg0, %arg1, %c0_i32, %c0_i32_0, %c0_i32_1 : i32, i32, i32, i32, i32
  }
  func.func @transform_1(%arg0: i32, %arg1: i32) -> (i32, i32, i32) {
    %c0_i32 = arith.constant 0 : i32
    %c0_i32_0 = arith.constant 0 : i32
    %c0_i32_1 = arith.constant 0 : i32
    %c0_i32_2 = arith.constant 0 : i32
    return %c0_i32, %c0_i32_0, %c0_i32_1 : i32, i32, i32
  }
  func.func @transform_2(%arg0: i32, %arg1: i32) -> (i32, i32, i32, i32) {
    %c0_i32 = arith.constant 0 : i32
    %c0_i32_0 = arith.constant 0 : i32
    %c0_i32_1 = arith.constant 0 : i32
    return %arg0, %arg1, %c0_i32, %c0_i32_0 : i32, i32, i32, i32
  }
  func.func @transform_3(%arg0: i32, %arg1: i32) -> (i32, i32, i32, i32) {
    %c0_i32 = arith.constant 0 : i32
    %c0_i32_0 = arith.constant 0 : i32
    %c0_i32_1 = arith.constant 0 : i32
    return %arg0, %arg1, %c0_i32, %c0_i32_0 : i32, i32, i32, i32
  }
  func.func @transform_4(%arg0: i32, %arg1: i32) -> (i32, i32, i32, i32) {
    %c0_i32 = arith.constant 0 : i32
    %c0_i32_0 = arith.constant 0 : i32
    %c0_i32_1 = arith.constant 0 : i32
    return %arg0, %arg1, %c0_i32, %c0_i32_0 : i32, i32, i32, i32
  }
}

module attributes {stable_mosaic.version = 11 : i64} {
  func.func @_affine_relu_kernel(%arg0: i32, %arg1: memref<2048x128xbf16, #tpu.memory_space<vmem>>, %arg2: memref<1x128xf32, #tpu.memory_space<vmem>>, %arg3: memref<1x128xf32, #tpu.memory_space<vmem>>, %arg4: memref<2048x128xbf16, #tpu.memory_space<vmem>>) attributes {dimension_semantics = [#tpu.dimension_semantics<parallel>], iteration_bounds = array<i64: 1>, scalar_prefetch = 0 : i64, scratch_operands = 0 : i64, tpu.core_type = #tpu.core_type<tc>, window_params = [{transform_indices = @transform_0, window_bounds = array<i64: 2048, 128>}, {pipeline_mode = #tpu.pipeline_mode<synchronous>, transform_indices = @transform_1, window_bounds = array<i64: 1, 128>}, {pipeline_mode = #tpu.pipeline_mode<synchronous>, transform_indices = @transform_2, window_bounds = array<i64: 1, 128>}, {transform_indices = @transform_3, window_bounds = array<i64: 2048, 128>}]} {
    %c0 = arith.constant 0 : index
    %c0_0 = arith.constant 0 : index
    %0 = vector.load %arg1[%c0, %c0_0] : memref<2048x128xbf16, #tpu.memory_space<vmem>>, vector<2048x128xbf16>
    %1 = arith.extf %0 : vector<2048x128xbf16> to vector<2048x128xf32>
    %c0_1 = arith.constant 0 : index
    %c0_2 = arith.constant 0 : index
    %2 = vector.load %arg2[%c0_1, %c0_2] : memref<1x128xf32, #tpu.memory_space<vmem>>, vector<1x128xf32>
    %3 = vector.broadcast %2 : vector<1x128xf32> to vector<2048x128xf32>
    %4 = arith.mulf %1, %3 : vector<2048x128xf32>
    %c0_3 = arith.constant 0 : index
    %c0_4 = arith.constant 0 : index
    %5 = vector.load %arg3[%c0_3, %c0_4] : memref<1x128xf32, #tpu.memory_space<vmem>>, vector<1x128xf32>
    %6 = vector.broadcast %5 : vector<1x128xf32> to vector<2048x128xf32>
    %7 = arith.addf %4, %6 : vector<2048x128xf32>
    %cst = arith.constant 0.000000e+00 : f32
    %8 = vector.broadcast %cst : f32 to vector<2048x128xf32>
    %9 = arith.maximumf %7, %8 : vector<2048x128xf32>
    %10 = arith.truncf %9 : vector<2048x128xf32> to vector<2048x128xbf16>
    %c0_5 = arith.constant 0 : index
    %c0_6 = arith.constant 0 : index
    %11 = vector.load %arg4[%c0_5, %c0_6] : memref<2048x128xbf16, #tpu.memory_space<vmem>>, vector<2048x128xbf16>
    tpu.vector_store %arg4[%c0_5, %c0_6], %10 {strides = array<i32>} : memref<2048x128xbf16, #tpu.memory_space<vmem>>, vector<2048x128xbf16>,
    return
  }
  func.func @transform_0(%arg0: i32) -> (i32, i32) {
    %c0_i32 = arith.constant 0 : i32
    %c0_i32_0 = arith.constant 0 : i32
    return %arg0, %c0_i32 : i32, i32
  }
  func.func @transform_1(%arg0: i32) -> (i32, i32) {
    %c0_i32 = arith.constant 0 : i32
    %c0_i32_0 = arith.constant 0 : i32
    %c0_i32_1 = arith.constant 0 : i32
    return %c0_i32, %c0_i32_0 : i32, i32
  }
  func.func @transform_2(%arg0: i32) -> (i32, i32) {
    %c0_i32 = arith.constant 0 : i32
    %c0_i32_0 = arith.constant 0 : i32
    %c0_i32_1 = arith.constant 0 : i32
    return %c0_i32, %c0_i32_0 : i32, i32
  }
  func.func @transform_3(%arg0: i32) -> (i32, i32) {
    %c0_i32 = arith.constant 0 : i32
    %c0_i32_0 = arith.constant 0 : i32
    return %arg0, %c0_i32 : i32, i32
  }
}

module attributes {stable_mosaic.version = 11 : i64} {
  func.func @_conv3x3_kernel(%arg0: i32, %arg1: i32, %arg2: memref<1x1x34x34x128xbf16, #tpu.memory_space<vmem>>, %arg3: memref<9x128x128xbf16, #tpu.memory_space<vmem>>, %arg4: memref<1x1x1024x128xbf16, #tpu.memory_space<vmem>>, %arg5: memref<1x1x1x128xf32, #tpu.memory_space<vmem>>, %arg6: memref<1x1x1x128xf32, #tpu.memory_space<vmem>>) attributes {dimension_semantics = [#tpu.dimension_semantics<parallel>, #tpu.dimension_semantics<parallel>], iteration_bounds = array<i64: 2, 1>, scalar_prefetch = 0 : i64, scratch_operands = 0 : i64, tpu.core_type = #tpu.core_type<tc>, window_params = [{transform_indices = @transform_0, window_bounds = array<i64: 1, 1, 34, 34, 128>}, {pipeline_mode = #tpu.pipeline_mode<synchronous>, transform_indices = @transform_1, window_bounds = array<i64: 9, 128, 128>}, {transform_indices = @transform_2, window_bounds = array<i64: 1, 1, 1024, 128>}, {transform_indices = @transform_3, window_bounds = array<i64: 1, 1, 1, 128>}, {transform_indices = @transform_4, window_bounds = array<i64: 1, 1, 1, 128>}]} {
    %c0 = arith.constant 0 : index
    %c0_0 = arith.constant 0 : index
    %c0_1 = arith.constant 0 : index
    %c0_2 = arith.constant 0 : index
    %c0_3 = arith.constant 0 : index
    %0 = vector.load %arg2[%c0, %c0_0, %c0_1, %c0_2, %c0_3] : memref<1x1x34x34x128xbf16, #tpu.memory_space<vmem>>, vector<1x1x34x34x128xbf16>
    %1 = vector.shape_cast %0 : vector<1x1x34x34x128xbf16> to vector<34x34x128xbf16>
    %cst = arith.constant 0.000000e+00 : f32
    %2 = vector.broadcast %cst : f32 to vector<1024x128xf32>
    %3 = vector.extract_strided_slice %1 {offsets = [0, 0, 0], sizes = [32, 32, 128], strides = [1, 1, 1]} : vector<34x34x128xbf16> to vector<32x32x128xbf16>
    %4 = vector.shape_cast %3 : vector<32x32x128xbf16> to vector<1024x128xbf16>
    %c0_4 = arith.constant 0 : index
    %c0_5 = arith.constant 0 : index
    %c0_6 = arith.constant 0 : index
    %5 = vector.load %arg3[%c0_4, %c0_5, %c0_6] : memref<9x128x128xbf16, #tpu.memory_space<vmem>>, vector<1x128x128xbf16>
    %6 = vector.shape_cast %5 : vector<1x128x128xbf16> to vector<128x128xbf16>
    %cst_7 = arith.constant dense<0.000000e+00> : vector<1024x128xf32>
    %7 = tpu.matmul %4, %6, %cst_7 {dimension_numbers = #tpu.dot_dimension_numbers<[1], [0], [0], [1], [0, 0, 1, 1], [], []>} : vector<1024x128xbf16>, vector<128x128xbf16>, vector<1024x128xf32> -> vector<1024x128xf32>
    %8 = arith.addf %2, %7 : vector<1024x128xf32>
    %9 = vector.extract_strided_slice %1 {offsets = [0, 1, 0], sizes = [32, 32, 128], strides = [1, 1, 1]} : vector<34x34x128xbf16> to vector<32x32x128xbf16>
    %10 = vector.shape_cast %9 : vector<32x32x128xbf16> to vector<1024x128xbf16>
    %c1 = arith.constant 1 : index
    %c0_8 = arith.constant 0 : index
    %c0_9 = arith.constant 0 : index
    %11 = vector.load %arg3[%c1, %c0_8, %c0_9] : memref<9x128x128xbf16, #tpu.memory_space<vmem>>, vector<1x128x128xbf16>
    %12 = vector.shape_cast %11 : vector<1x128x128xbf16> to vector<128x128xbf16>
    %cst_10 = arith.constant dense<0.000000e+00> : vector<1024x128xf32>
    %13 = tpu.matmul %10, %12, %cst_10 {dimension_numbers = #tpu.dot_dimension_numbers<[1], [0], [0], [1], [0, 0, 1, 1], [], []>} : vector<1024x128xbf16>, vector<128x128xbf16>, vector<1024x128xf32> -> vector<1024x128xf32>
    %14 = arith.addf %8, %13 : vector<1024x128xf32>
    %15 = vector.extract_strided_slice %1 {offsets = [0, 2, 0], sizes = [32, 32, 128], strides = [1, 1, 1]} : vector<34x34x128xbf16> to vector<32x32x128xbf16>
    %16 = vector.shape_cast %15 : vector<32x32x128xbf16> to vector<1024x128xbf16>
    %c2 = arith.constant 2 : index
    %c0_11 = arith.constant 0 : index
    %c0_12 = arith.constant 0 : index
    %17 = vector.load %arg3[%c2, %c0_11, %c0_12] : memref<9x128x128xbf16, #tpu.memory_space<vmem>>, vector<1x128x128xbf16>
    %18 = vector.shape_cast %17 : vector<1x128x128xbf16> to vector<128x128xbf16>
    %cst_13 = arith.constant dense<0.000000e+00> : vector<1024x128xf32>
    %19 = tpu.matmul %16, %18, %cst_13 {dimension_numbers = #tpu.dot_dimension_numbers<[1], [0], [0], [1], [0, 0, 1, 1], [], []>} : vector<1024x128xbf16>, vector<128x128xbf16>, vector<1024x128xf32> -> vector<1024x128xf32>
    %20 = arith.addf %14, %19 : vector<1024x128xf32>
    %21 = vector.extract_strided_slice %1 {offsets = [1, 0, 0], sizes = [32, 32, 128], strides = [1, 1, 1]} : vector<34x34x128xbf16> to vector<32x32x128xbf16>
    %22 = vector.shape_cast %21 : vector<32x32x128xbf16> to vector<1024x128xbf16>
    %c3 = arith.constant 3 : index
    %c0_14 = arith.constant 0 : index
    %c0_15 = arith.constant 0 : index
    %23 = vector.load %arg3[%c3, %c0_14, %c0_15] : memref<9x128x128xbf16, #tpu.memory_space<vmem>>, vector<1x128x128xbf16>
    %24 = vector.shape_cast %23 : vector<1x128x128xbf16> to vector<128x128xbf16>
    %cst_16 = arith.constant dense<0.000000e+00> : vector<1024x128xf32>
    %25 = tpu.matmul %22, %24, %cst_16 {dimension_numbers = #tpu.dot_dimension_numbers<[1], [0], [0], [1], [0, 0, 1, 1], [], []>} : vector<1024x128xbf16>, vector<128x128xbf16>, vector<1024x128xf32> -> vector<1024x128xf32>
    %26 = arith.addf %20, %25 : vector<1024x128xf32>
    %27 = vector.extract_strided_slice %1 {offsets = [1, 1, 0], sizes = [32, 32, 128], strides = [1, 1, 1]} : vector<34x34x128xbf16> to vector<32x32x128xbf16>
    %28 = vector.shape_cast %27 : vector<32x32x128xbf16> to vector<1024x128xbf16>
    %c4 = arith.constant 4 : index
    %c0_17 = arith.constant 0 : index
    %c0_18 = arith.constant 0 : index
    %29 = vector.load %arg3[%c4, %c0_17, %c0_18] : memref<9x128x128xbf16, #tpu.memory_space<vmem>>, vector<1x128x128xbf16>
    %30 = vector.shape_cast %29 : vector<1x128x128xbf16> to vector<128x128xbf16>
    %cst_19 = arith.constant dense<0.000000e+00> : vector<1024x128xf32>
    %31 = tpu.matmul %28, %30, %cst_19 {dimension_numbers = #tpu.dot_dimension_numbers<[1], [0], [0], [1], [0, 0, 1, 1], [], []>} : vector<1024x128xbf16>, vector<128x128xbf16>, vector<1024x128xf32> -> vector<1024x128xf32>
    %32 = arith.addf %26, %31 : vector<1024x128xf32>
    %33 = vector.extract_strided_slice %1 {offsets = [1, 2, 0], sizes = [32, 32, 128], strides = [1, 1, 1]} : vector<34x34x128xbf16> to vector<32x32x128xbf16>
    %34 = vector.shape_cast %33 : vector<32x32x128xbf16> to vector<1024x128xbf16>
    %c5 = arith.constant 5 : index
    %c0_20 = arith.constant 0 : index
    %c0_21 = arith.constant 0 : index
    %35 = vector.load %arg3[%c5, %c0_20, %c0_21] : memref<9x128x128xbf16, #tpu.memory_space<vmem>>, vector<1x128x128xbf16>
    %36 = vector.shape_cast %35 : vector<1x128x128xbf16> to vector<128x128xbf16>
    %cst_22 = arith.constant dense<0.000000e+00> : vector<1024x128xf32>
    %37 = tpu.matmul %34, %36, %cst_22 {dimension_numbers = #tpu.dot_dimension_numbers<[1], [0], [0], [1], [0, 0, 1, 1], [], []>} : vector<1024x128xbf16>, vector<128x128xbf16>, vector<1024x128xf32> -> vector<1024x128xf32>
    %38 = arith.addf %32, %37 : vector<1024x128xf32>
    %39 = vector.extract_strided_slice %1 {offsets = [2, 0, 0], sizes = [32, 32, 128], strides = [1, 1, 1]} : vector<34x34x128xbf16> to vector<32x32x128xbf16>
    %40 = vector.shape_cast %39 : vector<32x32x128xbf16> to vector<1024x128xbf16>
    %c6 = arith.constant 6 : index
    %c0_23 = arith.constant 0 : index
    %c0_24 = arith.constant 0 : index
    %41 = vector.load %arg3[%c6, %c0_23, %c0_24] : memref<9x128x128xbf16, #tpu.memory_space<vmem>>, vector<1x128x128xbf16>
    %42 = vector.shape_cast %41 : vector<1x128x128xbf16> to vector<128x128xbf16>
    %cst_25 = arith.constant dense<0.000000e+00> : vector<1024x128xf32>
    %43 = tpu.matmul %40, %42, %cst_25 {dimension_numbers = #tpu.dot_dimension_numbers<[1], [0], [0], [1], [0, 0, 1, 1], [], []>} : vector<1024x128xbf16>, vector<128x128xbf16>, vector<1024x128xf32> -> vector<1024x128xf32>
    %44 = arith.addf %38, %43 : vector<1024x128xf32>
    %45 = vector.extract_strided_slice %1 {offsets = [2, 1, 0], sizes = [32, 32, 128], strides = [1, 1, 1]} : vector<34x34x128xbf16> to vector<32x32x128xbf16>
    %46 = vector.shape_cast %45 : vector<32x32x128xbf16> to vector<1024x128xbf16>
    %c7 = arith.constant 7 : index
    %c0_26 = arith.constant 0 : index
    %c0_27 = arith.constant 0 : index
    %47 = vector.load %arg3[%c7, %c0_26, %c0_27] : memref<9x128x128xbf16, #tpu.memory_space<vmem>>, vector<1x128x128xbf16>
    %48 = vector.shape_cast %47 : vector<1x128x128xbf16> to vector<128x128xbf16>
    %cst_28 = arith.constant dense<0.000000e+00> : vector<1024x128xf32>
    %49 = tpu.matmul %46, %48, %cst_28 {dimension_numbers = #tpu.dot_dimension_numbers<[1], [0], [0], [1], [0, 0, 1, 1], [], []>} : vector<1024x128xbf16>, vector<128x128xbf16>, vector<1024x128xf32> -> vector<1024x128xf32>
    %50 = arith.addf %44, %49 : vector<1024x128xf32>
    %51 = vector.extract_strided_slice %1 {offsets = [2, 2, 0], sizes = [32, 32, 128], strides = [1, 1, 1]} : vector<34x34x128xbf16> to vector<32x32x128xbf16>
    %52 = vector.shape_cast %51 : vector<32x32x128xbf16> to vector<1024x128xbf16>
    %c8 = arith.constant 8 : index
    %c0_29 = arith.constant 0 : index
    %c0_30 = arith.constant 0 : index
    %53 = vector.load %arg3[%c8, %c0_29, %c0_30] : memref<9x128x128xbf16, #tpu.memory_space<vmem>>, vector<1x128x128xbf16>
    %54 = vector.shape_cast %53 : vector<1x128x128xbf16> to vector<128x128xbf16>
    %cst_31 = arith.constant dense<0.000000e+00> : vector<1024x128xf32>
    %55 = tpu.matmul %52, %54, %cst_31 {dimension_numbers = #tpu.dot_dimension_numbers<[1], [0], [0], [1], [0, 0, 1, 1], [], []>} : vector<1024x128xbf16>, vector<128x128xbf16>, vector<1024x128xf32> -> vector<1024x128xf32>
    %56 = arith.addf %50, %55 : vector<1024x128xf32>
    %57 = vector.shape_cast %56 : vector<1024x128xf32> to vector<1x1x1024x128xf32>
    %58 = arith.truncf %57 : vector<1x1x1024x128xf32> to vector<1x1x1024x128xbf16>
    %c0_32 = arith.constant 0 : index
    %c0_33 = arith.constant 0 : index
    %c0_34 = arith.constant 0 : index
    %c0_35 = arith.constant 0 : index
    %59 = vector.load %arg4[%c0_32, %c0_33, %c0_34, %c0_35] : memref<1x1x1024x128xbf16, #tpu.memory_space<vmem>>, vector<1x1x1024x128xbf16>
    tpu.vector_store %arg4[%c0_32, %c0_33, %c0_34, %c0_35], %58 {strides = array<i32>} : memref<1x1x1024x128xbf16, #tpu.memory_space<vmem>>, vector<1x1x1024x128xbf16>,
    %cst_36 = arith.constant dense<0.000000e+00> : vector<128xf32>
    %60 = vector.multi_reduction <add>, %56, %cst_36 [0] : vector<1024x128xf32> to vector<128xf32>
    %61 = vector.shape_cast %60 : vector<128xf32> to vector<1x1x1x128xf32>
    %c0_37 = arith.constant 0 : index
    %c0_38 = arith.constant 0 : index
    %c0_39 = arith.constant 0 : index
    %c0_40 = arith.constant 0 : index
    %62 = vector.load %arg5[%c0_37, %c0_38, %c0_39, %c0_40] : memref<1x1x1x128xf32, #tpu.memory_space<vmem>>, vector<1x1x1x128xf32>
    tpu.vector_store %arg5[%c0_37, %c0_38, %c0_39, %c0_40], %61 {strides = array<i32>} : memref<1x1x1x128xf32, #tpu.memory_space<vmem>>, vector<1x1x1x128xf32>,
    %63 = arith.mulf %56, %56 : vector<1024x128xf32>
    %cst_41 = arith.constant dense<0.000000e+00> : vector<128xf32>
    %64 = vector.multi_reduction <add>, %63, %cst_41 [0] : vector<1024x128xf32> to vector<128xf32>
    %65 = vector.shape_cast %64 : vector<128xf32> to vector<1x1x1x128xf32>
    %c0_42 = arith.constant 0 : index
    %c0_43 = arith.constant 0 : index
    %c0_44 = arith.constant 0 : index
    %c0_45 = arith.constant 0 : index
    %66 = vector.load %arg6[%c0_42, %c0_43, %c0_44, %c0_45] : memref<1x1x1x128xf32, #tpu.memory_space<vmem>>, vector<1x1x1x128xf32>
    tpu.vector_store %arg6[%c0_42, %c0_43, %c0_44, %c0_45], %65 {strides = array<i32>} : memref<1x1x1x128xf32, #tpu.memory_space<vmem>>, vector<1x1x1x128xf32>,
    return
  }
  func.func @transform_0(%arg0: i32, %arg1: i32) -> (i32, i32, i32, i32, i32) {
    %c0_i32 = arith.constant 0 : i32
    %c0_i32_0 = arith.constant 0 : i32
    %c0_i32_1 = arith.constant 0 : i32
    %c0_i32_2 = arith.constant 0 : i32
    return %arg0, %arg1, %c0_i32, %c0_i32_0, %c0_i32_1 : i32, i32, i32, i32, i32
  }
  func.func @transform_1(%arg0: i32, %arg1: i32) -> (i32, i32, i32) {
    %c0_i32 = arith.constant 0 : i32
    %c0_i32_0 = arith.constant 0 : i32
    %c0_i32_1 = arith.constant 0 : i32
    %c0_i32_2 = arith.constant 0 : i32
    return %c0_i32, %c0_i32_0, %c0_i32_1 : i32, i32, i32
  }
  func.func @transform_2(%arg0: i32, %arg1: i32) -> (i32, i32, i32, i32) {
    %c0_i32 = arith.constant 0 : i32
    %c0_i32_0 = arith.constant 0 : i32
    %c0_i32_1 = arith.constant 0 : i32
    return %arg0, %arg1, %c0_i32, %c0_i32_0 : i32, i32, i32, i32
  }
  func.func @transform_3(%arg0: i32, %arg1: i32) -> (i32, i32, i32, i32) {
    %c0_i32 = arith.constant 0 : i32
    %c0_i32_0 = arith.constant 0 : i32
    %c0_i32_1 = arith.constant 0 : i32
    return %arg0, %arg1, %c0_i32, %c0_i32_0 : i32, i32, i32, i32
  }
  func.func @transform_4(%arg0: i32, %arg1: i32) -> (i32, i32, i32, i32) {
    %c0_i32 = arith.constant 0 : i32
    %c0_i32_0 = arith.constant 0 : i32
    %c0_i32_1 = arith.constant 0 : i32
    return %arg0, %arg1, %c0_i32, %c0_i32_0 : i32, i32, i32, i32
  }
}

module attributes {stable_mosaic.version = 11 : i64} {
  func.func @_conv3x3_kernel(%arg0: i32, %arg1: i32, %arg2: memref<1x1x18x18x128xbf16, #tpu.memory_space<vmem>>, %arg3: memref<9x128x256xbf16, #tpu.memory_space<vmem>>, %arg4: memref<1x1x256x256xbf16, #tpu.memory_space<vmem>>, %arg5: memref<1x1x1x256xf32, #tpu.memory_space<vmem>>, %arg6: memref<1x1x1x256xf32, #tpu.memory_space<vmem>>) attributes {dimension_semantics = [#tpu.dimension_semantics<parallel>, #tpu.dimension_semantics<parallel>], iteration_bounds = array<i64: 2, 1>, scalar_prefetch = 0 : i64, scratch_operands = 0 : i64, tpu.core_type = #tpu.core_type<tc>, window_params = [{transform_indices = @transform_0, window_bounds = array<i64: 1, 1, 18, 18, 128>}, {pipeline_mode = #tpu.pipeline_mode<synchronous>, transform_indices = @transform_1, window_bounds = array<i64: 9, 128, 256>}, {transform_indices = @transform_2, window_bounds = array<i64: 1, 1, 256, 256>}, {transform_indices = @transform_3, window_bounds = array<i64: 1, 1, 1, 256>}, {transform_indices = @transform_4, window_bounds = array<i64: 1, 1, 1, 256>}]} {
    %c0 = arith.constant 0 : index
    %c0_0 = arith.constant 0 : index
    %c0_1 = arith.constant 0 : index
    %c0_2 = arith.constant 0 : index
    %c0_3 = arith.constant 0 : index
    %0 = vector.load %arg2[%c0, %c0_0, %c0_1, %c0_2, %c0_3] : memref<1x1x18x18x128xbf16, #tpu.memory_space<vmem>>, vector<1x1x18x18x128xbf16>
    %1 = vector.shape_cast %0 : vector<1x1x18x18x128xbf16> to vector<18x18x128xbf16>
    %cst = arith.constant 0.000000e+00 : f32
    %2 = vector.broadcast %cst : f32 to vector<256x256xf32>
    %3 = vector.extract_strided_slice %1 {offsets = [0, 0, 0], sizes = [16, 16, 128], strides = [1, 1, 1]} : vector<18x18x128xbf16> to vector<16x16x128xbf16>
    %4 = vector.shape_cast %3 : vector<16x16x128xbf16> to vector<256x128xbf16>
    %c0_4 = arith.constant 0 : index
    %c0_5 = arith.constant 0 : index
    %c0_6 = arith.constant 0 : index
    %5 = vector.load %arg3[%c0_4, %c0_5, %c0_6] : memref<9x128x256xbf16, #tpu.memory_space<vmem>>, vector<1x128x256xbf16>
    %6 = vector.shape_cast %5 : vector<1x128x256xbf16> to vector<128x256xbf16>
    %cst_7 = arith.constant dense<0.000000e+00> : vector<256x256xf32>
    %7 = tpu.matmul %4, %6, %cst_7 {dimension_numbers = #tpu.dot_dimension_numbers<[1], [0], [0], [1], [0, 0, 1, 1], [], []>} : vector<256x128xbf16>, vector<128x256xbf16>, vector<256x256xf32> -> vector<256x256xf32>
    %8 = arith.addf %2, %7 : vector<256x256xf32>
    %9 = vector.extract_strided_slice %1 {offsets = [0, 1, 0], sizes = [16, 16, 128], strides = [1, 1, 1]} : vector<18x18x128xbf16> to vector<16x16x128xbf16>
    %10 = vector.shape_cast %9 : vector<16x16x128xbf16> to vector<256x128xbf16>
    %c1 = arith.constant 1 : index
    %c0_8 = arith.constant 0 : index
    %c0_9 = arith.constant 0 : index
    %11 = vector.load %arg3[%c1, %c0_8, %c0_9] : memref<9x128x256xbf16, #tpu.memory_space<vmem>>, vector<1x128x256xbf16>
    %12 = vector.shape_cast %11 : vector<1x128x256xbf16> to vector<128x256xbf16>
    %cst_10 = arith.constant dense<0.000000e+00> : vector<256x256xf32>
    %13 = tpu.matmul %10, %12, %cst_10 {dimension_numbers = #tpu.dot_dimension_numbers<[1], [0], [0], [1], [0, 0, 1, 1], [], []>} : vector<256x128xbf16>, vector<128x256xbf16>, vector<256x256xf32> -> vector<256x256xf32>
    %14 = arith.addf %8, %13 : vector<256x256xf32>
    %15 = vector.extract_strided_slice %1 {offsets = [0, 2, 0], sizes = [16, 16, 128], strides = [1, 1, 1]} : vector<18x18x128xbf16> to vector<16x16x128xbf16>
    %16 = vector.shape_cast %15 : vector<16x16x128xbf16> to vector<256x128xbf16>
    %c2 = arith.constant 2 : index
    %c0_11 = arith.constant 0 : index
    %c0_12 = arith.constant 0 : index
    %17 = vector.load %arg3[%c2, %c0_11, %c0_12] : memref<9x128x256xbf16, #tpu.memory_space<vmem>>, vector<1x128x256xbf16>
    %18 = vector.shape_cast %17 : vector<1x128x256xbf16> to vector<128x256xbf16>
    %cst_13 = arith.constant dense<0.000000e+00> : vector<256x256xf32>
    %19 = tpu.matmul %16, %18, %cst_13 {dimension_numbers = #tpu.dot_dimension_numbers<[1], [0], [0], [1], [0, 0, 1, 1], [], []>} : vector<256x128xbf16>, vector<128x256xbf16>, vector<256x256xf32> -> vector<256x256xf32>
    %20 = arith.addf %14, %19 : vector<256x256xf32>
    %21 = vector.extract_strided_slice %1 {offsets = [1, 0, 0], sizes = [16, 16, 128], strides = [1, 1, 1]} : vector<18x18x128xbf16> to vector<16x16x128xbf16>
    %22 = vector.shape_cast %21 : vector<16x16x128xbf16> to vector<256x128xbf16>
    %c3 = arith.constant 3 : index
    %c0_14 = arith.constant 0 : index
    %c0_15 = arith.constant 0 : index
    %23 = vector.load %arg3[%c3, %c0_14, %c0_15] : memref<9x128x256xbf16, #tpu.memory_space<vmem>>, vector<1x128x256xbf16>
    %24 = vector.shape_cast %23 : vector<1x128x256xbf16> to vector<128x256xbf16>
    %cst_16 = arith.constant dense<0.000000e+00> : vector<256x256xf32>
    %25 = tpu.matmul %22, %24, %cst_16 {dimension_numbers = #tpu.dot_dimension_numbers<[1], [0], [0], [1], [0, 0, 1, 1], [], []>} : vector<256x128xbf16>, vector<128x256xbf16>, vector<256x256xf32> -> vector<256x256xf32>
    %26 = arith.addf %20, %25 : vector<256x256xf32>
    %27 = vector.extract_strided_slice %1 {offsets = [1, 1, 0], sizes = [16, 16, 128], strides = [1, 1, 1]} : vector<18x18x128xbf16> to vector<16x16x128xbf16>
    %28 = vector.shape_cast %27 : vector<16x16x128xbf16> to vector<256x128xbf16>
    %c4 = arith.constant 4 : index
    %c0_17 = arith.constant 0 : index
    %c0_18 = arith.constant 0 : index
    %29 = vector.load %arg3[%c4, %c0_17, %c0_18] : memref<9x128x256xbf16, #tpu.memory_space<vmem>>, vector<1x128x256xbf16>
    %30 = vector.shape_cast %29 : vector<1x128x256xbf16> to vector<128x256xbf16>
    %cst_19 = arith.constant dense<0.000000e+00> : vector<256x256xf32>
    %31 = tpu.matmul %28, %30, %cst_19 {dimension_numbers = #tpu.dot_dimension_numbers<[1], [0], [0], [1], [0, 0, 1, 1], [], []>} : vector<256x128xbf16>, vector<128x256xbf16>, vector<256x256xf32> -> vector<256x256xf32>
    %32 = arith.addf %26, %31 : vector<256x256xf32>
    %33 = vector.extract_strided_slice %1 {offsets = [1, 2, 0], sizes = [16, 16, 128], strides = [1, 1, 1]} : vector<18x18x128xbf16> to vector<16x16x128xbf16>
    %34 = vector.shape_cast %33 : vector<16x16x128xbf16> to vector<256x128xbf16>
    %c5 = arith.constant 5 : index
    %c0_20 = arith.constant 0 : index
    %c0_21 = arith.constant 0 : index
    %35 = vector.load %arg3[%c5, %c0_20, %c0_21] : memref<9x128x256xbf16, #tpu.memory_space<vmem>>, vector<1x128x256xbf16>
    %36 = vector.shape_cast %35 : vector<1x128x256xbf16> to vector<128x256xbf16>
    %cst_22 = arith.constant dense<0.000000e+00> : vector<256x256xf32>
    %37 = tpu.matmul %34, %36, %cst_22 {dimension_numbers = #tpu.dot_dimension_numbers<[1], [0], [0], [1], [0, 0, 1, 1], [], []>} : vector<256x128xbf16>, vector<128x256xbf16>, vector<256x256xf32> -> vector<256x256xf32>
    %38 = arith.addf %32, %37 : vector<256x256xf32>
    %39 = vector.extract_strided_slice %1 {offsets = [2, 0, 0], sizes = [16, 16, 128], strides = [1, 1, 1]} : vector<18x18x128xbf16> to vector<16x16x128xbf16>
    %40 = vector.shape_cast %39 : vector<16x16x128xbf16> to vector<256x128xbf16>
    %c6 = arith.constant 6 : index
    %c0_23 = arith.constant 0 : index
    %c0_24 = arith.constant 0 : index
    %41 = vector.load %arg3[%c6, %c0_23, %c0_24] : memref<9x128x256xbf16, #tpu.memory_space<vmem>>, vector<1x128x256xbf16>
    %42 = vector.shape_cast %41 : vector<1x128x256xbf16> to vector<128x256xbf16>
    %cst_25 = arith.constant dense<0.000000e+00> : vector<256x256xf32>
    %43 = tpu.matmul %40, %42, %cst_25 {dimension_numbers = #tpu.dot_dimension_numbers<[1], [0], [0], [1], [0, 0, 1, 1], [], []>} : vector<256x128xbf16>, vector<128x256xbf16>, vector<256x256xf32> -> vector<256x256xf32>
    %44 = arith.addf %38, %43 : vector<256x256xf32>
    %45 = vector.extract_strided_slice %1 {offsets = [2, 1, 0], sizes = [16, 16, 128], strides = [1, 1, 1]} : vector<18x18x128xbf16> to vector<16x16x128xbf16>
    %46 = vector.shape_cast %45 : vector<16x16x128xbf16> to vector<256x128xbf16>
    %c7 = arith.constant 7 : index
    %c0_26 = arith.constant 0 : index
    %c0_27 = arith.constant 0 : index
    %47 = vector.load %arg3[%c7, %c0_26, %c0_27] : memref<9x128x256xbf16, #tpu.memory_space<vmem>>, vector<1x128x256xbf16>
    %48 = vector.shape_cast %47 : vector<1x128x256xbf16> to vector<128x256xbf16>
    %cst_28 = arith.constant dense<0.000000e+00> : vector<256x256xf32>
    %49 = tpu.matmul %46, %48, %cst_28 {dimension_numbers = #tpu.dot_dimension_numbers<[1], [0], [0], [1], [0, 0, 1, 1], [], []>} : vector<256x128xbf16>, vector<128x256xbf16>, vector<256x256xf32> -> vector<256x256xf32>
    %50 = arith.addf %44, %49 : vector<256x256xf32>
    %51 = vector.extract_strided_slice %1 {offsets = [2, 2, 0], sizes = [16, 16, 128], strides = [1, 1, 1]} : vector<18x18x128xbf16> to vector<16x16x128xbf16>
    %52 = vector.shape_cast %51 : vector<16x16x128xbf16> to vector<256x128xbf16>
    %c8 = arith.constant 8 : index
    %c0_29 = arith.constant 0 : index
    %c0_30 = arith.constant 0 : index
    %53 = vector.load %arg3[%c8, %c0_29, %c0_30] : memref<9x128x256xbf16, #tpu.memory_space<vmem>>, vector<1x128x256xbf16>
    %54 = vector.shape_cast %53 : vector<1x128x256xbf16> to vector<128x256xbf16>
    %cst_31 = arith.constant dense<0.000000e+00> : vector<256x256xf32>
    %55 = tpu.matmul %52, %54, %cst_31 {dimension_numbers = #tpu.dot_dimension_numbers<[1], [0], [0], [1], [0, 0, 1, 1], [], []>} : vector<256x128xbf16>, vector<128x256xbf16>, vector<256x256xf32> -> vector<256x256xf32>
    %56 = arith.addf %50, %55 : vector<256x256xf32>
    %57 = vector.shape_cast %56 : vector<256x256xf32> to vector<1x1x256x256xf32>
    %58 = arith.truncf %57 : vector<1x1x256x256xf32> to vector<1x1x256x256xbf16>
    %c0_32 = arith.constant 0 : index
    %c0_33 = arith.constant 0 : index
    %c0_34 = arith.constant 0 : index
    %c0_35 = arith.constant 0 : index
    %59 = vector.load %arg4[%c0_32, %c0_33, %c0_34, %c0_35] : memref<1x1x256x256xbf16, #tpu.memory_space<vmem>>, vector<1x1x256x256xbf16>
    tpu.vector_store %arg4[%c0_32, %c0_33, %c0_34, %c0_35], %58 {strides = array<i32>} : memref<1x1x256x256xbf16, #tpu.memory_space<vmem>>, vector<1x1x256x256xbf16>,
    %cst_36 = arith.constant dense<0.000000e+00> : vector<256xf32>
    %60 = vector.multi_reduction <add>, %56, %cst_36 [0] : vector<256x256xf32> to vector<256xf32>
    %61 = vector.shape_cast %60 : vector<256xf32> to vector<1x1x1x256xf32>
    %c0_37 = arith.constant 0 : index
    %c0_38 = arith.constant 0 : index
    %c0_39 = arith.constant 0 : index
    %c0_40 = arith.constant 0 : index
    %62 = vector.load %arg5[%c0_37, %c0_38, %c0_39, %c0_40] : memref<1x1x1x256xf32, #tpu.memory_space<vmem>>, vector<1x1x1x256xf32>
    tpu.vector_store %arg5[%c0_37, %c0_38, %c0_39, %c0_40], %61 {strides = array<i32>} : memref<1x1x1x256xf32, #tpu.memory_space<vmem>>, vector<1x1x1x256xf32>,
    %63 = arith.mulf %56, %56 : vector<256x256xf32>
    %cst_41 = arith.constant dense<0.000000e+00> : vector<256xf32>
    %64 = vector.multi_reduction <add>, %63, %cst_41 [0] : vector<256x256xf32> to vector<256xf32>
    %65 = vector.shape_cast %64 : vector<256xf32> to vector<1x1x1x256xf32>
    %c0_42 = arith.constant 0 : index
    %c0_43 = arith.constant 0 : index
    %c0_44 = arith.constant 0 : index
    %c0_45 = arith.constant 0 : index
    %66 = vector.load %arg6[%c0_42, %c0_43, %c0_44, %c0_45] : memref<1x1x1x256xf32, #tpu.memory_space<vmem>>, vector<1x1x1x256xf32>
    tpu.vector_store %arg6[%c0_42, %c0_43, %c0_44, %c0_45], %65 {strides = array<i32>} : memref<1x1x1x256xf32, #tpu.memory_space<vmem>>, vector<1x1x1x256xf32>,
    return
  }
  func.func @transform_0(%arg0: i32, %arg1: i32) -> (i32, i32, i32, i32, i32) {
    %c0_i32 = arith.constant 0 : i32
    %c0_i32_0 = arith.constant 0 : i32
    %c0_i32_1 = arith.constant 0 : i32
    %c0_i32_2 = arith.constant 0 : i32
    return %arg0, %arg1, %c0_i32, %c0_i32_0, %c0_i32_1 : i32, i32, i32, i32, i32
  }
  func.func @transform_1(%arg0: i32, %arg1: i32) -> (i32, i32, i32) {
    %c0_i32 = arith.constant 0 : i32
    %c0_i32_0 = arith.constant 0 : i32
    %c0_i32_1 = arith.constant 0 : i32
    %c0_i32_2 = arith.constant 0 : i32
    return %c0_i32, %c0_i32_0, %c0_i32_1 : i32, i32, i32
  }
  func.func @transform_2(%arg0: i32, %arg1: i32) -> (i32, i32, i32, i32) {
    %c0_i32 = arith.constant 0 : i32
    %c0_i32_0 = arith.constant 0 : i32
    %c0_i32_1 = arith.constant 0 : i32
    return %arg0, %arg1, %c0_i32, %c0_i32_0 : i32, i32, i32, i32
  }
  func.func @transform_3(%arg0: i32, %arg1: i32) -> (i32, i32, i32, i32) {
    %c0_i32 = arith.constant 0 : i32
    %c0_i32_0 = arith.constant 0 : i32
    %c0_i32_1 = arith.constant 0 : i32
    return %arg0, %arg1, %c0_i32, %c0_i32_0 : i32, i32, i32, i32
  }
  func.func @transform_4(%arg0: i32, %arg1: i32) -> (i32, i32, i32, i32) {
    %c0_i32 = arith.constant 0 : i32
    %c0_i32_0 = arith.constant 0 : i32
    %c0_i32_1 = arith.constant 0 : i32
    return %arg0, %arg1, %c0_i32, %c0_i32_0 : i32, i32, i32, i32
  }
}

module attributes {stable_mosaic.version = 11 : i64} {
  func.func @_affine_relu_kernel(%arg0: i32, %arg1: memref<512x256xbf16, #tpu.memory_space<vmem>>, %arg2: memref<1x256xf32, #tpu.memory_space<vmem>>, %arg3: memref<1x256xf32, #tpu.memory_space<vmem>>, %arg4: memref<512x256xbf16, #tpu.memory_space<vmem>>) attributes {dimension_semantics = [#tpu.dimension_semantics<parallel>], iteration_bounds = array<i64: 1>, scalar_prefetch = 0 : i64, scratch_operands = 0 : i64, tpu.core_type = #tpu.core_type<tc>, window_params = [{transform_indices = @transform_0, window_bounds = array<i64: 512, 256>}, {pipeline_mode = #tpu.pipeline_mode<synchronous>, transform_indices = @transform_1, window_bounds = array<i64: 1, 256>}, {pipeline_mode = #tpu.pipeline_mode<synchronous>, transform_indices = @transform_2, window_bounds = array<i64: 1, 256>}, {transform_indices = @transform_3, window_bounds = array<i64: 512, 256>}]} {
    %c0 = arith.constant 0 : index
    %c0_0 = arith.constant 0 : index
    %0 = vector.load %arg1[%c0, %c0_0] : memref<512x256xbf16, #tpu.memory_space<vmem>>, vector<512x256xbf16>
    %1 = arith.extf %0 : vector<512x256xbf16> to vector<512x256xf32>
    %c0_1 = arith.constant 0 : index
    %c0_2 = arith.constant 0 : index
    %2 = vector.load %arg2[%c0_1, %c0_2] : memref<1x256xf32, #tpu.memory_space<vmem>>, vector<1x256xf32>
    %3 = vector.broadcast %2 : vector<1x256xf32> to vector<512x256xf32>
    %4 = arith.mulf %1, %3 : vector<512x256xf32>
    %c0_3 = arith.constant 0 : index
    %c0_4 = arith.constant 0 : index
    %5 = vector.load %arg3[%c0_3, %c0_4] : memref<1x256xf32, #tpu.memory_space<vmem>>, vector<1x256xf32>
    %6 = vector.broadcast %5 : vector<1x256xf32> to vector<512x256xf32>
    %7 = arith.addf %4, %6 : vector<512x256xf32>
    %cst = arith.constant 0.000000e+00 : f32
    %8 = vector.broadcast %cst : f32 to vector<512x256xf32>
    %9 = arith.maximumf %7, %8 : vector<512x256xf32>
    %10 = arith.truncf %9 : vector<512x256xf32> to vector<512x256xbf16>
    %c0_5 = arith.constant 0 : index
    %c0_6 = arith.constant 0 : index
    %11 = vector.load %arg4[%c0_5, %c0_6] : memref<512x256xbf16, #tpu.memory_space<vmem>>, vector<512x256xbf16>
    tpu.vector_store %arg4[%c0_5, %c0_6], %10 {strides = array<i32>} : memref<512x256xbf16, #tpu.memory_space<vmem>>, vector<512x256xbf16>,
    return
  }
  func.func @transform_0(%arg0: i32) -> (i32, i32) {
    %c0_i32 = arith.constant 0 : i32
    %c0_i32_0 = arith.constant 0 : i32
    return %arg0, %c0_i32 : i32, i32
  }
  func.func @transform_1(%arg0: i32) -> (i32, i32) {
    %c0_i32 = arith.constant 0 : i32
    %c0_i32_0 = arith.constant 0 : i32
    %c0_i32_1 = arith.constant 0 : i32
    return %c0_i32, %c0_i32_0 : i32, i32
  }
  func.func @transform_2(%arg0: i32) -> (i32, i32) {
    %c0_i32 = arith.constant 0 : i32
    %c0_i32_0 = arith.constant 0 : i32
    %c0_i32_1 = arith.constant 0 : i32
    return %c0_i32, %c0_i32_0 : i32, i32
  }
  func.func @transform_3(%arg0: i32) -> (i32, i32) {
    %c0_i32 = arith.constant 0 : i32
    %c0_i32_0 = arith.constant 0 : i32
    return %arg0, %c0_i32 : i32, i32
  }
}

module attributes {stable_mosaic.version = 11 : i64} {
  func.func @_conv3x3_kernel(%arg0: i32, %arg1: i32, %arg2: memref<1x1x18x18x256xbf16, #tpu.memory_space<vmem>>, %arg3: memref<9x256x256xbf16, #tpu.memory_space<vmem>>, %arg4: memref<1x1x256x256xbf16, #tpu.memory_space<vmem>>, %arg5: memref<1x1x1x256xf32, #tpu.memory_space<vmem>>, %arg6: memref<1x1x1x256xf32, #tpu.memory_space<vmem>>) attributes {dimension_semantics = [#tpu.dimension_semantics<parallel>, #tpu.dimension_semantics<parallel>], iteration_bounds = array<i64: 2, 1>, scalar_prefetch = 0 : i64, scratch_operands = 0 : i64, tpu.core_type = #tpu.core_type<tc>, window_params = [{transform_indices = @transform_0, window_bounds = array<i64: 1, 1, 18, 18, 256>}, {pipeline_mode = #tpu.pipeline_mode<synchronous>, transform_indices = @transform_1, window_bounds = array<i64: 9, 256, 256>}, {transform_indices = @transform_2, window_bounds = array<i64: 1, 1, 256, 256>}, {transform_indices = @transform_3, window_bounds = array<i64: 1, 1, 1, 256>}, {transform_indices = @transform_4, window_bounds = array<i64: 1, 1, 1, 256>}]} {
    %c0 = arith.constant 0 : index
    %c0_0 = arith.constant 0 : index
    %c0_1 = arith.constant 0 : index
    %c0_2 = arith.constant 0 : index
    %c0_3 = arith.constant 0 : index
    %0 = vector.load %arg2[%c0, %c0_0, %c0_1, %c0_2, %c0_3] : memref<1x1x18x18x256xbf16, #tpu.memory_space<vmem>>, vector<1x1x18x18x256xbf16>
    %1 = vector.shape_cast %0 : vector<1x1x18x18x256xbf16> to vector<18x18x256xbf16>
    %cst = arith.constant 0.000000e+00 : f32
    %2 = vector.broadcast %cst : f32 to vector<256x256xf32>
    %3 = vector.extract_strided_slice %1 {offsets = [0, 0, 0], sizes = [16, 16, 256], strides = [1, 1, 1]} : vector<18x18x256xbf16> to vector<16x16x256xbf16>
    %4 = vector.shape_cast %3 : vector<16x16x256xbf16> to vector<256x256xbf16>
    %c0_4 = arith.constant 0 : index
    %c0_5 = arith.constant 0 : index
    %c0_6 = arith.constant 0 : index
    %5 = vector.load %arg3[%c0_4, %c0_5, %c0_6] : memref<9x256x256xbf16, #tpu.memory_space<vmem>>, vector<1x256x256xbf16>
    %6 = vector.shape_cast %5 : vector<1x256x256xbf16> to vector<256x256xbf16>
    %cst_7 = arith.constant dense<0.000000e+00> : vector<256x256xf32>
    %7 = tpu.matmul %4, %6, %cst_7 {dimension_numbers = #tpu.dot_dimension_numbers<[1], [0], [0], [1], [0, 0, 1, 1], [], []>} : vector<256x256xbf16>, vector<256x256xbf16>, vector<256x256xf32> -> vector<256x256xf32>
    %8 = arith.addf %2, %7 : vector<256x256xf32>
    %9 = vector.extract_strided_slice %1 {offsets = [0, 1, 0], sizes = [16, 16, 256], strides = [1, 1, 1]} : vector<18x18x256xbf16> to vector<16x16x256xbf16>
    %10 = vector.shape_cast %9 : vector<16x16x256xbf16> to vector<256x256xbf16>
    %c1 = arith.constant 1 : index
    %c0_8 = arith.constant 0 : index
    %c0_9 = arith.constant 0 : index
    %11 = vector.load %arg3[%c1, %c0_8, %c0_9] : memref<9x256x256xbf16, #tpu.memory_space<vmem>>, vector<1x256x256xbf16>
    %12 = vector.shape_cast %11 : vector<1x256x256xbf16> to vector<256x256xbf16>
    %cst_10 = arith.constant dense<0.000000e+00> : vector<256x256xf32>
    %13 = tpu.matmul %10, %12, %cst_10 {dimension_numbers = #tpu.dot_dimension_numbers<[1], [0], [0], [1], [0, 0, 1, 1], [], []>} : vector<256x256xbf16>, vector<256x256xbf16>, vector<256x256xf32> -> vector<256x256xf32>
    %14 = arith.addf %8, %13 : vector<256x256xf32>
    %15 = vector.extract_strided_slice %1 {offsets = [0, 2, 0], sizes = [16, 16, 256], strides = [1, 1, 1]} : vector<18x18x256xbf16> to vector<16x16x256xbf16>
    %16 = vector.shape_cast %15 : vector<16x16x256xbf16> to vector<256x256xbf16>
    %c2 = arith.constant 2 : index
    %c0_11 = arith.constant 0 : index
    %c0_12 = arith.constant 0 : index
    %17 = vector.load %arg3[%c2, %c0_11, %c0_12] : memref<9x256x256xbf16, #tpu.memory_space<vmem>>, vector<1x256x256xbf16>
    %18 = vector.shape_cast %17 : vector<1x256x256xbf16> to vector<256x256xbf16>
    %cst_13 = arith.constant dense<0.000000e+00> : vector<256x256xf32>
    %19 = tpu.matmul %16, %18, %cst_13 {dimension_numbers = #tpu.dot_dimension_numbers<[1], [0], [0], [1], [0, 0, 1, 1], [], []>} : vector<256x256xbf16>, vector<256x256xbf16>, vector<256x256xf32> -> vector<256x256xf32>
    %20 = arith.addf %14, %19 : vector<256x256xf32>
    %21 = vector.extract_strided_slice %1 {offsets = [1, 0, 0], sizes = [16, 16, 256], strides = [1, 1, 1]} : vector<18x18x256xbf16> to vector<16x16x256xbf16>
    %22 = vector.shape_cast %21 : vector<16x16x256xbf16> to vector<256x256xbf16>
    %c3 = arith.constant 3 : index
    %c0_14 = arith.constant 0 : index
    %c0_15 = arith.constant 0 : index
    %23 = vector.load %arg3[%c3, %c0_14, %c0_15] : memref<9x256x256xbf16, #tpu.memory_space<vmem>>, vector<1x256x256xbf16>
    %24 = vector.shape_cast %23 : vector<1x256x256xbf16> to vector<256x256xbf16>
    %cst_16 = arith.constant dense<0.000000e+00> : vector<256x256xf32>
    %25 = tpu.matmul %22, %24, %cst_16 {dimension_numbers = #tpu.dot_dimension_numbers<[1], [0], [0], [1], [0, 0, 1, 1], [], []>} : vector<256x256xbf16>, vector<256x256xbf16>, vector<256x256xf32> -> vector<256x256xf32>
    %26 = arith.addf %20, %25 : vector<256x256xf32>
    %27 = vector.extract_strided_slice %1 {offsets = [1, 1, 0], sizes = [16, 16, 256], strides = [1, 1, 1]} : vector<18x18x256xbf16> to vector<16x16x256xbf16>
    %28 = vector.shape_cast %27 : vector<16x16x256xbf16> to vector<256x256xbf16>
    %c4 = arith.constant 4 : index
    %c0_17 = arith.constant 0 : index
    %c0_18 = arith.constant 0 : index
    %29 = vector.load %arg3[%c4, %c0_17, %c0_18] : memref<9x256x256xbf16, #tpu.memory_space<vmem>>, vector<1x256x256xbf16>
    %30 = vector.shape_cast %29 : vector<1x256x256xbf16> to vector<256x256xbf16>
    %cst_19 = arith.constant dense<0.000000e+00> : vector<256x256xf32>
    %31 = tpu.matmul %28, %30, %cst_19 {dimension_numbers = #tpu.dot_dimension_numbers<[1], [0], [0], [1], [0, 0, 1, 1], [], []>} : vector<256x256xbf16>, vector<256x256xbf16>, vector<256x256xf32> -> vector<256x256xf32>
    %32 = arith.addf %26, %31 : vector<256x256xf32>
    %33 = vector.extract_strided_slice %1 {offsets = [1, 2, 0], sizes = [16, 16, 256], strides = [1, 1, 1]} : vector<18x18x256xbf16> to vector<16x16x256xbf16>
    %34 = vector.shape_cast %33 : vector<16x16x256xbf16> to vector<256x256xbf16>
    %c5 = arith.constant 5 : index
    %c0_20 = arith.constant 0 : index
    %c0_21 = arith.constant 0 : index
    %35 = vector.load %arg3[%c5, %c0_20, %c0_21] : memref<9x256x256xbf16, #tpu.memory_space<vmem>>, vector<1x256x256xbf16>
    %36 = vector.shape_cast %35 : vector<1x256x256xbf16> to vector<256x256xbf16>
    %cst_22 = arith.constant dense<0.000000e+00> : vector<256x256xf32>
    %37 = tpu.matmul %34, %36, %cst_22 {dimension_numbers = #tpu.dot_dimension_numbers<[1], [0], [0], [1], [0, 0, 1, 1], [], []>} : vector<256x256xbf16>, vector<256x256xbf16>, vector<256x256xf32> -> vector<256x256xf32>
    %38 = arith.addf %32, %37 : vector<256x256xf32>
    %39 = vector.extract_strided_slice %1 {offsets = [2, 0, 0], sizes = [16, 16, 256], strides = [1, 1, 1]} : vector<18x18x256xbf16> to vector<16x16x256xbf16>
    %40 = vector.shape_cast %39 : vector<16x16x256xbf16> to vector<256x256xbf16>
    %c6 = arith.constant 6 : index
    %c0_23 = arith.constant 0 : index
    %c0_24 = arith.constant 0 : index
    %41 = vector.load %arg3[%c6, %c0_23, %c0_24] : memref<9x256x256xbf16, #tpu.memory_space<vmem>>, vector<1x256x256xbf16>
    %42 = vector.shape_cast %41 : vector<1x256x256xbf16> to vector<256x256xbf16>
    %cst_25 = arith.constant dense<0.000000e+00> : vector<256x256xf32>
    %43 = tpu.matmul %40, %42, %cst_25 {dimension_numbers = #tpu.dot_dimension_numbers<[1], [0], [0], [1], [0, 0, 1, 1], [], []>} : vector<256x256xbf16>, vector<256x256xbf16>, vector<256x256xf32> -> vector<256x256xf32>
    %44 = arith.addf %38, %43 : vector<256x256xf32>
    %45 = vector.extract_strided_slice %1 {offsets = [2, 1, 0], sizes = [16, 16, 256], strides = [1, 1, 1]} : vector<18x18x256xbf16> to vector<16x16x256xbf16>
    %46 = vector.shape_cast %45 : vector<16x16x256xbf16> to vector<256x256xbf16>
    %c7 = arith.constant 7 : index
    %c0_26 = arith.constant 0 : index
    %c0_27 = arith.constant 0 : index
    %47 = vector.load %arg3[%c7, %c0_26, %c0_27] : memref<9x256x256xbf16, #tpu.memory_space<vmem>>, vector<1x256x256xbf16>
    %48 = vector.shape_cast %47 : vector<1x256x256xbf16> to vector<256x256xbf16>
    %cst_28 = arith.constant dense<0.000000e+00> : vector<256x256xf32>
    %49 = tpu.matmul %46, %48, %cst_28 {dimension_numbers = #tpu.dot_dimension_numbers<[1], [0], [0], [1], [0, 0, 1, 1], [], []>} : vector<256x256xbf16>, vector<256x256xbf16>, vector<256x256xf32> -> vector<256x256xf32>
    %50 = arith.addf %44, %49 : vector<256x256xf32>
    %51 = vector.extract_strided_slice %1 {offsets = [2, 2, 0], sizes = [16, 16, 256], strides = [1, 1, 1]} : vector<18x18x256xbf16> to vector<16x16x256xbf16>
    %52 = vector.shape_cast %51 : vector<16x16x256xbf16> to vector<256x256xbf16>
    %c8 = arith.constant 8 : index
    %c0_29 = arith.constant 0 : index
    %c0_30 = arith.constant 0 : index
    %53 = vector.load %arg3[%c8, %c0_29, %c0_30] : memref<9x256x256xbf16, #tpu.memory_space<vmem>>, vector<1x256x256xbf16>
    %54 = vector.shape_cast %53 : vector<1x256x256xbf16> to vector<256x256xbf16>
    %cst_31 = arith.constant dense<0.000000e+00> : vector<256x256xf32>
    %55 = tpu.matmul %52, %54, %cst_31 {dimension_numbers = #tpu.dot_dimension_numbers<[1], [0], [0], [1], [0, 0, 1, 1], [], []>} : vector<256x256xbf16>, vector<256x256xbf16>, vector<256x256xf32> -> vector<256x256xf32>
    %56 = arith.addf %50, %55 : vector<256x256xf32>
    %57 = vector.shape_cast %56 : vector<256x256xf32> to vector<1x1x256x256xf32>
    %58 = arith.truncf %57 : vector<1x1x256x256xf32> to vector<1x1x256x256xbf16>
    %c0_32 = arith.constant 0 : index
    %c0_33 = arith.constant 0 : index
    %c0_34 = arith.constant 0 : index
    %c0_35 = arith.constant 0 : index
    %59 = vector.load %arg4[%c0_32, %c0_33, %c0_34, %c0_35] : memref<1x1x256x256xbf16, #tpu.memory_space<vmem>>, vector<1x1x256x256xbf16>
    tpu.vector_store %arg4[%c0_32, %c0_33, %c0_34, %c0_35], %58 {strides = array<i32>} : memref<1x1x256x256xbf16, #tpu.memory_space<vmem>>, vector<1x1x256x256xbf16>,
    %cst_36 = arith.constant dense<0.000000e+00> : vector<256xf32>
    %60 = vector.multi_reduction <add>, %56, %cst_36 [0] : vector<256x256xf32> to vector<256xf32>
    %61 = vector.shape_cast %60 : vector<256xf32> to vector<1x1x1x256xf32>
    %c0_37 = arith.constant 0 : index
    %c0_38 = arith.constant 0 : index
    %c0_39 = arith.constant 0 : index
    %c0_40 = arith.constant 0 : index
    %62 = vector.load %arg5[%c0_37, %c0_38, %c0_39, %c0_40] : memref<1x1x1x256xf32, #tpu.memory_space<vmem>>, vector<1x1x1x256xf32>
    tpu.vector_store %arg5[%c0_37, %c0_38, %c0_39, %c0_40], %61 {strides = array<i32>} : memref<1x1x1x256xf32, #tpu.memory_space<vmem>>, vector<1x1x1x256xf32>,
    %63 = arith.mulf %56, %56 : vector<256x256xf32>
    %cst_41 = arith.constant dense<0.000000e+00> : vector<256xf32>
    %64 = vector.multi_reduction <add>, %63, %cst_41 [0] : vector<256x256xf32> to vector<256xf32>
    %65 = vector.shape_cast %64 : vector<256xf32> to vector<1x1x1x256xf32>
    %c0_42 = arith.constant 0 : index
    %c0_43 = arith.constant 0 : index
    %c0_44 = arith.constant 0 : index
    %c0_45 = arith.constant 0 : index
    %66 = vector.load %arg6[%c0_42, %c0_43, %c0_44, %c0_45] : memref<1x1x1x256xf32, #tpu.memory_space<vmem>>, vector<1x1x1x256xf32>
    tpu.vector_store %arg6[%c0_42, %c0_43, %c0_44, %c0_45], %65 {strides = array<i32>} : memref<1x1x1x256xf32, #tpu.memory_space<vmem>>, vector<1x1x1x256xf32>,
    return
  }
  func.func @transform_0(%arg0: i32, %arg1: i32) -> (i32, i32, i32, i32, i32) {
    %c0_i32 = arith.constant 0 : i32
    %c0_i32_0 = arith.constant 0 : i32
    %c0_i32_1 = arith.constant 0 : i32
    %c0_i32_2 = arith.constant 0 : i32
    return %arg0, %arg1, %c0_i32, %c0_i32_0, %c0_i32_1 : i32, i32, i32, i32, i32
  }
  func.func @transform_1(%arg0: i32, %arg1: i32) -> (i32, i32, i32) {
    %c0_i32 = arith.constant 0 : i32
    %c0_i32_0 = arith.constant 0 : i32
    %c0_i32_1 = arith.constant 0 : i32
    %c0_i32_2 = arith.constant 0 : i32
    return %c0_i32, %c0_i32_0, %c0_i32_1 : i32, i32, i32
  }
  func.func @transform_2(%arg0: i32, %arg1: i32) -> (i32, i32, i32, i32) {
    %c0_i32 = arith.constant 0 : i32
    %c0_i32_0 = arith.constant 0 : i32
    %c0_i32_1 = arith.constant 0 : i32
    return %arg0, %arg1, %c0_i32, %c0_i32_0 : i32, i32, i32, i32
  }
  func.func @transform_3(%arg0: i32, %arg1: i32) -> (i32, i32, i32, i32) {
    %c0_i32 = arith.constant 0 : i32
    %c0_i32_0 = arith.constant 0 : i32
    %c0_i32_1 = arith.constant 0 : i32
    return %arg0, %arg1, %c0_i32, %c0_i32_0 : i32, i32, i32, i32
  }
  func.func @transform_4(%arg0: i32, %arg1: i32) -> (i32, i32, i32, i32) {
    %c0_i32 = arith.constant 0 : i32
    %c0_i32_0 = arith.constant 0 : i32
    %c0_i32_1 = arith.constant 0 : i32
    return %arg0, %arg1, %c0_i32, %c0_i32_0 : i32, i32, i32, i32
  }
}

module attributes {stable_mosaic.version = 11 : i64} {
  func.func @_conv3x3_kernel(%arg0: i32, %arg1: i32, %arg2: memref<1x1x10x10x256xbf16, #tpu.memory_space<vmem>>, %arg3: memref<9x256x512xbf16, #tpu.memory_space<vmem>>, %arg4: memref<1x1x64x512xbf16, #tpu.memory_space<vmem>>, %arg5: memref<1x1x1x512xf32, #tpu.memory_space<vmem>>, %arg6: memref<1x1x1x512xf32, #tpu.memory_space<vmem>>) attributes {dimension_semantics = [#tpu.dimension_semantics<parallel>, #tpu.dimension_semantics<parallel>], iteration_bounds = array<i64: 2, 1>, scalar_prefetch = 0 : i64, scratch_operands = 0 : i64, tpu.core_type = #tpu.core_type<tc>, window_params = [{transform_indices = @transform_0, window_bounds = array<i64: 1, 1, 10, 10, 256>}, {pipeline_mode = #tpu.pipeline_mode<synchronous>, transform_indices = @transform_1, window_bounds = array<i64: 9, 256, 512>}, {transform_indices = @transform_2, window_bounds = array<i64: 1, 1, 64, 512>}, {transform_indices = @transform_3, window_bounds = array<i64: 1, 1, 1, 512>}, {transform_indices = @transform_4, window_bounds = array<i64: 1, 1, 1, 512>}]} {
    %c0 = arith.constant 0 : index
    %c0_0 = arith.constant 0 : index
    %c0_1 = arith.constant 0 : index
    %c0_2 = arith.constant 0 : index
    %c0_3 = arith.constant 0 : index
    %0 = vector.load %arg2[%c0, %c0_0, %c0_1, %c0_2, %c0_3] : memref<1x1x10x10x256xbf16, #tpu.memory_space<vmem>>, vector<1x1x10x10x256xbf16>
    %1 = vector.shape_cast %0 : vector<1x1x10x10x256xbf16> to vector<10x10x256xbf16>
    %cst = arith.constant 0.000000e+00 : f32
    %2 = vector.broadcast %cst : f32 to vector<64x512xf32>
    %3 = vector.extract_strided_slice %1 {offsets = [0, 0, 0], sizes = [8, 8, 256], strides = [1, 1, 1]} : vector<10x10x256xbf16> to vector<8x8x256xbf16>
    %4 = vector.shape_cast %3 : vector<8x8x256xbf16> to vector<64x256xbf16>
    %c0_4 = arith.constant 0 : index
    %c0_5 = arith.constant 0 : index
    %c0_6 = arith.constant 0 : index
    %5 = vector.load %arg3[%c0_4, %c0_5, %c0_6] : memref<9x256x512xbf16, #tpu.memory_space<vmem>>, vector<1x256x512xbf16>
    %6 = vector.shape_cast %5 : vector<1x256x512xbf16> to vector<256x512xbf16>
    %cst_7 = arith.constant dense<0.000000e+00> : vector<64x512xf32>
    %7 = tpu.matmul %4, %6, %cst_7 {dimension_numbers = #tpu.dot_dimension_numbers<[1], [0], [0], [1], [0, 0, 1, 1], [], []>} : vector<64x256xbf16>, vector<256x512xbf16>, vector<64x512xf32> -> vector<64x512xf32>
    %8 = arith.addf %2, %7 : vector<64x512xf32>
    %9 = vector.extract_strided_slice %1 {offsets = [0, 1, 0], sizes = [8, 8, 256], strides = [1, 1, 1]} : vector<10x10x256xbf16> to vector<8x8x256xbf16>
    %10 = vector.shape_cast %9 : vector<8x8x256xbf16> to vector<64x256xbf16>
    %c1 = arith.constant 1 : index
    %c0_8 = arith.constant 0 : index
    %c0_9 = arith.constant 0 : index
    %11 = vector.load %arg3[%c1, %c0_8, %c0_9] : memref<9x256x512xbf16, #tpu.memory_space<vmem>>, vector<1x256x512xbf16>
    %12 = vector.shape_cast %11 : vector<1x256x512xbf16> to vector<256x512xbf16>
    %cst_10 = arith.constant dense<0.000000e+00> : vector<64x512xf32>
    %13 = tpu.matmul %10, %12, %cst_10 {dimension_numbers = #tpu.dot_dimension_numbers<[1], [0], [0], [1], [0, 0, 1, 1], [], []>} : vector<64x256xbf16>, vector<256x512xbf16>, vector<64x512xf32> -> vector<64x512xf32>
    %14 = arith.addf %8, %13 : vector<64x512xf32>
    %15 = vector.extract_strided_slice %1 {offsets = [0, 2, 0], sizes = [8, 8, 256], strides = [1, 1, 1]} : vector<10x10x256xbf16> to vector<8x8x256xbf16>
    %16 = vector.shape_cast %15 : vector<8x8x256xbf16> to vector<64x256xbf16>
    %c2 = arith.constant 2 : index
    %c0_11 = arith.constant 0 : index
    %c0_12 = arith.constant 0 : index
    %17 = vector.load %arg3[%c2, %c0_11, %c0_12] : memref<9x256x512xbf16, #tpu.memory_space<vmem>>, vector<1x256x512xbf16>
    %18 = vector.shape_cast %17 : vector<1x256x512xbf16> to vector<256x512xbf16>
    %cst_13 = arith.constant dense<0.000000e+00> : vector<64x512xf32>
    %19 = tpu.matmul %16, %18, %cst_13 {dimension_numbers = #tpu.dot_dimension_numbers<[1], [0], [0], [1], [0, 0, 1, 1], [], []>} : vector<64x256xbf16>, vector<256x512xbf16>, vector<64x512xf32> -> vector<64x512xf32>
    %20 = arith.addf %14, %19 : vector<64x512xf32>
    %21 = vector.extract_strided_slice %1 {offsets = [1, 0, 0], sizes = [8, 8, 256], strides = [1, 1, 1]} : vector<10x10x256xbf16> to vector<8x8x256xbf16>
    %22 = vector.shape_cast %21 : vector<8x8x256xbf16> to vector<64x256xbf16>
    %c3 = arith.constant 3 : index
    %c0_14 = arith.constant 0 : index
    %c0_15 = arith.constant 0 : index
    %23 = vector.load %arg3[%c3, %c0_14, %c0_15] : memref<9x256x512xbf16, #tpu.memory_space<vmem>>, vector<1x256x512xbf16>
    %24 = vector.shape_cast %23 : vector<1x256x512xbf16> to vector<256x512xbf16>
    %cst_16 = arith.constant dense<0.000000e+00> : vector<64x512xf32>
    %25 = tpu.matmul %22, %24, %cst_16 {dimension_numbers = #tpu.dot_dimension_numbers<[1], [0], [0], [1], [0, 0, 1, 1], [], []>} : vector<64x256xbf16>, vector<256x512xbf16>, vector<64x512xf32> -> vector<64x512xf32>
    %26 = arith.addf %20, %25 : vector<64x512xf32>
    %27 = vector.extract_strided_slice %1 {offsets = [1, 1, 0], sizes = [8, 8, 256], strides = [1, 1, 1]} : vector<10x10x256xbf16> to vector<8x8x256xbf16>
    %28 = vector.shape_cast %27 : vector<8x8x256xbf16> to vector<64x256xbf16>
    %c4 = arith.constant 4 : index
    %c0_17 = arith.constant 0 : index
    %c0_18 = arith.constant 0 : index
    %29 = vector.load %arg3[%c4, %c0_17, %c0_18] : memref<9x256x512xbf16, #tpu.memory_space<vmem>>, vector<1x256x512xbf16>
    %30 = vector.shape_cast %29 : vector<1x256x512xbf16> to vector<256x512xbf16>
    %cst_19 = arith.constant dense<0.000000e+00> : vector<64x512xf32>
    %31 = tpu.matmul %28, %30, %cst_19 {dimension_numbers = #tpu.dot_dimension_numbers<[1], [0], [0], [1], [0, 0, 1, 1], [], []>} : vector<64x256xbf16>, vector<256x512xbf16>, vector<64x512xf32> -> vector<64x512xf32>
    %32 = arith.addf %26, %31 : vector<64x512xf32>
    %33 = vector.extract_strided_slice %1 {offsets = [1, 2, 0], sizes = [8, 8, 256], strides = [1, 1, 1]} : vector<10x10x256xbf16> to vector<8x8x256xbf16>
    %34 = vector.shape_cast %33 : vector<8x8x256xbf16> to vector<64x256xbf16>
    %c5 = arith.constant 5 : index
    %c0_20 = arith.constant 0 : index
    %c0_21 = arith.constant 0 : index
    %35 = vector.load %arg3[%c5, %c0_20, %c0_21] : memref<9x256x512xbf16, #tpu.memory_space<vmem>>, vector<1x256x512xbf16>
    %36 = vector.shape_cast %35 : vector<1x256x512xbf16> to vector<256x512xbf16>
    %cst_22 = arith.constant dense<0.000000e+00> : vector<64x512xf32>
    %37 = tpu.matmul %34, %36, %cst_22 {dimension_numbers = #tpu.dot_dimension_numbers<[1], [0], [0], [1], [0, 0, 1, 1], [], []>} : vector<64x256xbf16>, vector<256x512xbf16>, vector<64x512xf32> -> vector<64x512xf32>
    %38 = arith.addf %32, %37 : vector<64x512xf32>
    %39 = vector.extract_strided_slice %1 {offsets = [2, 0, 0], sizes = [8, 8, 256], strides = [1, 1, 1]} : vector<10x10x256xbf16> to vector<8x8x256xbf16>
    %40 = vector.shape_cast %39 : vector<8x8x256xbf16> to vector<64x256xbf16>
    %c6 = arith.constant 6 : index
    %c0_23 = arith.constant 0 : index
    %c0_24 = arith.constant 0 : index
    %41 = vector.load %arg3[%c6, %c0_23, %c0_24] : memref<9x256x512xbf16, #tpu.memory_space<vmem>>, vector<1x256x512xbf16>
    %42 = vector.shape_cast %41 : vector<1x256x512xbf16> to vector<256x512xbf16>
    %cst_25 = arith.constant dense<0.000000e+00> : vector<64x512xf32>
    %43 = tpu.matmul %40, %42, %cst_25 {dimension_numbers = #tpu.dot_dimension_numbers<[1], [0], [0], [1], [0, 0, 1, 1], [], []>} : vector<64x256xbf16>, vector<256x512xbf16>, vector<64x512xf32> -> vector<64x512xf32>
    %44 = arith.addf %38, %43 : vector<64x512xf32>
    %45 = vector.extract_strided_slice %1 {offsets = [2, 1, 0], sizes = [8, 8, 256], strides = [1, 1, 1]} : vector<10x10x256xbf16> to vector<8x8x256xbf16>
    %46 = vector.shape_cast %45 : vector<8x8x256xbf16> to vector<64x256xbf16>
    %c7 = arith.constant 7 : index
    %c0_26 = arith.constant 0 : index
    %c0_27 = arith.constant 0 : index
    %47 = vector.load %arg3[%c7, %c0_26, %c0_27] : memref<9x256x512xbf16, #tpu.memory_space<vmem>>, vector<1x256x512xbf16>
    %48 = vector.shape_cast %47 : vector<1x256x512xbf16> to vector<256x512xbf16>
    %cst_28 = arith.constant dense<0.000000e+00> : vector<64x512xf32>
    %49 = tpu.matmul %46, %48, %cst_28 {dimension_numbers = #tpu.dot_dimension_numbers<[1], [0], [0], [1], [0, 0, 1, 1], [], []>} : vector<64x256xbf16>, vector<256x512xbf16>, vector<64x512xf32> -> vector<64x512xf32>
    %50 = arith.addf %44, %49 : vector<64x512xf32>
    %51 = vector.extract_strided_slice %1 {offsets = [2, 2, 0], sizes = [8, 8, 256], strides = [1, 1, 1]} : vector<10x10x256xbf16> to vector<8x8x256xbf16>
    %52 = vector.shape_cast %51 : vector<8x8x256xbf16> to vector<64x256xbf16>
    %c8 = arith.constant 8 : index
    %c0_29 = arith.constant 0 : index
    %c0_30 = arith.constant 0 : index
    %53 = vector.load %arg3[%c8, %c0_29, %c0_30] : memref<9x256x512xbf16, #tpu.memory_space<vmem>>, vector<1x256x512xbf16>
    %54 = vector.shape_cast %53 : vector<1x256x512xbf16> to vector<256x512xbf16>
    %cst_31 = arith.constant dense<0.000000e+00> : vector<64x512xf32>
    %55 = tpu.matmul %52, %54, %cst_31 {dimension_numbers = #tpu.dot_dimension_numbers<[1], [0], [0], [1], [0, 0, 1, 1], [], []>} : vector<64x256xbf16>, vector<256x512xbf16>, vector<64x512xf32> -> vector<64x512xf32>
    %56 = arith.addf %50, %55 : vector<64x512xf32>
    %57 = vector.shape_cast %56 : vector<64x512xf32> to vector<1x1x64x512xf32>
    %58 = arith.truncf %57 : vector<1x1x64x512xf32> to vector<1x1x64x512xbf16>
    %c0_32 = arith.constant 0 : index
    %c0_33 = arith.constant 0 : index
    %c0_34 = arith.constant 0 : index
    %c0_35 = arith.constant 0 : index
    %59 = vector.load %arg4[%c0_32, %c0_33, %c0_34, %c0_35] : memref<1x1x64x512xbf16, #tpu.memory_space<vmem>>, vector<1x1x64x512xbf16>
    tpu.vector_store %arg4[%c0_32, %c0_33, %c0_34, %c0_35], %58 {strides = array<i32>} : memref<1x1x64x512xbf16, #tpu.memory_space<vmem>>, vector<1x1x64x512xbf16>,
    %cst_36 = arith.constant dense<0.000000e+00> : vector<512xf32>
    %60 = vector.multi_reduction <add>, %56, %cst_36 [0] : vector<64x512xf32> to vector<512xf32>
    %61 = vector.shape_cast %60 : vector<512xf32> to vector<1x1x1x512xf32>
    %c0_37 = arith.constant 0 : index
    %c0_38 = arith.constant 0 : index
    %c0_39 = arith.constant 0 : index
    %c0_40 = arith.constant 0 : index
    %62 = vector.load %arg5[%c0_37, %c0_38, %c0_39, %c0_40] : memref<1x1x1x512xf32, #tpu.memory_space<vmem>>, vector<1x1x1x512xf32>
    tpu.vector_store %arg5[%c0_37, %c0_38, %c0_39, %c0_40], %61 {strides = array<i32>} : memref<1x1x1x512xf32, #tpu.memory_space<vmem>>, vector<1x1x1x512xf32>,
    %63 = arith.mulf %56, %56 : vector<64x512xf32>
    %cst_41 = arith.constant dense<0.000000e+00> : vector<512xf32>
    %64 = vector.multi_reduction <add>, %63, %cst_41 [0] : vector<64x512xf32> to vector<512xf32>
    %65 = vector.shape_cast %64 : vector<512xf32> to vector<1x1x1x512xf32>
    %c0_42 = arith.constant 0 : index
    %c0_43 = arith.constant 0 : index
    %c0_44 = arith.constant 0 : index
    %c0_45 = arith.constant 0 : index
    %66 = vector.load %arg6[%c0_42, %c0_43, %c0_44, %c0_45] : memref<1x1x1x512xf32, #tpu.memory_space<vmem>>, vector<1x1x1x512xf32>
    tpu.vector_store %arg6[%c0_42, %c0_43, %c0_44, %c0_45], %65 {strides = array<i32>} : memref<1x1x1x512xf32, #tpu.memory_space<vmem>>, vector<1x1x1x512xf32>,
    return
  }
  func.func @transform_0(%arg0: i32, %arg1: i32) -> (i32, i32, i32, i32, i32) {
    %c0_i32 = arith.constant 0 : i32
    %c0_i32_0 = arith.constant 0 : i32
    %c0_i32_1 = arith.constant 0 : i32
    %c0_i32_2 = arith.constant 0 : i32
    return %arg0, %arg1, %c0_i32, %c0_i32_0, %c0_i32_1 : i32, i32, i32, i32, i32
  }
  func.func @transform_1(%arg0: i32, %arg1: i32) -> (i32, i32, i32) {
    %c0_i32 = arith.constant 0 : i32
    %c0_i32_0 = arith.constant 0 : i32
    %c0_i32_1 = arith.constant 0 : i32
    %c0_i32_2 = arith.constant 0 : i32
    return %c0_i32, %c0_i32_0, %c0_i32_1 : i32, i32, i32
  }
  func.func @transform_2(%arg0: i32, %arg1: i32) -> (i32, i32, i32, i32) {
    %c0_i32 = arith.constant 0 : i32
    %c0_i32_0 = arith.constant 0 : i32
    %c0_i32_1 = arith.constant 0 : i32
    return %arg0, %arg1, %c0_i32, %c0_i32_0 : i32, i32, i32, i32
  }
  func.func @transform_3(%arg0: i32, %arg1: i32) -> (i32, i32, i32, i32) {
    %c0_i32 = arith.constant 0 : i32
    %c0_i32_0 = arith.constant 0 : i32
    %c0_i32_1 = arith.constant 0 : i32
    return %arg0, %arg1, %c0_i32, %c0_i32_0 : i32, i32, i32, i32
  }
  func.func @transform_4(%arg0: i32, %arg1: i32) -> (i32, i32, i32, i32) {
    %c0_i32 = arith.constant 0 : i32
    %c0_i32_0 = arith.constant 0 : i32
    %c0_i32_1 = arith.constant 0 : i32
    return %arg0, %arg1, %c0_i32, %c0_i32_0 : i32, i32, i32, i32
  }
}

module attributes {stable_mosaic.version = 11 : i64} {
  func.func @_affine_relu_kernel(%arg0: i32, %arg1: memref<128x512xbf16, #tpu.memory_space<vmem>>, %arg2: memref<1x512xf32, #tpu.memory_space<vmem>>, %arg3: memref<1x512xf32, #tpu.memory_space<vmem>>, %arg4: memref<128x512xbf16, #tpu.memory_space<vmem>>) attributes {dimension_semantics = [#tpu.dimension_semantics<parallel>], iteration_bounds = array<i64: 1>, scalar_prefetch = 0 : i64, scratch_operands = 0 : i64, tpu.core_type = #tpu.core_type<tc>, window_params = [{transform_indices = @transform_0, window_bounds = array<i64: 128, 512>}, {pipeline_mode = #tpu.pipeline_mode<synchronous>, transform_indices = @transform_1, window_bounds = array<i64: 1, 512>}, {pipeline_mode = #tpu.pipeline_mode<synchronous>, transform_indices = @transform_2, window_bounds = array<i64: 1, 512>}, {transform_indices = @transform_3, window_bounds = array<i64: 128, 512>}]} {
    %c0 = arith.constant 0 : index
    %c0_0 = arith.constant 0 : index
    %0 = vector.load %arg1[%c0, %c0_0] : memref<128x512xbf16, #tpu.memory_space<vmem>>, vector<128x512xbf16>
    %1 = arith.extf %0 : vector<128x512xbf16> to vector<128x512xf32>
    %c0_1 = arith.constant 0 : index
    %c0_2 = arith.constant 0 : index
    %2 = vector.load %arg2[%c0_1, %c0_2] : memref<1x512xf32, #tpu.memory_space<vmem>>, vector<1x512xf32>
    %3 = vector.broadcast %2 : vector<1x512xf32> to vector<128x512xf32>
    %4 = arith.mulf %1, %3 : vector<128x512xf32>
    %c0_3 = arith.constant 0 : index
    %c0_4 = arith.constant 0 : index
    %5 = vector.load %arg3[%c0_3, %c0_4] : memref<1x512xf32, #tpu.memory_space<vmem>>, vector<1x512xf32>
    %6 = vector.broadcast %5 : vector<1x512xf32> to vector<128x512xf32>
    %7 = arith.addf %4, %6 : vector<128x512xf32>
    %cst = arith.constant 0.000000e+00 : f32
    %8 = vector.broadcast %cst : f32 to vector<128x512xf32>
    %9 = arith.maximumf %7, %8 : vector<128x512xf32>
    %10 = arith.truncf %9 : vector<128x512xf32> to vector<128x512xbf16>
    %c0_5 = arith.constant 0 : index
    %c0_6 = arith.constant 0 : index
    %11 = vector.load %arg4[%c0_5, %c0_6] : memref<128x512xbf16, #tpu.memory_space<vmem>>, vector<128x512xbf16>
    tpu.vector_store %arg4[%c0_5, %c0_6], %10 {strides = array<i32>} : memref<128x512xbf16, #tpu.memory_space<vmem>>, vector<128x512xbf16>,
    return
  }
  func.func @transform_0(%arg0: i32) -> (i32, i32) {
    %c0_i32 = arith.constant 0 : i32
    %c0_i32_0 = arith.constant 0 : i32
    return %arg0, %c0_i32 : i32, i32
  }
  func.func @transform_1(%arg0: i32) -> (i32, i32) {
    %c0_i32 = arith.constant 0 : i32
    %c0_i32_0 = arith.constant 0 : i32
    %c0_i32_1 = arith.constant 0 : i32
    return %c0_i32, %c0_i32_0 : i32, i32
  }
  func.func @transform_2(%arg0: i32) -> (i32, i32) {
    %c0_i32 = arith.constant 0 : i32
    %c0_i32_0 = arith.constant 0 : i32
    %c0_i32_1 = arith.constant 0 : i32
    return %c0_i32, %c0_i32_0 : i32, i32
  }
  func.func @transform_3(%arg0: i32) -> (i32, i32) {
    %c0_i32 = arith.constant 0 : i32
    %c0_i32_0 = arith.constant 0 : i32
    return %arg0, %c0_i32 : i32, i32
  }
}

module attributes {stable_mosaic.version = 11 : i64} {
  func.func @_conv3x3_kernel(%arg0: i32, %arg1: i32, %arg2: memref<1x1x10x10x512xbf16, #tpu.memory_space<vmem>>, %arg3: memref<9x512x512xbf16, #tpu.memory_space<vmem>>, %arg4: memref<1x1x64x512xbf16, #tpu.memory_space<vmem>>, %arg5: memref<1x1x1x512xf32, #tpu.memory_space<vmem>>, %arg6: memref<1x1x1x512xf32, #tpu.memory_space<vmem>>) attributes {dimension_semantics = [#tpu.dimension_semantics<parallel>, #tpu.dimension_semantics<parallel>], iteration_bounds = array<i64: 2, 1>, scalar_prefetch = 0 : i64, scratch_operands = 0 : i64, tpu.core_type = #tpu.core_type<tc>, window_params = [{transform_indices = @transform_0, window_bounds = array<i64: 1, 1, 10, 10, 512>}, {pipeline_mode = #tpu.pipeline_mode<synchronous>, transform_indices = @transform_1, window_bounds = array<i64: 9, 512, 512>}, {transform_indices = @transform_2, window_bounds = array<i64: 1, 1, 64, 512>}, {transform_indices = @transform_3, window_bounds = array<i64: 1, 1, 1, 512>}, {transform_indices = @transform_4, window_bounds = array<i64: 1, 1, 1, 512>}]} {
    %c0 = arith.constant 0 : index
    %c0_0 = arith.constant 0 : index
    %c0_1 = arith.constant 0 : index
    %c0_2 = arith.constant 0 : index
    %c0_3 = arith.constant 0 : index
    %0 = vector.load %arg2[%c0, %c0_0, %c0_1, %c0_2, %c0_3] : memref<1x1x10x10x512xbf16, #tpu.memory_space<vmem>>, vector<1x1x10x10x512xbf16>
    %1 = vector.shape_cast %0 : vector<1x1x10x10x512xbf16> to vector<10x10x512xbf16>
    %cst = arith.constant 0.000000e+00 : f32
    %2 = vector.broadcast %cst : f32 to vector<64x512xf32>
    %3 = vector.extract_strided_slice %1 {offsets = [0, 0, 0], sizes = [8, 8, 512], strides = [1, 1, 1]} : vector<10x10x512xbf16> to vector<8x8x512xbf16>
    %4 = vector.shape_cast %3 : vector<8x8x512xbf16> to vector<64x512xbf16>
    %c0_4 = arith.constant 0 : index
    %c0_5 = arith.constant 0 : index
    %c0_6 = arith.constant 0 : index
    %5 = vector.load %arg3[%c0_4, %c0_5, %c0_6] : memref<9x512x512xbf16, #tpu.memory_space<vmem>>, vector<1x512x512xbf16>
    %6 = vector.shape_cast %5 : vector<1x512x512xbf16> to vector<512x512xbf16>
    %cst_7 = arith.constant dense<0.000000e+00> : vector<64x512xf32>
    %7 = tpu.matmul %4, %6, %cst_7 {dimension_numbers = #tpu.dot_dimension_numbers<[1], [0], [0], [1], [0, 0, 1, 1], [], []>} : vector<64x512xbf16>, vector<512x512xbf16>, vector<64x512xf32> -> vector<64x512xf32>
    %8 = arith.addf %2, %7 : vector<64x512xf32>
    %9 = vector.extract_strided_slice %1 {offsets = [0, 1, 0], sizes = [8, 8, 512], strides = [1, 1, 1]} : vector<10x10x512xbf16> to vector<8x8x512xbf16>
    %10 = vector.shape_cast %9 : vector<8x8x512xbf16> to vector<64x512xbf16>
    %c1 = arith.constant 1 : index
    %c0_8 = arith.constant 0 : index
    %c0_9 = arith.constant 0 : index
    %11 = vector.load %arg3[%c1, %c0_8, %c0_9] : memref<9x512x512xbf16, #tpu.memory_space<vmem>>, vector<1x512x512xbf16>
    %12 = vector.shape_cast %11 : vector<1x512x512xbf16> to vector<512x512xbf16>
    %cst_10 = arith.constant dense<0.000000e+00> : vector<64x512xf32>
    %13 = tpu.matmul %10, %12, %cst_10 {dimension_numbers = #tpu.dot_dimension_numbers<[1], [0], [0], [1], [0, 0, 1, 1], [], []>} : vector<64x512xbf16>, vector<512x512xbf16>, vector<64x512xf32> -> vector<64x512xf32>
    %14 = arith.addf %8, %13 : vector<64x512xf32>
    %15 = vector.extract_strided_slice %1 {offsets = [0, 2, 0], sizes = [8, 8, 512], strides = [1, 1, 1]} : vector<10x10x512xbf16> to vector<8x8x512xbf16>
    %16 = vector.shape_cast %15 : vector<8x8x512xbf16> to vector<64x512xbf16>
    %c2 = arith.constant 2 : index
    %c0_11 = arith.constant 0 : index
    %c0_12 = arith.constant 0 : index
    %17 = vector.load %arg3[%c2, %c0_11, %c0_12] : memref<9x512x512xbf16, #tpu.memory_space<vmem>>, vector<1x512x512xbf16>
    %18 = vector.shape_cast %17 : vector<1x512x512xbf16> to vector<512x512xbf16>
    %cst_13 = arith.constant dense<0.000000e+00> : vector<64x512xf32>
    %19 = tpu.matmul %16, %18, %cst_13 {dimension_numbers = #tpu.dot_dimension_numbers<[1], [0], [0], [1], [0, 0, 1, 1], [], []>} : vector<64x512xbf16>, vector<512x512xbf16>, vector<64x512xf32> -> vector<64x512xf32>
    %20 = arith.addf %14, %19 : vector<64x512xf32>
    %21 = vector.extract_strided_slice %1 {offsets = [1, 0, 0], sizes = [8, 8, 512], strides = [1, 1, 1]} : vector<10x10x512xbf16> to vector<8x8x512xbf16>
    %22 = vector.shape_cast %21 : vector<8x8x512xbf16> to vector<64x512xbf16>
    %c3 = arith.constant 3 : index
    %c0_14 = arith.constant 0 : index
    %c0_15 = arith.constant 0 : index
    %23 = vector.load %arg3[%c3, %c0_14, %c0_15] : memref<9x512x512xbf16, #tpu.memory_space<vmem>>, vector<1x512x512xbf16>
    %24 = vector.shape_cast %23 : vector<1x512x512xbf16> to vector<512x512xbf16>
    %cst_16 = arith.constant dense<0.000000e+00> : vector<64x512xf32>
    %25 = tpu.matmul %22, %24, %cst_16 {dimension_numbers = #tpu.dot_dimension_numbers<[1], [0], [0], [1], [0, 0, 1, 1], [], []>} : vector<64x512xbf16>, vector<512x512xbf16>, vector<64x512xf32> -> vector<64x512xf32>
    %26 = arith.addf %20, %25 : vector<64x512xf32>
    %27 = vector.extract_strided_slice %1 {offsets = [1, 1, 0], sizes = [8, 8, 512], strides = [1, 1, 1]} : vector<10x10x512xbf16> to vector<8x8x512xbf16>
    %28 = vector.shape_cast %27 : vector<8x8x512xbf16> to vector<64x512xbf16>
    %c4 = arith.constant 4 : index
    %c0_17 = arith.constant 0 : index
    %c0_18 = arith.constant 0 : index
    %29 = vector.load %arg3[%c4, %c0_17, %c0_18] : memref<9x512x512xbf16, #tpu.memory_space<vmem>>, vector<1x512x512xbf16>
    %30 = vector.shape_cast %29 : vector<1x512x512xbf16> to vector<512x512xbf16>
    %cst_19 = arith.constant dense<0.000000e+00> : vector<64x512xf32>
    %31 = tpu.matmul %28, %30, %cst_19 {dimension_numbers = #tpu.dot_dimension_numbers<[1], [0], [0], [1], [0, 0, 1, 1], [], []>} : vector<64x512xbf16>, vector<512x512xbf16>, vector<64x512xf32> -> vector<64x512xf32>
    %32 = arith.addf %26, %31 : vector<64x512xf32>
    %33 = vector.extract_strided_slice %1 {offsets = [1, 2, 0], sizes = [8, 8, 512], strides = [1, 1, 1]} : vector<10x10x512xbf16> to vector<8x8x512xbf16>
    %34 = vector.shape_cast %33 : vector<8x8x512xbf16> to vector<64x512xbf16>
    %c5 = arith.constant 5 : index
    %c0_20 = arith.constant 0 : index
    %c0_21 = arith.constant 0 : index
    %35 = vector.load %arg3[%c5, %c0_20, %c0_21] : memref<9x512x512xbf16, #tpu.memory_space<vmem>>, vector<1x512x512xbf16>
    %36 = vector.shape_cast %35 : vector<1x512x512xbf16> to vector<512x512xbf16>
    %cst_22 = arith.constant dense<0.000000e+00> : vector<64x512xf32>
    %37 = tpu.matmul %34, %36, %cst_22 {dimension_numbers = #tpu.dot_dimension_numbers<[1], [0], [0], [1], [0, 0, 1, 1], [], []>} : vector<64x512xbf16>, vector<512x512xbf16>, vector<64x512xf32> -> vector<64x512xf32>
    %38 = arith.addf %32, %37 : vector<64x512xf32>
    %39 = vector.extract_strided_slice %1 {offsets = [2, 0, 0], sizes = [8, 8, 512], strides = [1, 1, 1]} : vector<10x10x512xbf16> to vector<8x8x512xbf16>
    %40 = vector.shape_cast %39 : vector<8x8x512xbf16> to vector<64x512xbf16>
    %c6 = arith.constant 6 : index
    %c0_23 = arith.constant 0 : index
    %c0_24 = arith.constant 0 : index
    %41 = vector.load %arg3[%c6, %c0_23, %c0_24] : memref<9x512x512xbf16, #tpu.memory_space<vmem>>, vector<1x512x512xbf16>
    %42 = vector.shape_cast %41 : vector<1x512x512xbf16> to vector<512x512xbf16>
    %cst_25 = arith.constant dense<0.000000e+00> : vector<64x512xf32>
    %43 = tpu.matmul %40, %42, %cst_25 {dimension_numbers = #tpu.dot_dimension_numbers<[1], [0], [0], [1], [0, 0, 1, 1], [], []>} : vector<64x512xbf16>, vector<512x512xbf16>, vector<64x512xf32> -> vector<64x512xf32>
    %44 = arith.addf %38, %43 : vector<64x512xf32>
    %45 = vector.extract_strided_slice %1 {offsets = [2, 1, 0], sizes = [8, 8, 512], strides = [1, 1, 1]} : vector<10x10x512xbf16> to vector<8x8x512xbf16>
    %46 = vector.shape_cast %45 : vector<8x8x512xbf16> to vector<64x512xbf16>
    %c7 = arith.constant 7 : index
    %c0_26 = arith.constant 0 : index
    %c0_27 = arith.constant 0 : index
    %47 = vector.load %arg3[%c7, %c0_26, %c0_27] : memref<9x512x512xbf16, #tpu.memory_space<vmem>>, vector<1x512x512xbf16>
    %48 = vector.shape_cast %47 : vector<1x512x512xbf16> to vector<512x512xbf16>
    %cst_28 = arith.constant dense<0.000000e+00> : vector<64x512xf32>
    %49 = tpu.matmul %46, %48, %cst_28 {dimension_numbers = #tpu.dot_dimension_numbers<[1], [0], [0], [1], [0, 0, 1, 1], [], []>} : vector<64x512xbf16>, vector<512x512xbf16>, vector<64x512xf32> -> vector<64x512xf32>
    %50 = arith.addf %44, %49 : vector<64x512xf32>
    %51 = vector.extract_strided_slice %1 {offsets = [2, 2, 0], sizes = [8, 8, 512], strides = [1, 1, 1]} : vector<10x10x512xbf16> to vector<8x8x512xbf16>
    %52 = vector.shape_cast %51 : vector<8x8x512xbf16> to vector<64x512xbf16>
    %c8 = arith.constant 8 : index
    %c0_29 = arith.constant 0 : index
    %c0_30 = arith.constant 0 : index
    %53 = vector.load %arg3[%c8, %c0_29, %c0_30] : memref<9x512x512xbf16, #tpu.memory_space<vmem>>, vector<1x512x512xbf16>
    %54 = vector.shape_cast %53 : vector<1x512x512xbf16> to vector<512x512xbf16>
    %cst_31 = arith.constant dense<0.000000e+00> : vector<64x512xf32>
    %55 = tpu.matmul %52, %54, %cst_31 {dimension_numbers = #tpu.dot_dimension_numbers<[1], [0], [0], [1], [0, 0, 1, 1], [], []>} : vector<64x512xbf16>, vector<512x512xbf16>, vector<64x512xf32> -> vector<64x512xf32>
    %56 = arith.addf %50, %55 : vector<64x512xf32>
    %57 = vector.shape_cast %56 : vector<64x512xf32> to vector<1x1x64x512xf32>
    %58 = arith.truncf %57 : vector<1x1x64x512xf32> to vector<1x1x64x512xbf16>
    %c0_32 = arith.constant 0 : index
    %c0_33 = arith.constant 0 : index
    %c0_34 = arith.constant 0 : index
    %c0_35 = arith.constant 0 : index
    %59 = vector.load %arg4[%c0_32, %c0_33, %c0_34, %c0_35] : memref<1x1x64x512xbf16, #tpu.memory_space<vmem>>, vector<1x1x64x512xbf16>
    tpu.vector_store %arg4[%c0_32, %c0_33, %c0_34, %c0_35], %58 {strides = array<i32>} : memref<1x1x64x512xbf16, #tpu.memory_space<vmem>>, vector<1x1x64x512xbf16>,
    %cst_36 = arith.constant dense<0.000000e+00> : vector<512xf32>
    %60 = vector.multi_reduction <add>, %56, %cst_36 [0] : vector<64x512xf32> to vector<512xf32>
    %61 = vector.shape_cast %60 : vector<512xf32> to vector<1x1x1x512xf32>
    %c0_37 = arith.constant 0 : index
    %c0_38 = arith.constant 0 : index
    %c0_39 = arith.constant 0 : index
    %c0_40 = arith.constant 0 : index
    %62 = vector.load %arg5[%c0_37, %c0_38, %c0_39, %c0_40] : memref<1x1x1x512xf32, #tpu.memory_space<vmem>>, vector<1x1x1x512xf32>
    tpu.vector_store %arg5[%c0_37, %c0_38, %c0_39, %c0_40], %61 {strides = array<i32>} : memref<1x1x1x512xf32, #tpu.memory_space<vmem>>, vector<1x1x1x512xf32>,
    %63 = arith.mulf %56, %56 : vector<64x512xf32>
    %cst_41 = arith.constant dense<0.000000e+00> : vector<512xf32>
    %64 = vector.multi_reduction <add>, %63, %cst_41 [0] : vector<64x512xf32> to vector<512xf32>
    %65 = vector.shape_cast %64 : vector<512xf32> to vector<1x1x1x512xf32>
    %c0_42 = arith.constant 0 : index
    %c0_43 = arith.constant 0 : index
    %c0_44 = arith.constant 0 : index
    %c0_45 = arith.constant 0 : index
    %66 = vector.load %arg6[%c0_42, %c0_43, %c0_44, %c0_45] : memref<1x1x1x512xf32, #tpu.memory_space<vmem>>, vector<1x1x1x512xf32>
    tpu.vector_store %arg6[%c0_42, %c0_43, %c0_44, %c0_45], %65 {strides = array<i32>} : memref<1x1x1x512xf32, #tpu.memory_space<vmem>>, vector<1x1x1x512xf32>,
    return
  }
  func.func @transform_0(%arg0: i32, %arg1: i32) -> (i32, i32, i32, i32, i32) {
    %c0_i32 = arith.constant 0 : i32
    %c0_i32_0 = arith.constant 0 : i32
    %c0_i32_1 = arith.constant 0 : i32
    %c0_i32_2 = arith.constant 0 : i32
    return %arg0, %arg1, %c0_i32, %c0_i32_0, %c0_i32_1 : i32, i32, i32, i32, i32
  }
  func.func @transform_1(%arg0: i32, %arg1: i32) -> (i32, i32, i32) {
    %c0_i32 = arith.constant 0 : i32
    %c0_i32_0 = arith.constant 0 : i32
    %c0_i32_1 = arith.constant 0 : i32
    %c0_i32_2 = arith.constant 0 : i32
    return %c0_i32, %c0_i32_0, %c0_i32_1 : i32, i32, i32
  }
  func.func @transform_2(%arg0: i32, %arg1: i32) -> (i32, i32, i32, i32) {
    %c0_i32 = arith.constant 0 : i32
    %c0_i32_0 = arith.constant 0 : i32
    %c0_i32_1 = arith.constant 0 : i32
    return %arg0, %arg1, %c0_i32, %c0_i32_0 : i32, i32, i32, i32
  }
  func.func @transform_3(%arg0: i32, %arg1: i32) -> (i32, i32, i32, i32) {
    %c0_i32 = arith.constant 0 : i32
    %c0_i32_0 = arith.constant 0 : i32
    %c0_i32_1 = arith.constant 0 : i32
    return %arg0, %arg1, %c0_i32, %c0_i32_0 : i32, i32, i32, i32
  }
  func.func @transform_4(%arg0: i32, %arg1: i32) -> (i32, i32, i32, i32) {
    %c0_i32 = arith.constant 0 : i32
    %c0_i32_0 = arith.constant 0 : i32
    %c0_i32_1 = arith.constant 0 : i32
    return %arg0, %arg1, %c0_i32, %c0_i32_0 : i32, i32, i32, i32
  }
}

module attributes {stable_mosaic.version = 11 : i64} {
  func.func @_conv3x3_kernel(%arg0: i32, %arg1: i32, %arg2: memref<1x1x6x6x512xbf16, #tpu.memory_space<vmem>>, %arg3: memref<9x512x512xbf16, #tpu.memory_space<vmem>>, %arg4: memref<1x1x16x512xbf16, #tpu.memory_space<vmem>>, %arg5: memref<1x1x1x512xf32, #tpu.memory_space<vmem>>, %arg6: memref<1x1x1x512xf32, #tpu.memory_space<vmem>>) attributes {dimension_semantics = [#tpu.dimension_semantics<parallel>, #tpu.dimension_semantics<parallel>], iteration_bounds = array<i64: 2, 1>, scalar_prefetch = 0 : i64, scratch_operands = 0 : i64, tpu.core_type = #tpu.core_type<tc>, window_params = [{transform_indices = @transform_0, window_bounds = array<i64: 1, 1, 6, 6, 512>}, {pipeline_mode = #tpu.pipeline_mode<synchronous>, transform_indices = @transform_1, window_bounds = array<i64: 9, 512, 512>}, {transform_indices = @transform_2, window_bounds = array<i64: 1, 1, 16, 512>}, {transform_indices = @transform_3, window_bounds = array<i64: 1, 1, 1, 512>}, {transform_indices = @transform_4, window_bounds = array<i64: 1, 1, 1, 512>}]} {
    %c0 = arith.constant 0 : index
    %c0_0 = arith.constant 0 : index
    %c0_1 = arith.constant 0 : index
    %c0_2 = arith.constant 0 : index
    %c0_3 = arith.constant 0 : index
    %0 = vector.load %arg2[%c0, %c0_0, %c0_1, %c0_2, %c0_3] : memref<1x1x6x6x512xbf16, #tpu.memory_space<vmem>>, vector<1x1x6x6x512xbf16>
    %1 = vector.shape_cast %0 : vector<1x1x6x6x512xbf16> to vector<6x6x512xbf16>
    %cst = arith.constant 0.000000e+00 : f32
    %2 = vector.broadcast %cst : f32 to vector<16x512xf32>
    %3 = vector.extract_strided_slice %1 {offsets = [0, 0, 0], sizes = [4, 4, 512], strides = [1, 1, 1]} : vector<6x6x512xbf16> to vector<4x4x512xbf16>
    %4 = vector.shape_cast %3 : vector<4x4x512xbf16> to vector<16x512xbf16>
    %c0_4 = arith.constant 0 : index
    %c0_5 = arith.constant 0 : index
    %c0_6 = arith.constant 0 : index
    %5 = vector.load %arg3[%c0_4, %c0_5, %c0_6] : memref<9x512x512xbf16, #tpu.memory_space<vmem>>, vector<1x512x512xbf16>
    %6 = vector.shape_cast %5 : vector<1x512x512xbf16> to vector<512x512xbf16>
    %cst_7 = arith.constant dense<0.000000e+00> : vector<16x512xf32>
    %7 = tpu.matmul %4, %6, %cst_7 {dimension_numbers = #tpu.dot_dimension_numbers<[1], [0], [0], [1], [0, 0, 1, 1], [], []>} : vector<16x512xbf16>, vector<512x512xbf16>, vector<16x512xf32> -> vector<16x512xf32>
    %8 = arith.addf %2, %7 : vector<16x512xf32>
    %9 = vector.extract_strided_slice %1 {offsets = [0, 1, 0], sizes = [4, 4, 512], strides = [1, 1, 1]} : vector<6x6x512xbf16> to vector<4x4x512xbf16>
    %10 = vector.shape_cast %9 : vector<4x4x512xbf16> to vector<16x512xbf16>
    %c1 = arith.constant 1 : index
    %c0_8 = arith.constant 0 : index
    %c0_9 = arith.constant 0 : index
    %11 = vector.load %arg3[%c1, %c0_8, %c0_9] : memref<9x512x512xbf16, #tpu.memory_space<vmem>>, vector<1x512x512xbf16>
    %12 = vector.shape_cast %11 : vector<1x512x512xbf16> to vector<512x512xbf16>
    %cst_10 = arith.constant dense<0.000000e+00> : vector<16x512xf32>
    %13 = tpu.matmul %10, %12, %cst_10 {dimension_numbers = #tpu.dot_dimension_numbers<[1], [0], [0], [1], [0, 0, 1, 1], [], []>} : vector<16x512xbf16>, vector<512x512xbf16>, vector<16x512xf32> -> vector<16x512xf32>
    %14 = arith.addf %8, %13 : vector<16x512xf32>
    %15 = vector.extract_strided_slice %1 {offsets = [0, 2, 0], sizes = [4, 4, 512], strides = [1, 1, 1]} : vector<6x6x512xbf16> to vector<4x4x512xbf16>
    %16 = vector.shape_cast %15 : vector<4x4x512xbf16> to vector<16x512xbf16>
    %c2 = arith.constant 2 : index
    %c0_11 = arith.constant 0 : index
    %c0_12 = arith.constant 0 : index
    %17 = vector.load %arg3[%c2, %c0_11, %c0_12] : memref<9x512x512xbf16, #tpu.memory_space<vmem>>, vector<1x512x512xbf16>
    %18 = vector.shape_cast %17 : vector<1x512x512xbf16> to vector<512x512xbf16>
    %cst_13 = arith.constant dense<0.000000e+00> : vector<16x512xf32>
    %19 = tpu.matmul %16, %18, %cst_13 {dimension_numbers = #tpu.dot_dimension_numbers<[1], [0], [0], [1], [0, 0, 1, 1], [], []>} : vector<16x512xbf16>, vector<512x512xbf16>, vector<16x512xf32> -> vector<16x512xf32>
    %20 = arith.addf %14, %19 : vector<16x512xf32>
    %21 = vector.extract_strided_slice %1 {offsets = [1, 0, 0], sizes = [4, 4, 512], strides = [1, 1, 1]} : vector<6x6x512xbf16> to vector<4x4x512xbf16>
    %22 = vector.shape_cast %21 : vector<4x4x512xbf16> to vector<16x512xbf16>
    %c3 = arith.constant 3 : index
    %c0_14 = arith.constant 0 : index
    %c0_15 = arith.constant 0 : index
    %23 = vector.load %arg3[%c3, %c0_14, %c0_15] : memref<9x512x512xbf16, #tpu.memory_space<vmem>>, vector<1x512x512xbf16>
    %24 = vector.shape_cast %23 : vector<1x512x512xbf16> to vector<512x512xbf16>
    %cst_16 = arith.constant dense<0.000000e+00> : vector<16x512xf32>
    %25 = tpu.matmul %22, %24, %cst_16 {dimension_numbers = #tpu.dot_dimension_numbers<[1], [0], [0], [1], [0, 0, 1, 1], [], []>} : vector<16x512xbf16>, vector<512x512xbf16>, vector<16x512xf32> -> vector<16x512xf32>
    %26 = arith.addf %20, %25 : vector<16x512xf32>
    %27 = vector.extract_strided_slice %1 {offsets = [1, 1, 0], sizes = [4, 4, 512], strides = [1, 1, 1]} : vector<6x6x512xbf16> to vector<4x4x512xbf16>
    %28 = vector.shape_cast %27 : vector<4x4x512xbf16> to vector<16x512xbf16>
    %c4 = arith.constant 4 : index
    %c0_17 = arith.constant 0 : index
    %c0_18 = arith.constant 0 : index
    %29 = vector.load %arg3[%c4, %c0_17, %c0_18] : memref<9x512x512xbf16, #tpu.memory_space<vmem>>, vector<1x512x512xbf16>
    %30 = vector.shape_cast %29 : vector<1x512x512xbf16> to vector<512x512xbf16>
    %cst_19 = arith.constant dense<0.000000e+00> : vector<16x512xf32>
    %31 = tpu.matmul %28, %30, %cst_19 {dimension_numbers = #tpu.dot_dimension_numbers<[1], [0], [0], [1], [0, 0, 1, 1], [], []>} : vector<16x512xbf16>, vector<512x512xbf16>, vector<16x512xf32> -> vector<16x512xf32>
    %32 = arith.addf %26, %31 : vector<16x512xf32>
    %33 = vector.extract_strided_slice %1 {offsets = [1, 2, 0], sizes = [4, 4, 512], strides = [1, 1, 1]} : vector<6x6x512xbf16> to vector<4x4x512xbf16>
    %34 = vector.shape_cast %33 : vector<4x4x512xbf16> to vector<16x512xbf16>
    %c5 = arith.constant 5 : index
    %c0_20 = arith.constant 0 : index
    %c0_21 = arith.constant 0 : index
    %35 = vector.load %arg3[%c5, %c0_20, %c0_21] : memref<9x512x512xbf16, #tpu.memory_space<vmem>>, vector<1x512x512xbf16>
    %36 = vector.shape_cast %35 : vector<1x512x512xbf16> to vector<512x512xbf16>
    %cst_22 = arith.constant dense<0.000000e+00> : vector<16x512xf32>
    %37 = tpu.matmul %34, %36, %cst_22 {dimension_numbers = #tpu.dot_dimension_numbers<[1], [0], [0], [1], [0, 0, 1, 1], [], []>} : vector<16x512xbf16>, vector<512x512xbf16>, vector<16x512xf32> -> vector<16x512xf32>
    %38 = arith.addf %32, %37 : vector<16x512xf32>
    %39 = vector.extract_strided_slice %1 {offsets = [2, 0, 0], sizes = [4, 4, 512], strides = [1, 1, 1]} : vector<6x6x512xbf16> to vector<4x4x512xbf16>
    %40 = vector.shape_cast %39 : vector<4x4x512xbf16> to vector<16x512xbf16>
    %c6 = arith.constant 6 : index
    %c0_23 = arith.constant 0 : index
    %c0_24 = arith.constant 0 : index
    %41 = vector.load %arg3[%c6, %c0_23, %c0_24] : memref<9x512x512xbf16, #tpu.memory_space<vmem>>, vector<1x512x512xbf16>
    %42 = vector.shape_cast %41 : vector<1x512x512xbf16> to vector<512x512xbf16>
    %cst_25 = arith.constant dense<0.000000e+00> : vector<16x512xf32>
    %43 = tpu.matmul %40, %42, %cst_25 {dimension_numbers = #tpu.dot_dimension_numbers<[1], [0], [0], [1], [0, 0, 1, 1], [], []>} : vector<16x512xbf16>, vector<512x512xbf16>, vector<16x512xf32> -> vector<16x512xf32>
    %44 = arith.addf %38, %43 : vector<16x512xf32>
    %45 = vector.extract_strided_slice %1 {offsets = [2, 1, 0], sizes = [4, 4, 512], strides = [1, 1, 1]} : vector<6x6x512xbf16> to vector<4x4x512xbf16>
    %46 = vector.shape_cast %45 : vector<4x4x512xbf16> to vector<16x512xbf16>
    %c7 = arith.constant 7 : index
    %c0_26 = arith.constant 0 : index
    %c0_27 = arith.constant 0 : index
    %47 = vector.load %arg3[%c7, %c0_26, %c0_27] : memref<9x512x512xbf16, #tpu.memory_space<vmem>>, vector<1x512x512xbf16>
    %48 = vector.shape_cast %47 : vector<1x512x512xbf16> to vector<512x512xbf16>
    %cst_28 = arith.constant dense<0.000000e+00> : vector<16x512xf32>
    %49 = tpu.matmul %46, %48, %cst_28 {dimension_numbers = #tpu.dot_dimension_numbers<[1], [0], [0], [1], [0, 0, 1, 1], [], []>} : vector<16x512xbf16>, vector<512x512xbf16>, vector<16x512xf32> -> vector<16x512xf32>
    %50 = arith.addf %44, %49 : vector<16x512xf32>
    %51 = vector.extract_strided_slice %1 {offsets = [2, 2, 0], sizes = [4, 4, 512], strides = [1, 1, 1]} : vector<6x6x512xbf16> to vector<4x4x512xbf16>
    %52 = vector.shape_cast %51 : vector<4x4x512xbf16> to vector<16x512xbf16>
    %c8 = arith.constant 8 : index
    %c0_29 = arith.constant 0 : index
    %c0_30 = arith.constant 0 : index
    %53 = vector.load %arg3[%c8, %c0_29, %c0_30] : memref<9x512x512xbf16, #tpu.memory_space<vmem>>, vector<1x512x512xbf16>
    %54 = vector.shape_cast %53 : vector<1x512x512xbf16> to vector<512x512xbf16>
    %cst_31 = arith.constant dense<0.000000e+00> : vector<16x512xf32>
    %55 = tpu.matmul %52, %54, %cst_31 {dimension_numbers = #tpu.dot_dimension_numbers<[1], [0], [0], [1], [0, 0, 1, 1], [], []>} : vector<16x512xbf16>, vector<512x512xbf16>, vector<16x512xf32> -> vector<16x512xf32>
    %56 = arith.addf %50, %55 : vector<16x512xf32>
    %57 = vector.shape_cast %56 : vector<16x512xf32> to vector<1x1x16x512xf32>
    %58 = arith.truncf %57 : vector<1x1x16x512xf32> to vector<1x1x16x512xbf16>
    %c0_32 = arith.constant 0 : index
    %c0_33 = arith.constant 0 : index
    %c0_34 = arith.constant 0 : index
    %c0_35 = arith.constant 0 : index
    %59 = vector.load %arg4[%c0_32, %c0_33, %c0_34, %c0_35] : memref<1x1x16x512xbf16, #tpu.memory_space<vmem>>, vector<1x1x16x512xbf16>
    tpu.vector_store %arg4[%c0_32, %c0_33, %c0_34, %c0_35], %58 {strides = array<i32>} : memref<1x1x16x512xbf16, #tpu.memory_space<vmem>>, vector<1x1x16x512xbf16>,
    %cst_36 = arith.constant dense<0.000000e+00> : vector<512xf32>
    %60 = vector.multi_reduction <add>, %56, %cst_36 [0] : vector<16x512xf32> to vector<512xf32>
    %61 = vector.shape_cast %60 : vector<512xf32> to vector<1x1x1x512xf32>
    %c0_37 = arith.constant 0 : index
    %c0_38 = arith.constant 0 : index
    %c0_39 = arith.constant 0 : index
    %c0_40 = arith.constant 0 : index
    %62 = vector.load %arg5[%c0_37, %c0_38, %c0_39, %c0_40] : memref<1x1x1x512xf32, #tpu.memory_space<vmem>>, vector<1x1x1x512xf32>
    tpu.vector_store %arg5[%c0_37, %c0_38, %c0_39, %c0_40], %61 {strides = array<i32>} : memref<1x1x1x512xf32, #tpu.memory_space<vmem>>, vector<1x1x1x512xf32>,
    %63 = arith.mulf %56, %56 : vector<16x512xf32>
    %cst_41 = arith.constant dense<0.000000e+00> : vector<512xf32>
    %64 = vector.multi_reduction <add>, %63, %cst_41 [0] : vector<16x512xf32> to vector<512xf32>
    %65 = vector.shape_cast %64 : vector<512xf32> to vector<1x1x1x512xf32>
    %c0_42 = arith.constant 0 : index
    %c0_43 = arith.constant 0 : index
    %c0_44 = arith.constant 0 : index
    %c0_45 = arith.constant 0 : index
    %66 = vector.load %arg6[%c0_42, %c0_43, %c0_44, %c0_45] : memref<1x1x1x512xf32, #tpu.memory_space<vmem>>, vector<1x1x1x512xf32>
    tpu.vector_store %arg6[%c0_42, %c0_43, %c0_44, %c0_45], %65 {strides = array<i32>} : memref<1x1x1x512xf32, #tpu.memory_space<vmem>>, vector<1x1x1x512xf32>,
    return
  }
  func.func @transform_0(%arg0: i32, %arg1: i32) -> (i32, i32, i32, i32, i32) {
    %c0_i32 = arith.constant 0 : i32
    %c0_i32_0 = arith.constant 0 : i32
    %c0_i32_1 = arith.constant 0 : i32
    %c0_i32_2 = arith.constant 0 : i32
    return %arg0, %arg1, %c0_i32, %c0_i32_0, %c0_i32_1 : i32, i32, i32, i32, i32
  }
  func.func @transform_1(%arg0: i32, %arg1: i32) -> (i32, i32, i32) {
    %c0_i32 = arith.constant 0 : i32
    %c0_i32_0 = arith.constant 0 : i32
    %c0_i32_1 = arith.constant 0 : i32
    %c0_i32_2 = arith.constant 0 : i32
    return %c0_i32, %c0_i32_0, %c0_i32_1 : i32, i32, i32
  }
  func.func @transform_2(%arg0: i32, %arg1: i32) -> (i32, i32, i32, i32) {
    %c0_i32 = arith.constant 0 : i32
    %c0_i32_0 = arith.constant 0 : i32
    %c0_i32_1 = arith.constant 0 : i32
    return %arg0, %arg1, %c0_i32, %c0_i32_0 : i32, i32, i32, i32
  }
  func.func @transform_3(%arg0: i32, %arg1: i32) -> (i32, i32, i32, i32) {
    %c0_i32 = arith.constant 0 : i32
    %c0_i32_0 = arith.constant 0 : i32
    %c0_i32_1 = arith.constant 0 : i32
    return %arg0, %arg1, %c0_i32, %c0_i32_0 : i32, i32, i32, i32
  }
  func.func @transform_4(%arg0: i32, %arg1: i32) -> (i32, i32, i32, i32) {
    %c0_i32 = arith.constant 0 : i32
    %c0_i32_0 = arith.constant 0 : i32
    %c0_i32_1 = arith.constant 0 : i32
    return %arg0, %arg1, %c0_i32, %c0_i32_0 : i32, i32, i32, i32
  }
}

module attributes {stable_mosaic.version = 11 : i64} {
  func.func @_affine_relu_kernel(%arg0: i32, %arg1: memref<32x512xbf16, #tpu.memory_space<vmem>>, %arg2: memref<1x512xf32, #tpu.memory_space<vmem>>, %arg3: memref<1x512xf32, #tpu.memory_space<vmem>>, %arg4: memref<32x512xbf16, #tpu.memory_space<vmem>>) attributes {dimension_semantics = [#tpu.dimension_semantics<parallel>], iteration_bounds = array<i64: 1>, scalar_prefetch = 0 : i64, scratch_operands = 0 : i64, tpu.core_type = #tpu.core_type<tc>, window_params = [{transform_indices = @transform_0, window_bounds = array<i64: 32, 512>}, {pipeline_mode = #tpu.pipeline_mode<synchronous>, transform_indices = @transform_1, window_bounds = array<i64: 1, 512>}, {pipeline_mode = #tpu.pipeline_mode<synchronous>, transform_indices = @transform_2, window_bounds = array<i64: 1, 512>}, {transform_indices = @transform_3, window_bounds = array<i64: 32, 512>}]} {
    %c0 = arith.constant 0 : index
    %c0_0 = arith.constant 0 : index
    %0 = vector.load %arg1[%c0, %c0_0] : memref<32x512xbf16, #tpu.memory_space<vmem>>, vector<32x512xbf16>
    %1 = arith.extf %0 : vector<32x512xbf16> to vector<32x512xf32>
    %c0_1 = arith.constant 0 : index
    %c0_2 = arith.constant 0 : index
    %2 = vector.load %arg2[%c0_1, %c0_2] : memref<1x512xf32, #tpu.memory_space<vmem>>, vector<1x512xf32>
    %3 = vector.broadcast %2 : vector<1x512xf32> to vector<32x512xf32>
    %4 = arith.mulf %1, %3 : vector<32x512xf32>
    %c0_3 = arith.constant 0 : index
    %c0_4 = arith.constant 0 : index
    %5 = vector.load %arg3[%c0_3, %c0_4] : memref<1x512xf32, #tpu.memory_space<vmem>>, vector<1x512xf32>
    %6 = vector.broadcast %5 : vector<1x512xf32> to vector<32x512xf32>
    %7 = arith.addf %4, %6 : vector<32x512xf32>
    %cst = arith.constant 0.000000e+00 : f32
    %8 = vector.broadcast %cst : f32 to vector<32x512xf32>
    %9 = arith.maximumf %7, %8 : vector<32x512xf32>
    %10 = arith.truncf %9 : vector<32x512xf32> to vector<32x512xbf16>
    %c0_5 = arith.constant 0 : index
    %c0_6 = arith.constant 0 : index
    %11 = vector.load %arg4[%c0_5, %c0_6] : memref<32x512xbf16, #tpu.memory_space<vmem>>, vector<32x512xbf16>
    tpu.vector_store %arg4[%c0_5, %c0_6], %10 {strides = array<i32>} : memref<32x512xbf16, #tpu.memory_space<vmem>>, vector<32x512xbf16>,
    return
  }
  func.func @transform_0(%arg0: i32) -> (i32, i32) {
    %c0_i32 = arith.constant 0 : i32
    %c0_i32_0 = arith.constant 0 : i32
    return %arg0, %c0_i32 : i32, i32
  }
  func.func @transform_1(%arg0: i32) -> (i32, i32) {
    %c0_i32 = arith.constant 0 : i32
    %c0_i32_0 = arith.constant 0 : i32
    %c0_i32_1 = arith.constant 0 : i32
    return %c0_i32, %c0_i32_0 : i32, i32
  }
  func.func @transform_2(%arg0: i32) -> (i32, i32) {
    %c0_i32 = arith.constant 0 : i32
    %c0_i32_0 = arith.constant 0 : i32
    %c0_i32_1 = arith.constant 0 : i32
    return %c0_i32, %c0_i32_0 : i32, i32
  }
  func.func @transform_3(%arg0: i32) -> (i32, i32) {
    %c0_i32 = arith.constant 0 : i32
    %c0_i32_0 = arith.constant 0 : i32
    return %arg0, %c0_i32 : i32, i32
  }
}

module attributes {stable_mosaic.version = 11 : i64} {
  func.func @_mm_stats_kernel(%arg0: i32, %arg1: memref<8x512xbf16, #tpu.memory_space<vmem>>, %arg2: memref<512x64xbf16, #tpu.memory_space<vmem>>, %arg3: memref<8x64xbf16, #tpu.memory_space<vmem>>, %arg4: memref<1x1x64xf32, #tpu.memory_space<vmem>>, %arg5: memref<1x1x64xf32, #tpu.memory_space<vmem>>) attributes {dimension_semantics = [#tpu.dimension_semantics<parallel>], iteration_bounds = array<i64: 1>, scalar_prefetch = 0 : i64, scratch_operands = 0 : i64, tpu.core_type = #tpu.core_type<tc>, window_params = [{transform_indices = @transform_0, window_bounds = array<i64: 8, 512>}, {pipeline_mode = #tpu.pipeline_mode<synchronous>, transform_indices = @transform_1, window_bounds = array<i64: 512, 64>}, {transform_indices = @transform_2, window_bounds = array<i64: 8, 64>}, {transform_indices = @transform_3, window_bounds = array<i64: 1, 1, 64>}, {transform_indices = @transform_4, window_bounds = array<i64: 1, 1, 64>}]} {
    %c0 = arith.constant 0 : index
    %c0_0 = arith.constant 0 : index
    %0 = vector.load %arg1[%c0, %c0_0] : memref<8x512xbf16, #tpu.memory_space<vmem>>, vector<8x512xbf16>
    %c0_1 = arith.constant 0 : index
    %c0_2 = arith.constant 0 : index
    %1 = vector.load %arg2[%c0_1, %c0_2] : memref<512x64xbf16, #tpu.memory_space<vmem>>, vector<512x64xbf16>
    %cst = arith.constant dense<0.000000e+00> : vector<8x64xf32>
    %2 = tpu.matmul %0, %1, %cst {dimension_numbers = #tpu.dot_dimension_numbers<[1], [0], [0], [1], [0, 0, 1, 1], [], []>} : vector<8x512xbf16>, vector<512x64xbf16>, vector<8x64xf32> -> vector<8x64xf32>
    %3 = arith.truncf %2 : vector<8x64xf32> to vector<8x64xbf16>
    %c0_3 = arith.constant 0 : index
    %c0_4 = arith.constant 0 : index
    %4 = vector.load %arg3[%c0_3, %c0_4] : memref<8x64xbf16, #tpu.memory_space<vmem>>, vector<8x64xbf16>
    tpu.vector_store %arg3[%c0_3, %c0_4], %3 {strides = array<i32>} : memref<8x64xbf16, #tpu.memory_space<vmem>>, vector<8x64xbf16>,
    %cst_5 = arith.constant dense<0.000000e+00> : vector<64xf32>
    %5 = vector.multi_reduction <add>, %2, %cst_5 [0] : vector<8x64xf32> to vector<64xf32>
    %6 = vector.shape_cast %5 : vector<64xf32> to vector<1x1x64xf32>
    %c0_6 = arith.constant 0 : index
    %c0_7 = arith.constant 0 : index
    %c0_8 = arith.constant 0 : index
    %7 = vector.load %arg4[%c0_6, %c0_7, %c0_8] : memref<1x1x64xf32, #tpu.memory_space<vmem>>, vector<1x1x64xf32>
    tpu.vector_store %arg4[%c0_6, %c0_7, %c0_8], %6 {strides = array<i32>} : memref<1x1x64xf32, #tpu.memory_space<vmem>>, vector<1x1x64xf32>,
    %8 = arith.mulf %2, %2 : vector<8x64xf32>
    %cst_9 = arith.constant dense<0.000000e+00> : vector<64xf32>
    %9 = vector.multi_reduction <add>, %8, %cst_9 [0] : vector<8x64xf32> to vector<64xf32>
    %10 = vector.shape_cast %9 : vector<64xf32> to vector<1x1x64xf32>
    %c0_10 = arith.constant 0 : index
    %c0_11 = arith.constant 0 : index
    %c0_12 = arith.constant 0 : index
    %11 = vector.load %arg5[%c0_10, %c0_11, %c0_12] : memref<1x1x64xf32, #tpu.memory_space<vmem>>, vector<1x1x64xf32>
    tpu.vector_store %arg5[%c0_10, %c0_11, %c0_12], %10 {strides = array<i32>} : memref<1x1x64xf32, #tpu.memory_space<vmem>>, vector<1x1x64xf32>,
    return
  }
  func.func @transform_0(%arg0: i32) -> (i32, i32) {
    %c0_i32 = arith.constant 0 : i32
    %c0_i32_0 = arith.constant 0 : i32
    return %arg0, %c0_i32 : i32, i32
  }
  func.func @transform_1(%arg0: i32) -> (i32, i32) {
    %c0_i32 = arith.constant 0 : i32
    %c0_i32_0 = arith.constant 0 : i32
    %c0_i32_1 = arith.constant 0 : i32
    return %c0_i32, %c0_i32_0 : i32, i32
  }
  func.func @transform_2(%arg0: i32) -> (i32, i32) {
    %c0_i32 = arith.constant 0 : i32
    %c0_i32_0 = arith.constant 0 : i32
    return %arg0, %c0_i32 : i32, i32
  }
  func.func @transform_3(%arg0: i32) -> (i32, i32, i32) {
    %c0_i32 = arith.constant 0 : i32
    %c0_i32_0 = arith.constant 0 : i32
    %c0_i32_1 = arith.constant 0 : i32
    return %arg0, %c0_i32, %c0_i32_0 : i32, i32, i32
  }
  func.func @transform_4(%arg0: i32) -> (i32, i32, i32) {
    %c0_i32 = arith.constant 0 : i32
    %c0_i32_0 = arith.constant 0 : i32
    %c0_i32_1 = arith.constant 0 : i32
    return %arg0, %c0_i32, %c0_i32_0 : i32, i32, i32
  }
}

module attributes {stable_mosaic.version = 11 : i64} {
  func.func @_affine_relu_kernel(%arg0: i32, %arg1: memref<8x128xbf16, #tpu.memory_space<vmem>>, %arg2: memref<1x128xf32, #tpu.memory_space<vmem>>, %arg3: memref<1x128xf32, #tpu.memory_space<vmem>>, %arg4: memref<8x128xbf16, #tpu.memory_space<vmem>>) attributes {dimension_semantics = [#tpu.dimension_semantics<parallel>], iteration_bounds = array<i64: 1>, scalar_prefetch = 0 : i64, scratch_operands = 0 : i64, tpu.core_type = #tpu.core_type<tc>, window_params = [{transform_indices = @transform_0, window_bounds = array<i64: 8, 128>}, {pipeline_mode = #tpu.pipeline_mode<synchronous>, transform_indices = @transform_1, window_bounds = array<i64: 1, 128>}, {pipeline_mode = #tpu.pipeline_mode<synchronous>, transform_indices = @transform_2, window_bounds = array<i64: 1, 128>}, {transform_indices = @transform_3, window_bounds = array<i64: 8, 128>}]} {
    %c0 = arith.constant 0 : index
    %c0_0 = arith.constant 0 : index
    %0 = vector.load %arg1[%c0, %c0_0] : memref<8x128xbf16, #tpu.memory_space<vmem>>, vector<8x128xbf16>
    %1 = arith.extf %0 : vector<8x128xbf16> to vector<8x128xf32>
    %c0_1 = arith.constant 0 : index
    %c0_2 = arith.constant 0 : index
    %2 = vector.load %arg2[%c0_1, %c0_2] : memref<1x128xf32, #tpu.memory_space<vmem>>, vector<1x128xf32>
    %3 = vector.broadcast %2 : vector<1x128xf32> to vector<8x128xf32>
    %4 = arith.mulf %1, %3 : vector<8x128xf32>
    %c0_3 = arith.constant 0 : index
    %c0_4 = arith.constant 0 : index
    %5 = vector.load %arg3[%c0_3, %c0_4] : memref<1x128xf32, #tpu.memory_space<vmem>>, vector<1x128xf32>
    %6 = vector.broadcast %5 : vector<1x128xf32> to vector<8x128xf32>
    %7 = arith.addf %4, %6 : vector<8x128xf32>
    %cst = arith.constant 0.000000e+00 : f32
    %8 = vector.broadcast %cst : f32 to vector<8x128xf32>
    %9 = arith.maximumf %7, %8 : vector<8x128xf32>
    %10 = arith.truncf %9 : vector<8x128xf32> to vector<8x128xbf16>
    %c0_5 = arith.constant 0 : index
    %c0_6 = arith.constant 0 : index
    %11 = vector.load %arg4[%c0_5, %c0_6] : memref<8x128xbf16, #tpu.memory_space<vmem>>, vector<8x128xbf16>
    tpu.vector_store %arg4[%c0_5, %c0_6], %10 {strides = array<i32>} : memref<8x128xbf16, #tpu.memory_space<vmem>>, vector<8x128xbf16>,
    return
  }
  func.func @transform_0(%arg0: i32) -> (i32, i32) {
    %c0_i32 = arith.constant 0 : i32
    %c0_i32_0 = arith.constant 0 : i32
    return %arg0, %c0_i32 : i32, i32
  }
  func.func @transform_1(%arg0: i32) -> (i32, i32) {
    %c0_i32 = arith.constant 0 : i32
    %c0_i32_0 = arith.constant 0 : i32
    %c0_i32_1 = arith.constant 0 : i32
    return %c0_i32, %c0_i32_0 : i32, i32
  }
  func.func @transform_2(%arg0: i32) -> (i32, i32) {
    %c0_i32 = arith.constant 0 : i32
    %c0_i32_0 = arith.constant 0 : i32
    %c0_i32_1 = arith.constant 0 : i32
    return %c0_i32, %c0_i32_0 : i32, i32
  }
  func.func @transform_3(%arg0: i32) -> (i32, i32) {
    %c0_i32 = arith.constant 0 : i32
    %c0_i32_0 = arith.constant 0 : i32
    return %arg0, %c0_i32 : i32, i32
  }
}

module attributes {stable_mosaic.version = 11 : i64} {
  func.func @_mm_stats_kernel(%arg0: i32, %arg1: memref<32x512xbf16, #tpu.memory_space<vmem>>, %arg2: memref<512x64xbf16, #tpu.memory_space<vmem>>, %arg3: memref<32x64xbf16, #tpu.memory_space<vmem>>, %arg4: memref<1x1x64xf32, #tpu.memory_space<vmem>>, %arg5: memref<1x1x64xf32, #tpu.memory_space<vmem>>) attributes {dimension_semantics = [#tpu.dimension_semantics<parallel>], iteration_bounds = array<i64: 1>, scalar_prefetch = 0 : i64, scratch_operands = 0 : i64, tpu.core_type = #tpu.core_type<tc>, window_params = [{transform_indices = @transform_0, window_bounds = array<i64: 32, 512>}, {pipeline_mode = #tpu.pipeline_mode<synchronous>, transform_indices = @transform_1, window_bounds = array<i64: 512, 64>}, {transform_indices = @transform_2, window_bounds = array<i64: 32, 64>}, {transform_indices = @transform_3, window_bounds = array<i64: 1, 1, 64>}, {transform_indices = @transform_4, window_bounds = array<i64: 1, 1, 64>}]} {
    %c0 = arith.constant 0 : index
    %c0_0 = arith.constant 0 : index
    %0 = vector.load %arg1[%c0, %c0_0] : memref<32x512xbf16, #tpu.memory_space<vmem>>, vector<32x512xbf16>
    %c0_1 = arith.constant 0 : index
    %c0_2 = arith.constant 0 : index
    %1 = vector.load %arg2[%c0_1, %c0_2] : memref<512x64xbf16, #tpu.memory_space<vmem>>, vector<512x64xbf16>
    %cst = arith.constant dense<0.000000e+00> : vector<32x64xf32>
    %2 = tpu.matmul %0, %1, %cst {dimension_numbers = #tpu.dot_dimension_numbers<[1], [0], [0], [1], [0, 0, 1, 1], [], []>} : vector<32x512xbf16>, vector<512x64xbf16>, vector<32x64xf32> -> vector<32x64xf32>
    %3 = arith.truncf %2 : vector<32x64xf32> to vector<32x64xbf16>
    %c0_3 = arith.constant 0 : index
    %c0_4 = arith.constant 0 : index
    %4 = vector.load %arg3[%c0_3, %c0_4] : memref<32x64xbf16, #tpu.memory_space<vmem>>, vector<32x64xbf16>
    tpu.vector_store %arg3[%c0_3, %c0_4], %3 {strides = array<i32>} : memref<32x64xbf16, #tpu.memory_space<vmem>>, vector<32x64xbf16>,
    %cst_5 = arith.constant dense<0.000000e+00> : vector<64xf32>
    %5 = vector.multi_reduction <add>, %2, %cst_5 [0] : vector<32x64xf32> to vector<64xf32>
    %6 = vector.shape_cast %5 : vector<64xf32> to vector<1x1x64xf32>
    %c0_6 = arith.constant 0 : index
    %c0_7 = arith.constant 0 : index
    %c0_8 = arith.constant 0 : index
    %7 = vector.load %arg4[%c0_6, %c0_7, %c0_8] : memref<1x1x64xf32, #tpu.memory_space<vmem>>, vector<1x1x64xf32>
    tpu.vector_store %arg4[%c0_6, %c0_7, %c0_8], %6 {strides = array<i32>} : memref<1x1x64xf32, #tpu.memory_space<vmem>>, vector<1x1x64xf32>,
    %8 = arith.mulf %2, %2 : vector<32x64xf32>
    %cst_9 = arith.constant dense<0.000000e+00> : vector<64xf32>
    %9 = vector.multi_reduction <add>, %8, %cst_9 [0] : vector<32x64xf32> to vector<64xf32>
    %10 = vector.shape_cast %9 : vector<64xf32> to vector<1x1x64xf32>
    %c0_10 = arith.constant 0 : index
    %c0_11 = arith.constant 0 : index
    %c0_12 = arith.constant 0 : index
    %11 = vector.load %arg5[%c0_10, %c0_11, %c0_12] : memref<1x1x64xf32, #tpu.memory_space<vmem>>, vector<1x1x64xf32>
    tpu.vector_store %arg5[%c0_10, %c0_11, %c0_12], %10 {strides = array<i32>} : memref<1x1x64xf32, #tpu.memory_space<vmem>>, vector<1x1x64xf32>,
    return
  }
  func.func @transform_0(%arg0: i32) -> (i32, i32) {
    %c0_i32 = arith.constant 0 : i32
    %c0_i32_0 = arith.constant 0 : i32
    return %arg0, %c0_i32 : i32, i32
  }
  func.func @transform_1(%arg0: i32) -> (i32, i32) {
    %c0_i32 = arith.constant 0 : i32
    %c0_i32_0 = arith.constant 0 : i32
    %c0_i32_1 = arith.constant 0 : i32
    return %c0_i32, %c0_i32_0 : i32, i32
  }
  func.func @transform_2(%arg0: i32) -> (i32, i32) {
    %c0_i32 = arith.constant 0 : i32
    %c0_i32_0 = arith.constant 0 : i32
    return %arg0, %c0_i32 : i32, i32
  }
  func.func @transform_3(%arg0: i32) -> (i32, i32, i32) {
    %c0_i32 = arith.constant 0 : i32
    %c0_i32_0 = arith.constant 0 : i32
    %c0_i32_1 = arith.constant 0 : i32
    return %arg0, %c0_i32, %c0_i32_0 : i32, i32, i32
  }
  func.func @transform_4(%arg0: i32) -> (i32, i32, i32) {
    %c0_i32 = arith.constant 0 : i32
    %c0_i32_0 = arith.constant 0 : i32
    %c0_i32_1 = arith.constant 0 : i32
    return %arg0, %c0_i32, %c0_i32_0 : i32, i32, i32
  }
}

module attributes {stable_mosaic.version = 11 : i64} {
  func.func @_affine_relu_kernel(%arg0: i32, %arg1: memref<16x128xbf16, #tpu.memory_space<vmem>>, %arg2: memref<1x128xf32, #tpu.memory_space<vmem>>, %arg3: memref<1x128xf32, #tpu.memory_space<vmem>>, %arg4: memref<16x128xbf16, #tpu.memory_space<vmem>>) attributes {dimension_semantics = [#tpu.dimension_semantics<parallel>], iteration_bounds = array<i64: 1>, scalar_prefetch = 0 : i64, scratch_operands = 0 : i64, tpu.core_type = #tpu.core_type<tc>, window_params = [{transform_indices = @transform_0, window_bounds = array<i64: 16, 128>}, {pipeline_mode = #tpu.pipeline_mode<synchronous>, transform_indices = @transform_1, window_bounds = array<i64: 1, 128>}, {pipeline_mode = #tpu.pipeline_mode<synchronous>, transform_indices = @transform_2, window_bounds = array<i64: 1, 128>}, {transform_indices = @transform_3, window_bounds = array<i64: 16, 128>}]} {
    %c0 = arith.constant 0 : index
    %c0_0 = arith.constant 0 : index
    %0 = vector.load %arg1[%c0, %c0_0] : memref<16x128xbf16, #tpu.memory_space<vmem>>, vector<16x128xbf16>
    %1 = arith.extf %0 : vector<16x128xbf16> to vector<16x128xf32>
    %c0_1 = arith.constant 0 : index
    %c0_2 = arith.constant 0 : index
    %2 = vector.load %arg2[%c0_1, %c0_2] : memref<1x128xf32, #tpu.memory_space<vmem>>, vector<1x128xf32>
    %3 = vector.broadcast %2 : vector<1x128xf32> to vector<16x128xf32>
    %4 = arith.mulf %1, %3 : vector<16x128xf32>
    %c0_3 = arith.constant 0 : index
    %c0_4 = arith.constant 0 : index
    %5 = vector.load %arg3[%c0_3, %c0_4] : memref<1x128xf32, #tpu.memory_space<vmem>>, vector<1x128xf32>
    %6 = vector.broadcast %5 : vector<1x128xf32> to vector<16x128xf32>
    %7 = arith.addf %4, %6 : vector<16x128xf32>
    %cst = arith.constant 0.000000e+00 : f32
    %8 = vector.broadcast %cst : f32 to vector<16x128xf32>
    %9 = arith.maximumf %7, %8 : vector<16x128xf32>
    %10 = arith.truncf %9 : vector<16x128xf32> to vector<16x128xbf16>
    %c0_5 = arith.constant 0 : index
    %c0_6 = arith.constant 0 : index
    %11 = vector.load %arg4[%c0_5, %c0_6] : memref<16x128xbf16, #tpu.memory_space<vmem>>, vector<16x128xbf16>
    tpu.vector_store %arg4[%c0_5, %c0_6], %10 {strides = array<i32>} : memref<16x128xbf16, #tpu.memory_space<vmem>>, vector<16x128xbf16>,
    return
  }
  func.func @transform_0(%arg0: i32) -> (i32, i32) {
    %c0_i32 = arith.constant 0 : i32
    %c0_i32_0 = arith.constant 0 : i32
    return %arg0, %c0_i32 : i32, i32
  }
  func.func @transform_1(%arg0: i32) -> (i32, i32) {
    %c0_i32 = arith.constant 0 : i32
    %c0_i32_0 = arith.constant 0 : i32
    %c0_i32_1 = arith.constant 0 : i32
    return %c0_i32, %c0_i32_0 : i32, i32
  }
  func.func @transform_2(%arg0: i32) -> (i32, i32) {
    %c0_i32 = arith.constant 0 : i32
    %c0_i32_0 = arith.constant 0 : i32
    %c0_i32_1 = arith.constant 0 : i32
    return %c0_i32, %c0_i32_0 : i32, i32
  }
  func.func @transform_3(%arg0: i32) -> (i32, i32) {
    %c0_i32 = arith.constant 0 : i32
    %c0_i32_0 = arith.constant 0 : i32
    return %arg0, %c0_i32 : i32, i32
  }
}

module attributes {stable_mosaic.version = 11 : i64} {
  func.func @_mm_stats_kernel(%arg0: i32, %arg1: memref<128x256xbf16, #tpu.memory_space<vmem>>, %arg2: memref<256x64xbf16, #tpu.memory_space<vmem>>, %arg3: memref<128x64xbf16, #tpu.memory_space<vmem>>, %arg4: memref<1x1x64xf32, #tpu.memory_space<vmem>>, %arg5: memref<1x1x64xf32, #tpu.memory_space<vmem>>) attributes {dimension_semantics = [#tpu.dimension_semantics<parallel>], iteration_bounds = array<i64: 1>, scalar_prefetch = 0 : i64, scratch_operands = 0 : i64, tpu.core_type = #tpu.core_type<tc>, window_params = [{transform_indices = @transform_0, window_bounds = array<i64: 128, 256>}, {pipeline_mode = #tpu.pipeline_mode<synchronous>, transform_indices = @transform_1, window_bounds = array<i64: 256, 64>}, {transform_indices = @transform_2, window_bounds = array<i64: 128, 64>}, {transform_indices = @transform_3, window_bounds = array<i64: 1, 1, 64>}, {transform_indices = @transform_4, window_bounds = array<i64: 1, 1, 64>}]} {
    %c0 = arith.constant 0 : index
    %c0_0 = arith.constant 0 : index
    %0 = vector.load %arg1[%c0, %c0_0] : memref<128x256xbf16, #tpu.memory_space<vmem>>, vector<128x256xbf16>
    %c0_1 = arith.constant 0 : index
    %c0_2 = arith.constant 0 : index
    %1 = vector.load %arg2[%c0_1, %c0_2] : memref<256x64xbf16, #tpu.memory_space<vmem>>, vector<256x64xbf16>
    %cst = arith.constant dense<0.000000e+00> : vector<128x64xf32>
    %2 = tpu.matmul %0, %1, %cst {dimension_numbers = #tpu.dot_dimension_numbers<[1], [0], [0], [1], [0, 0, 1, 1], [], []>} : vector<128x256xbf16>, vector<256x64xbf16>, vector<128x64xf32> -> vector<128x64xf32>
    %3 = arith.truncf %2 : vector<128x64xf32> to vector<128x64xbf16>
    %c0_3 = arith.constant 0 : index
    %c0_4 = arith.constant 0 : index
    %4 = vector.load %arg3[%c0_3, %c0_4] : memref<128x64xbf16, #tpu.memory_space<vmem>>, vector<128x64xbf16>
    tpu.vector_store %arg3[%c0_3, %c0_4], %3 {strides = array<i32>} : memref<128x64xbf16, #tpu.memory_space<vmem>>, vector<128x64xbf16>,
    %cst_5 = arith.constant dense<0.000000e+00> : vector<64xf32>
    %5 = vector.multi_reduction <add>, %2, %cst_5 [0] : vector<128x64xf32> to vector<64xf32>
    %6 = vector.shape_cast %5 : vector<64xf32> to vector<1x1x64xf32>
    %c0_6 = arith.constant 0 : index
    %c0_7 = arith.constant 0 : index
    %c0_8 = arith.constant 0 : index
    %7 = vector.load %arg4[%c0_6, %c0_7, %c0_8] : memref<1x1x64xf32, #tpu.memory_space<vmem>>, vector<1x1x64xf32>
    tpu.vector_store %arg4[%c0_6, %c0_7, %c0_8], %6 {strides = array<i32>} : memref<1x1x64xf32, #tpu.memory_space<vmem>>, vector<1x1x64xf32>,
    %8 = arith.mulf %2, %2 : vector<128x64xf32>
    %cst_9 = arith.constant dense<0.000000e+00> : vector<64xf32>
    %9 = vector.multi_reduction <add>, %8, %cst_9 [0] : vector<128x64xf32> to vector<64xf32>
    %10 = vector.shape_cast %9 : vector<64xf32> to vector<1x1x64xf32>
    %c0_10 = arith.constant 0 : index
    %c0_11 = arith.constant 0 : index
    %c0_12 = arith.constant 0 : index
    %11 = vector.load %arg5[%c0_10, %c0_11, %c0_12] : memref<1x1x64xf32, #tpu.memory_space<vmem>>, vector<1x1x64xf32>
    tpu.vector_store %arg5[%c0_10, %c0_11, %c0_12], %10 {strides = array<i32>} : memref<1x1x64xf32, #tpu.memory_space<vmem>>, vector<1x1x64xf32>,
    return
  }
  func.func @transform_0(%arg0: i32) -> (i32, i32) {
    %c0_i32 = arith.constant 0 : i32
    %c0_i32_0 = arith.constant 0 : i32
    return %arg0, %c0_i32 : i32, i32
  }
  func.func @transform_1(%arg0: i32) -> (i32, i32) {
    %c0_i32 = arith.constant 0 : i32
    %c0_i32_0 = arith.constant 0 : i32
    %c0_i32_1 = arith.constant 0 : i32
    return %c0_i32, %c0_i32_0 : i32, i32
  }
  func.func @transform_2(%arg0: i32) -> (i32, i32) {
    %c0_i32 = arith.constant 0 : i32
    %c0_i32_0 = arith.constant 0 : i32
    return %arg0, %c0_i32 : i32, i32
  }
  func.func @transform_3(%arg0: i32) -> (i32, i32, i32) {
    %c0_i32 = arith.constant 0 : i32
    %c0_i32_0 = arith.constant 0 : i32
    %c0_i32_1 = arith.constant 0 : i32
    return %arg0, %c0_i32, %c0_i32_0 : i32, i32, i32
  }
  func.func @transform_4(%arg0: i32) -> (i32, i32, i32) {
    %c0_i32 = arith.constant 0 : i32
    %c0_i32_0 = arith.constant 0 : i32
    %c0_i32_1 = arith.constant 0 : i32
    return %arg0, %c0_i32, %c0_i32_0 : i32, i32, i32
  }
}

module attributes {stable_mosaic.version = 11 : i64} {
  func.func @_affine_relu_kernel(%arg0: i32, %arg1: memref<64x128xbf16, #tpu.memory_space<vmem>>, %arg2: memref<1x128xf32, #tpu.memory_space<vmem>>, %arg3: memref<1x128xf32, #tpu.memory_space<vmem>>, %arg4: memref<64x128xbf16, #tpu.memory_space<vmem>>) attributes {dimension_semantics = [#tpu.dimension_semantics<parallel>], iteration_bounds = array<i64: 1>, scalar_prefetch = 0 : i64, scratch_operands = 0 : i64, tpu.core_type = #tpu.core_type<tc>, window_params = [{transform_indices = @transform_0, window_bounds = array<i64: 64, 128>}, {pipeline_mode = #tpu.pipeline_mode<synchronous>, transform_indices = @transform_1, window_bounds = array<i64: 1, 128>}, {pipeline_mode = #tpu.pipeline_mode<synchronous>, transform_indices = @transform_2, window_bounds = array<i64: 1, 128>}, {transform_indices = @transform_3, window_bounds = array<i64: 64, 128>}]} {
    %c0 = arith.constant 0 : index
    %c0_0 = arith.constant 0 : index
    %0 = vector.load %arg1[%c0, %c0_0] : memref<64x128xbf16, #tpu.memory_space<vmem>>, vector<64x128xbf16>
    %1 = arith.extf %0 : vector<64x128xbf16> to vector<64x128xf32>
    %c0_1 = arith.constant 0 : index
    %c0_2 = arith.constant 0 : index
    %2 = vector.load %arg2[%c0_1, %c0_2] : memref<1x128xf32, #tpu.memory_space<vmem>>, vector<1x128xf32>
    %3 = vector.broadcast %2 : vector<1x128xf32> to vector<64x128xf32>
    %4 = arith.mulf %1, %3 : vector<64x128xf32>
    %c0_3 = arith.constant 0 : index
    %c0_4 = arith.constant 0 : index
    %5 = vector.load %arg3[%c0_3, %c0_4] : memref<1x128xf32, #tpu.memory_space<vmem>>, vector<1x128xf32>
    %6 = vector.broadcast %5 : vector<1x128xf32> to vector<64x128xf32>
    %7 = arith.addf %4, %6 : vector<64x128xf32>
    %cst = arith.constant 0.000000e+00 : f32
    %8 = vector.broadcast %cst : f32 to vector<64x128xf32>
    %9 = arith.maximumf %7, %8 : vector<64x128xf32>
    %10 = arith.truncf %9 : vector<64x128xf32> to vector<64x128xbf16>
    %c0_5 = arith.constant 0 : index
    %c0_6 = arith.constant 0 : index
    %11 = vector.load %arg4[%c0_5, %c0_6] : memref<64x128xbf16, #tpu.memory_space<vmem>>, vector<64x128xbf16>
    tpu.vector_store %arg4[%c0_5, %c0_6], %10 {strides = array<i32>} : memref<64x128xbf16, #tpu.memory_space<vmem>>, vector<64x128xbf16>,
    return
  }
  func.func @transform_0(%arg0: i32) -> (i32, i32) {
    %c0_i32 = arith.constant 0 : i32
    %c0_i32_0 = arith.constant 0 : i32
    return %arg0, %c0_i32 : i32, i32
  }
  func.func @transform_1(%arg0: i32) -> (i32, i32) {
    %c0_i32 = arith.constant 0 : i32
    %c0_i32_0 = arith.constant 0 : i32
    %c0_i32_1 = arith.constant 0 : i32
    return %c0_i32, %c0_i32_0 : i32, i32
  }
  func.func @transform_2(%arg0: i32) -> (i32, i32) {
    %c0_i32 = arith.constant 0 : i32
    %c0_i32_0 = arith.constant 0 : i32
    %c0_i32_1 = arith.constant 0 : i32
    return %c0_i32, %c0_i32_0 : i32, i32
  }
  func.func @transform_3(%arg0: i32) -> (i32, i32) {
    %c0_i32 = arith.constant 0 : i32
    %c0_i32_0 = arith.constant 0 : i32
    return %arg0, %c0_i32 : i32, i32
  }
}

module attributes {stable_mosaic.version = 11 : i64} {
  func.func @_mm_stats_kernel(%arg0: i32, %arg1: memref<512x128xbf16, #tpu.memory_space<vmem>>, %arg2: memref<128x64xbf16, #tpu.memory_space<vmem>>, %arg3: memref<512x64xbf16, #tpu.memory_space<vmem>>, %arg4: memref<1x1x64xf32, #tpu.memory_space<vmem>>, %arg5: memref<1x1x64xf32, #tpu.memory_space<vmem>>) attributes {dimension_semantics = [#tpu.dimension_semantics<parallel>], iteration_bounds = array<i64: 1>, scalar_prefetch = 0 : i64, scratch_operands = 0 : i64, tpu.core_type = #tpu.core_type<tc>, window_params = [{transform_indices = @transform_0, window_bounds = array<i64: 512, 128>}, {pipeline_mode = #tpu.pipeline_mode<synchronous>, transform_indices = @transform_1, window_bounds = array<i64: 128, 64>}, {transform_indices = @transform_2, window_bounds = array<i64: 512, 64>}, {transform_indices = @transform_3, window_bounds = array<i64: 1, 1, 64>}, {transform_indices = @transform_4, window_bounds = array<i64: 1, 1, 64>}]} {
    %c0 = arith.constant 0 : index
    %c0_0 = arith.constant 0 : index
    %0 = vector.load %arg1[%c0, %c0_0] : memref<512x128xbf16, #tpu.memory_space<vmem>>, vector<512x128xbf16>
    %c0_1 = arith.constant 0 : index
    %c0_2 = arith.constant 0 : index
    %1 = vector.load %arg2[%c0_1, %c0_2] : memref<128x64xbf16, #tpu.memory_space<vmem>>, vector<128x64xbf16>
    %cst = arith.constant dense<0.000000e+00> : vector<512x64xf32>
    %2 = tpu.matmul %0, %1, %cst {dimension_numbers = #tpu.dot_dimension_numbers<[1], [0], [0], [1], [0, 0, 1, 1], [], []>} : vector<512x128xbf16>, vector<128x64xbf16>, vector<512x64xf32> -> vector<512x64xf32>
    %3 = arith.truncf %2 : vector<512x64xf32> to vector<512x64xbf16>
    %c0_3 = arith.constant 0 : index
    %c0_4 = arith.constant 0 : index
    %4 = vector.load %arg3[%c0_3, %c0_4] : memref<512x64xbf16, #tpu.memory_space<vmem>>, vector<512x64xbf16>
    tpu.vector_store %arg3[%c0_3, %c0_4], %3 {strides = array<i32>} : memref<512x64xbf16, #tpu.memory_space<vmem>>, vector<512x64xbf16>,
    %cst_5 = arith.constant dense<0.000000e+00> : vector<64xf32>
    %5 = vector.multi_reduction <add>, %2, %cst_5 [0] : vector<512x64xf32> to vector<64xf32>
    %6 = vector.shape_cast %5 : vector<64xf32> to vector<1x1x64xf32>
    %c0_6 = arith.constant 0 : index
    %c0_7 = arith.constant 0 : index
    %c0_8 = arith.constant 0 : index
    %7 = vector.load %arg4[%c0_6, %c0_7, %c0_8] : memref<1x1x64xf32, #tpu.memory_space<vmem>>, vector<1x1x64xf32>
    tpu.vector_store %arg4[%c0_6, %c0_7, %c0_8], %6 {strides = array<i32>} : memref<1x1x64xf32, #tpu.memory_space<vmem>>, vector<1x1x64xf32>,
    %8 = arith.mulf %2, %2 : vector<512x64xf32>
    %cst_9 = arith.constant dense<0.000000e+00> : vector<64xf32>
    %9 = vector.multi_reduction <add>, %8, %cst_9 [0] : vector<512x64xf32> to vector<64xf32>
    %10 = vector.shape_cast %9 : vector<64xf32> to vector<1x1x64xf32>
    %c0_10 = arith.constant 0 : index
    %c0_11 = arith.constant 0 : index
    %c0_12 = arith.constant 0 : index
    %11 = vector.load %arg5[%c0_10, %c0_11, %c0_12] : memref<1x1x64xf32, #tpu.memory_space<vmem>>, vector<1x1x64xf32>
    tpu.vector_store %arg5[%c0_10, %c0_11, %c0_12], %10 {strides = array<i32>} : memref<1x1x64xf32, #tpu.memory_space<vmem>>, vector<1x1x64xf32>,
    return
  }
  func.func @transform_0(%arg0: i32) -> (i32, i32) {
    %c0_i32 = arith.constant 0 : i32
    %c0_i32_0 = arith.constant 0 : i32
    return %arg0, %c0_i32 : i32, i32
  }
  func.func @transform_1(%arg0: i32) -> (i32, i32) {
    %c0_i32 = arith.constant 0 : i32
    %c0_i32_0 = arith.constant 0 : i32
    %c0_i32_1 = arith.constant 0 : i32
    return %c0_i32, %c0_i32_0 : i32, i32
  }
  func.func @transform_2(%arg0: i32) -> (i32, i32) {
    %c0_i32 = arith.constant 0 : i32
    %c0_i32_0 = arith.constant 0 : i32
    return %arg0, %c0_i32 : i32, i32
  }
  func.func @transform_3(%arg0: i32) -> (i32, i32, i32) {
    %c0_i32 = arith.constant 0 : i32
    %c0_i32_0 = arith.constant 0 : i32
    %c0_i32_1 = arith.constant 0 : i32
    return %arg0, %c0_i32, %c0_i32_0 : i32, i32, i32
  }
  func.func @transform_4(%arg0: i32) -> (i32, i32, i32) {
    %c0_i32 = arith.constant 0 : i32
    %c0_i32_0 = arith.constant 0 : i32
    %c0_i32_1 = arith.constant 0 : i32
    return %arg0, %c0_i32, %c0_i32_0 : i32, i32, i32
  }
}

module attributes {stable_mosaic.version = 11 : i64} {
  func.func @_affine_relu_kernel(%arg0: i32, %arg1: memref<256x128xbf16, #tpu.memory_space<vmem>>, %arg2: memref<1x128xf32, #tpu.memory_space<vmem>>, %arg3: memref<1x128xf32, #tpu.memory_space<vmem>>, %arg4: memref<256x128xbf16, #tpu.memory_space<vmem>>) attributes {dimension_semantics = [#tpu.dimension_semantics<parallel>], iteration_bounds = array<i64: 1>, scalar_prefetch = 0 : i64, scratch_operands = 0 : i64, tpu.core_type = #tpu.core_type<tc>, window_params = [{transform_indices = @transform_0, window_bounds = array<i64: 256, 128>}, {pipeline_mode = #tpu.pipeline_mode<synchronous>, transform_indices = @transform_1, window_bounds = array<i64: 1, 128>}, {pipeline_mode = #tpu.pipeline_mode<synchronous>, transform_indices = @transform_2, window_bounds = array<i64: 1, 128>}, {transform_indices = @transform_3, window_bounds = array<i64: 256, 128>}]} {
    %c0 = arith.constant 0 : index
    %c0_0 = arith.constant 0 : index
    %0 = vector.load %arg1[%c0, %c0_0] : memref<256x128xbf16, #tpu.memory_space<vmem>>, vector<256x128xbf16>
    %1 = arith.extf %0 : vector<256x128xbf16> to vector<256x128xf32>
    %c0_1 = arith.constant 0 : index
    %c0_2 = arith.constant 0 : index
    %2 = vector.load %arg2[%c0_1, %c0_2] : memref<1x128xf32, #tpu.memory_space<vmem>>, vector<1x128xf32>
    %3 = vector.broadcast %2 : vector<1x128xf32> to vector<256x128xf32>
    %4 = arith.mulf %1, %3 : vector<256x128xf32>
    %c0_3 = arith.constant 0 : index
    %c0_4 = arith.constant 0 : index
    %5 = vector.load %arg3[%c0_3, %c0_4] : memref<1x128xf32, #tpu.memory_space<vmem>>, vector<1x128xf32>
    %6 = vector.broadcast %5 : vector<1x128xf32> to vector<256x128xf32>
    %7 = arith.addf %4, %6 : vector<256x128xf32>
    %cst = arith.constant 0.000000e+00 : f32
    %8 = vector.broadcast %cst : f32 to vector<256x128xf32>
    %9 = arith.maximumf %7, %8 : vector<256x128xf32>
    %10 = arith.truncf %9 : vector<256x128xf32> to vector<256x128xbf16>
    %c0_5 = arith.constant 0 : index
    %c0_6 = arith.constant 0 : index
    %11 = vector.load %arg4[%c0_5, %c0_6] : memref<256x128xbf16, #tpu.memory_space<vmem>>, vector<256x128xbf16>
    tpu.vector_store %arg4[%c0_5, %c0_6], %10 {strides = array<i32>} : memref<256x128xbf16, #tpu.memory_space<vmem>>, vector<256x128xbf16>,
    return
  }
  func.func @transform_0(%arg0: i32) -> (i32, i32) {
    %c0_i32 = arith.constant 0 : i32
    %c0_i32_0 = arith.constant 0 : i32
    return %arg0, %c0_i32 : i32, i32
  }
  func.func @transform_1(%arg0: i32) -> (i32, i32) {
    %c0_i32 = arith.constant 0 : i32
    %c0_i32_0 = arith.constant 0 : i32
    %c0_i32_1 = arith.constant 0 : i32
    return %c0_i32, %c0_i32_0 : i32, i32
  }
  func.func @transform_2(%arg0: i32) -> (i32, i32) {
    %c0_i32 = arith.constant 0 : i32
    %c0_i32_0 = arith.constant 0 : i32
    %c0_i32_1 = arith.constant 0 : i32
    return %c0_i32, %c0_i32_0 : i32, i32
  }
  func.func @transform_3(%arg0: i32) -> (i32, i32) {
    %c0_i32 = arith.constant 0 : i32
    %c0_i32_0 = arith.constant 0 : i32
    return %arg0, %c0_i32 : i32, i32
  }
}

module attributes {stable_mosaic.version = 11 : i64} {
  func.func @_conv3x3_kernel(%arg0: i32, %arg1: i32, %arg2: memref<1x1x24x24x256xbf16, #tpu.memory_space<vmem>>, %arg3: memref<9x256x64xbf16, #tpu.memory_space<vmem>>, %arg4: memref<1x1x256x64xbf16, #tpu.memory_space<vmem>>, %arg5: memref<1x1x1x64xf32, #tpu.memory_space<vmem>>, %arg6: memref<1x1x1x64xf32, #tpu.memory_space<vmem>>) attributes {dimension_semantics = [#tpu.dimension_semantics<parallel>, #tpu.dimension_semantics<parallel>], iteration_bounds = array<i64: 2, 1>, scalar_prefetch = 0 : i64, scratch_operands = 0 : i64, tpu.core_type = #tpu.core_type<tc>, window_params = [{transform_indices = @transform_0, window_bounds = array<i64: 1, 1, 24, 24, 256>}, {pipeline_mode = #tpu.pipeline_mode<synchronous>, transform_indices = @transform_1, window_bounds = array<i64: 9, 256, 64>}, {transform_indices = @transform_2, window_bounds = array<i64: 1, 1, 256, 64>}, {transform_indices = @transform_3, window_bounds = array<i64: 1, 1, 1, 64>}, {transform_indices = @transform_4, window_bounds = array<i64: 1, 1, 1, 64>}]} {
    %c0 = arith.constant 0 : index
    %c0_0 = arith.constant 0 : index
    %c0_1 = arith.constant 0 : index
    %c0_2 = arith.constant 0 : index
    %c0_3 = arith.constant 0 : index
    %0 = vector.load %arg2[%c0, %c0_0, %c0_1, %c0_2, %c0_3] : memref<1x1x24x24x256xbf16, #tpu.memory_space<vmem>>, vector<1x1x24x24x256xbf16>
    %1 = vector.shape_cast %0 : vector<1x1x24x24x256xbf16> to vector<24x24x256xbf16>
    %cst = arith.constant 0.000000e+00 : f32
    %2 = vector.broadcast %cst : f32 to vector<256x64xf32>
    %3 = vector.extract_strided_slice %1 {offsets = [0, 0, 0], sizes = [16, 16, 256], strides = [1, 1, 1]} : vector<24x24x256xbf16> to vector<16x16x256xbf16>
    %4 = vector.shape_cast %3 : vector<16x16x256xbf16> to vector<256x256xbf16>
    %c0_4 = arith.constant 0 : index
    %c0_5 = arith.constant 0 : index
    %c0_6 = arith.constant 0 : index
    %5 = vector.load %arg3[%c0_4, %c0_5, %c0_6] : memref<9x256x64xbf16, #tpu.memory_space<vmem>>, vector<1x256x64xbf16>
    %6 = vector.shape_cast %5 : vector<1x256x64xbf16> to vector<256x64xbf16>
    %cst_7 = arith.constant dense<0.000000e+00> : vector<256x64xf32>
    %7 = tpu.matmul %4, %6, %cst_7 {dimension_numbers = #tpu.dot_dimension_numbers<[1], [0], [0], [1], [0, 0, 1, 1], [], []>} : vector<256x256xbf16>, vector<256x64xbf16>, vector<256x64xf32> -> vector<256x64xf32>
    %8 = arith.addf %2, %7 : vector<256x64xf32>
    %9 = vector.extract_strided_slice %1 {offsets = [0, 4, 0], sizes = [16, 16, 256], strides = [1, 1, 1]} : vector<24x24x256xbf16> to vector<16x16x256xbf16>
    %10 = vector.shape_cast %9 : vector<16x16x256xbf16> to vector<256x256xbf16>
    %c1 = arith.constant 1 : index
    %c0_8 = arith.constant 0 : index
    %c0_9 = arith.constant 0 : index
    %11 = vector.load %arg3[%c1, %c0_8, %c0_9] : memref<9x256x64xbf16, #tpu.memory_space<vmem>>, vector<1x256x64xbf16>
    %12 = vector.shape_cast %11 : vector<1x256x64xbf16> to vector<256x64xbf16>
    %cst_10 = arith.constant dense<0.000000e+00> : vector<256x64xf32>
    %13 = tpu.matmul %10, %12, %cst_10 {dimension_numbers = #tpu.dot_dimension_numbers<[1], [0], [0], [1], [0, 0, 1, 1], [], []>} : vector<256x256xbf16>, vector<256x64xbf16>, vector<256x64xf32> -> vector<256x64xf32>
    %14 = arith.addf %8, %13 : vector<256x64xf32>
    %15 = vector.extract_strided_slice %1 {offsets = [0, 8, 0], sizes = [16, 16, 256], strides = [1, 1, 1]} : vector<24x24x256xbf16> to vector<16x16x256xbf16>
    %16 = vector.shape_cast %15 : vector<16x16x256xbf16> to vector<256x256xbf16>
    %c2 = arith.constant 2 : index
    %c0_11 = arith.constant 0 : index
    %c0_12 = arith.constant 0 : index
    %17 = vector.load %arg3[%c2, %c0_11, %c0_12] : memref<9x256x64xbf16, #tpu.memory_space<vmem>>, vector<1x256x64xbf16>
    %18 = vector.shape_cast %17 : vector<1x256x64xbf16> to vector<256x64xbf16>
    %cst_13 = arith.constant dense<0.000000e+00> : vector<256x64xf32>
    %19 = tpu.matmul %16, %18, %cst_13 {dimension_numbers = #tpu.dot_dimension_numbers<[1], [0], [0], [1], [0, 0, 1, 1], [], []>} : vector<256x256xbf16>, vector<256x64xbf16>, vector<256x64xf32> -> vector<256x64xf32>
    %20 = arith.addf %14, %19 : vector<256x64xf32>
    %21 = vector.extract_strided_slice %1 {offsets = [4, 0, 0], sizes = [16, 16, 256], strides = [1, 1, 1]} : vector<24x24x256xbf16> to vector<16x16x256xbf16>
    %22 = vector.shape_cast %21 : vector<16x16x256xbf16> to vector<256x256xbf16>
    %c3 = arith.constant 3 : index
    %c0_14 = arith.constant 0 : index
    %c0_15 = arith.constant 0 : index
    %23 = vector.load %arg3[%c3, %c0_14, %c0_15] : memref<9x256x64xbf16, #tpu.memory_space<vmem>>, vector<1x256x64xbf16>
    %24 = vector.shape_cast %23 : vector<1x256x64xbf16> to vector<256x64xbf16>
    %cst_16 = arith.constant dense<0.000000e+00> : vector<256x64xf32>
    %25 = tpu.matmul %22, %24, %cst_16 {dimension_numbers = #tpu.dot_dimension_numbers<[1], [0], [0], [1], [0, 0, 1, 1], [], []>} : vector<256x256xbf16>, vector<256x64xbf16>, vector<256x64xf32> -> vector<256x64xf32>
    %26 = arith.addf %20, %25 : vector<256x64xf32>
    %27 = vector.extract_strided_slice %1 {offsets = [4, 4, 0], sizes = [16, 16, 256], strides = [1, 1, 1]} : vector<24x24x256xbf16> to vector<16x16x256xbf16>
    %28 = vector.shape_cast %27 : vector<16x16x256xbf16> to vector<256x256xbf16>
    %c4 = arith.constant 4 : index
    %c0_17 = arith.constant 0 : index
    %c0_18 = arith.constant 0 : index
    %29 = vector.load %arg3[%c4, %c0_17, %c0_18] : memref<9x256x64xbf16, #tpu.memory_space<vmem>>, vector<1x256x64xbf16>
    %30 = vector.shape_cast %29 : vector<1x256x64xbf16> to vector<256x64xbf16>
    %cst_19 = arith.constant dense<0.000000e+00> : vector<256x64xf32>
    %31 = tpu.matmul %28, %30, %cst_19 {dimension_numbers = #tpu.dot_dimension_numbers<[1], [0], [0], [1], [0, 0, 1, 1], [], []>} : vector<256x256xbf16>, vector<256x64xbf16>, vector<256x64xf32> -> vector<256x64xf32>
    %32 = arith.addf %26, %31 : vector<256x64xf32>
    %33 = vector.extract_strided_slice %1 {offsets = [4, 8, 0], sizes = [16, 16, 256], strides = [1, 1, 1]} : vector<24x24x256xbf16> to vector<16x16x256xbf16>
    %34 = vector.shape_cast %33 : vector<16x16x256xbf16> to vector<256x256xbf16>
    %c5 = arith.constant 5 : index
    %c0_20 = arith.constant 0 : index
    %c0_21 = arith.constant 0 : index
    %35 = vector.load %arg3[%c5, %c0_20, %c0_21] : memref<9x256x64xbf16, #tpu.memory_space<vmem>>, vector<1x256x64xbf16>
    %36 = vector.shape_cast %35 : vector<1x256x64xbf16> to vector<256x64xbf16>
    %cst_22 = arith.constant dense<0.000000e+00> : vector<256x64xf32>
    %37 = tpu.matmul %34, %36, %cst_22 {dimension_numbers = #tpu.dot_dimension_numbers<[1], [0], [0], [1], [0, 0, 1, 1], [], []>} : vector<256x256xbf16>, vector<256x64xbf16>, vector<256x64xf32> -> vector<256x64xf32>
    %38 = arith.addf %32, %37 : vector<256x64xf32>
    %39 = vector.extract_strided_slice %1 {offsets = [8, 0, 0], sizes = [16, 16, 256], strides = [1, 1, 1]} : vector<24x24x256xbf16> to vector<16x16x256xbf16>
    %40 = vector.shape_cast %39 : vector<16x16x256xbf16> to vector<256x256xbf16>
    %c6 = arith.constant 6 : index
    %c0_23 = arith.constant 0 : index
    %c0_24 = arith.constant 0 : index
    %41 = vector.load %arg3[%c6, %c0_23, %c0_24] : memref<9x256x64xbf16, #tpu.memory_space<vmem>>, vector<1x256x64xbf16>
    %42 = vector.shape_cast %41 : vector<1x256x64xbf16> to vector<256x64xbf16>
    %cst_25 = arith.constant dense<0.000000e+00> : vector<256x64xf32>
    %43 = tpu.matmul %40, %42, %cst_25 {dimension_numbers = #tpu.dot_dimension_numbers<[1], [0], [0], [1], [0, 0, 1, 1], [], []>} : vector<256x256xbf16>, vector<256x64xbf16>, vector<256x64xf32> -> vector<256x64xf32>
    %44 = arith.addf %38, %43 : vector<256x64xf32>
    %45 = vector.extract_strided_slice %1 {offsets = [8, 4, 0], sizes = [16, 16, 256], strides = [1, 1, 1]} : vector<24x24x256xbf16> to vector<16x16x256xbf16>
    %46 = vector.shape_cast %45 : vector<16x16x256xbf16> to vector<256x256xbf16>
    %c7 = arith.constant 7 : index
    %c0_26 = arith.constant 0 : index
    %c0_27 = arith.constant 0 : index
    %47 = vector.load %arg3[%c7, %c0_26, %c0_27] : memref<9x256x64xbf16, #tpu.memory_space<vmem>>, vector<1x256x64xbf16>
    %48 = vector.shape_cast %47 : vector<1x256x64xbf16> to vector<256x64xbf16>
    %cst_28 = arith.constant dense<0.000000e+00> : vector<256x64xf32>
    %49 = tpu.matmul %46, %48, %cst_28 {dimension_numbers = #tpu.dot_dimension_numbers<[1], [0], [0], [1], [0, 0, 1, 1], [], []>} : vector<256x256xbf16>, vector<256x64xbf16>, vector<256x64xf32> -> vector<256x64xf32>
    %50 = arith.addf %44, %49 : vector<256x64xf32>
    %51 = vector.extract_strided_slice %1 {offsets = [8, 8, 0], sizes = [16, 16, 256], strides = [1, 1, 1]} : vector<24x24x256xbf16> to vector<16x16x256xbf16>
    %52 = vector.shape_cast %51 : vector<16x16x256xbf16> to vector<256x256xbf16>
    %c8 = arith.constant 8 : index
    %c0_29 = arith.constant 0 : index
    %c0_30 = arith.constant 0 : index
    %53 = vector.load %arg3[%c8, %c0_29, %c0_30] : memref<9x256x64xbf16, #tpu.memory_space<vmem>>, vector<1x256x64xbf16>
    %54 = vector.shape_cast %53 : vector<1x256x64xbf16> to vector<256x64xbf16>
    %cst_31 = arith.constant dense<0.000000e+00> : vector<256x64xf32>
    %55 = tpu.matmul %52, %54, %cst_31 {dimension_numbers = #tpu.dot_dimension_numbers<[1], [0], [0], [1], [0, 0, 1, 1], [], []>} : vector<256x256xbf16>, vector<256x64xbf16>, vector<256x64xf32> -> vector<256x64xf32>
    %56 = arith.addf %50, %55 : vector<256x64xf32>
    %57 = vector.shape_cast %56 : vector<256x64xf32> to vector<1x1x256x64xf32>
    %58 = arith.truncf %57 : vector<1x1x256x64xf32> to vector<1x1x256x64xbf16>
    %c0_32 = arith.constant 0 : index
    %c0_33 = arith.constant 0 : index
    %c0_34 = arith.constant 0 : index
    %c0_35 = arith.constant 0 : index
    %59 = vector.load %arg4[%c0_32, %c0_33, %c0_34, %c0_35] : memref<1x1x256x64xbf16, #tpu.memory_space<vmem>>, vector<1x1x256x64xbf16>
    tpu.vector_store %arg4[%c0_32, %c0_33, %c0_34, %c0_35], %58 {strides = array<i32>} : memref<1x1x256x64xbf16, #tpu.memory_space<vmem>>, vector<1x1x256x64xbf16>,
    %cst_36 = arith.constant dense<0.000000e+00> : vector<64xf32>
    %60 = vector.multi_reduction <add>, %56, %cst_36 [0] : vector<256x64xf32> to vector<64xf32>
    %61 = vector.shape_cast %60 : vector<64xf32> to vector<1x1x1x64xf32>
    %c0_37 = arith.constant 0 : index
    %c0_38 = arith.constant 0 : index
    %c0_39 = arith.constant 0 : index
    %c0_40 = arith.constant 0 : index
    %62 = vector.load %arg5[%c0_37, %c0_38, %c0_39, %c0_40] : memref<1x1x1x64xf32, #tpu.memory_space<vmem>>, vector<1x1x1x64xf32>
    tpu.vector_store %arg5[%c0_37, %c0_38, %c0_39, %c0_40], %61 {strides = array<i32>} : memref<1x1x1x64xf32, #tpu.memory_space<vmem>>, vector<1x1x1x64xf32>,
    %63 = arith.mulf %56, %56 : vector<256x64xf32>
    %cst_41 = arith.constant dense<0.000000e+00> : vector<64xf32>
    %64 = vector.multi_reduction <add>, %63, %cst_41 [0] : vector<256x64xf32> to vector<64xf32>
    %65 = vector.shape_cast %64 : vector<64xf32> to vector<1x1x1x64xf32>
    %c0_42 = arith.constant 0 : index
    %c0_43 = arith.constant 0 : index
    %c0_44 = arith.constant 0 : index
    %c0_45 = arith.constant 0 : index
    %66 = vector.load %arg6[%c0_42, %c0_43, %c0_44, %c0_45] : memref<1x1x1x64xf32, #tpu.memory_space<vmem>>, vector<1x1x1x64xf32>
    tpu.vector_store %arg6[%c0_42, %c0_43, %c0_44, %c0_45], %65 {strides = array<i32>} : memref<1x1x1x64xf32, #tpu.memory_space<vmem>>, vector<1x1x1x64xf32>,
    return
  }
  func.func @transform_0(%arg0: i32, %arg1: i32) -> (i32, i32, i32, i32, i32) {
    %c0_i32 = arith.constant 0 : i32
    %c0_i32_0 = arith.constant 0 : i32
    %c0_i32_1 = arith.constant 0 : i32
    %c0_i32_2 = arith.constant 0 : i32
    return %arg0, %arg1, %c0_i32, %c0_i32_0, %c0_i32_1 : i32, i32, i32, i32, i32
  }
  func.func @transform_1(%arg0: i32, %arg1: i32) -> (i32, i32, i32) {
    %c0_i32 = arith.constant 0 : i32
    %c0_i32_0 = arith.constant 0 : i32
    %c0_i32_1 = arith.constant 0 : i32
    %c0_i32_2 = arith.constant 0 : i32
    return %c0_i32, %c0_i32_0, %c0_i32_1 : i32, i32, i32
  }
  func.func @transform_2(%arg0: i32, %arg1: i32) -> (i32, i32, i32, i32) {
    %c0_i32 = arith.constant 0 : i32
    %c0_i32_0 = arith.constant 0 : i32
    %c0_i32_1 = arith.constant 0 : i32
    return %arg0, %arg1, %c0_i32, %c0_i32_0 : i32, i32, i32, i32
  }
  func.func @transform_3(%arg0: i32, %arg1: i32) -> (i32, i32, i32, i32) {
    %c0_i32 = arith.constant 0 : i32
    %c0_i32_0 = arith.constant 0 : i32
    %c0_i32_1 = arith.constant 0 : i32
    return %arg0, %arg1, %c0_i32, %c0_i32_0 : i32, i32, i32, i32
  }
  func.func @transform_4(%arg0: i32, %arg1: i32) -> (i32, i32, i32, i32) {
    %c0_i32 = arith.constant 0 : i32
    %c0_i32_0 = arith.constant 0 : i32
    %c0_i32_1 = arith.constant 0 : i32
    return %arg0, %arg1, %c0_i32, %c0_i32_0 : i32, i32, i32, i32
  }
}

module attributes {stable_mosaic.version = 11 : i64} {
  func.func @_conv3x3_kernel(%arg0: i32, %arg1: i32, %arg2: memref<1x1x20x20x256xbf16, #tpu.memory_space<vmem>>, %arg3: memref<9x256x64xbf16, #tpu.memory_space<vmem>>, %arg4: memref<1x1x256x64xbf16, #tpu.memory_space<vmem>>, %arg5: memref<1x1x1x64xf32, #tpu.memory_space<vmem>>, %arg6: memref<1x1x1x64xf32, #tpu.memory_space<vmem>>) attributes {dimension_semantics = [#tpu.dimension_semantics<parallel>, #tpu.dimension_semantics<parallel>], iteration_bounds = array<i64: 2, 1>, scalar_prefetch = 0 : i64, scratch_operands = 0 : i64, tpu.core_type = #tpu.core_type<tc>, window_params = [{transform_indices = @transform_0, window_bounds = array<i64: 1, 1, 20, 20, 256>}, {pipeline_mode = #tpu.pipeline_mode<synchronous>, transform_indices = @transform_1, window_bounds = array<i64: 9, 256, 64>}, {transform_indices = @transform_2, window_bounds = array<i64: 1, 1, 256, 64>}, {transform_indices = @transform_3, window_bounds = array<i64: 1, 1, 1, 64>}, {transform_indices = @transform_4, window_bounds = array<i64: 1, 1, 1, 64>}]} {
    %c0 = arith.constant 0 : index
    %c0_0 = arith.constant 0 : index
    %c0_1 = arith.constant 0 : index
    %c0_2 = arith.constant 0 : index
    %c0_3 = arith.constant 0 : index
    %0 = vector.load %arg2[%c0, %c0_0, %c0_1, %c0_2, %c0_3] : memref<1x1x20x20x256xbf16, #tpu.memory_space<vmem>>, vector<1x1x20x20x256xbf16>
    %1 = vector.shape_cast %0 : vector<1x1x20x20x256xbf16> to vector<20x20x256xbf16>
    %cst = arith.constant 0.000000e+00 : f32
    %2 = vector.broadcast %cst : f32 to vector<256x64xf32>
    %3 = vector.extract_strided_slice %1 {offsets = [0, 0, 0], sizes = [16, 16, 256], strides = [1, 1, 1]} : vector<20x20x256xbf16> to vector<16x16x256xbf16>
    %4 = vector.shape_cast %3 : vector<16x16x256xbf16> to vector<256x256xbf16>
    %c0_4 = arith.constant 0 : index
    %c0_5 = arith.constant 0 : index
    %c0_6 = arith.constant 0 : index
    %5 = vector.load %arg3[%c0_4, %c0_5, %c0_6] : memref<9x256x64xbf16, #tpu.memory_space<vmem>>, vector<1x256x64xbf16>
    %6 = vector.shape_cast %5 : vector<1x256x64xbf16> to vector<256x64xbf16>
    %cst_7 = arith.constant dense<0.000000e+00> : vector<256x64xf32>
    %7 = tpu.matmul %4, %6, %cst_7 {dimension_numbers = #tpu.dot_dimension_numbers<[1], [0], [0], [1], [0, 0, 1, 1], [], []>} : vector<256x256xbf16>, vector<256x64xbf16>, vector<256x64xf32> -> vector<256x64xf32>
    %8 = arith.addf %2, %7 : vector<256x64xf32>
    %9 = vector.extract_strided_slice %1 {offsets = [0, 2, 0], sizes = [16, 16, 256], strides = [1, 1, 1]} : vector<20x20x256xbf16> to vector<16x16x256xbf16>
    %10 = vector.shape_cast %9 : vector<16x16x256xbf16> to vector<256x256xbf16>
    %c1 = arith.constant 1 : index
    %c0_8 = arith.constant 0 : index
    %c0_9 = arith.constant 0 : index
    %11 = vector.load %arg3[%c1, %c0_8, %c0_9] : memref<9x256x64xbf16, #tpu.memory_space<vmem>>, vector<1x256x64xbf16>
    %12 = vector.shape_cast %11 : vector<1x256x64xbf16> to vector<256x64xbf16>
    %cst_10 = arith.constant dense<0.000000e+00> : vector<256x64xf32>
    %13 = tpu.matmul %10, %12, %cst_10 {dimension_numbers = #tpu.dot_dimension_numbers<[1], [0], [0], [1], [0, 0, 1, 1], [], []>} : vector<256x256xbf16>, vector<256x64xbf16>, vector<256x64xf32> -> vector<256x64xf32>
    %14 = arith.addf %8, %13 : vector<256x64xf32>
    %15 = vector.extract_strided_slice %1 {offsets = [0, 4, 0], sizes = [16, 16, 256], strides = [1, 1, 1]} : vector<20x20x256xbf16> to vector<16x16x256xbf16>
    %16 = vector.shape_cast %15 : vector<16x16x256xbf16> to vector<256x256xbf16>
    %c2 = arith.constant 2 : index
    %c0_11 = arith.constant 0 : index
    %c0_12 = arith.constant 0 : index
    %17 = vector.load %arg3[%c2, %c0_11, %c0_12] : memref<9x256x64xbf16, #tpu.memory_space<vmem>>, vector<1x256x64xbf16>
    %18 = vector.shape_cast %17 : vector<1x256x64xbf16> to vector<256x64xbf16>
    %cst_13 = arith.constant dense<0.000000e+00> : vector<256x64xf32>
    %19 = tpu.matmul %16, %18, %cst_13 {dimension_numbers = #tpu.dot_dimension_numbers<[1], [0], [0], [1], [0, 0, 1, 1], [], []>} : vector<256x256xbf16>, vector<256x64xbf16>, vector<256x64xf32> -> vector<256x64xf32>
    %20 = arith.addf %14, %19 : vector<256x64xf32>
    %21 = vector.extract_strided_slice %1 {offsets = [2, 0, 0], sizes = [16, 16, 256], strides = [1, 1, 1]} : vector<20x20x256xbf16> to vector<16x16x256xbf16>
    %22 = vector.shape_cast %21 : vector<16x16x256xbf16> to vector<256x256xbf16>
    %c3 = arith.constant 3 : index
    %c0_14 = arith.constant 0 : index
    %c0_15 = arith.constant 0 : index
    %23 = vector.load %arg3[%c3, %c0_14, %c0_15] : memref<9x256x64xbf16, #tpu.memory_space<vmem>>, vector<1x256x64xbf16>
    %24 = vector.shape_cast %23 : vector<1x256x64xbf16> to vector<256x64xbf16>
    %cst_16 = arith.constant dense<0.000000e+00> : vector<256x64xf32>
    %25 = tpu.matmul %22, %24, %cst_16 {dimension_numbers = #tpu.dot_dimension_numbers<[1], [0], [0], [1], [0, 0, 1, 1], [], []>} : vector<256x256xbf16>, vector<256x64xbf16>, vector<256x64xf32> -> vector<256x64xf32>
    %26 = arith.addf %20, %25 : vector<256x64xf32>
    %27 = vector.extract_strided_slice %1 {offsets = [2, 2, 0], sizes = [16, 16, 256], strides = [1, 1, 1]} : vector<20x20x256xbf16> to vector<16x16x256xbf16>
    %28 = vector.shape_cast %27 : vector<16x16x256xbf16> to vector<256x256xbf16>
    %c4 = arith.constant 4 : index
    %c0_17 = arith.constant 0 : index
    %c0_18 = arith.constant 0 : index
    %29 = vector.load %arg3[%c4, %c0_17, %c0_18] : memref<9x256x64xbf16, #tpu.memory_space<vmem>>, vector<1x256x64xbf16>
    %30 = vector.shape_cast %29 : vector<1x256x64xbf16> to vector<256x64xbf16>
    %cst_19 = arith.constant dense<0.000000e+00> : vector<256x64xf32>
    %31 = tpu.matmul %28, %30, %cst_19 {dimension_numbers = #tpu.dot_dimension_numbers<[1], [0], [0], [1], [0, 0, 1, 1], [], []>} : vector<256x256xbf16>, vector<256x64xbf16>, vector<256x64xf32> -> vector<256x64xf32>
    %32 = arith.addf %26, %31 : vector<256x64xf32>
    %33 = vector.extract_strided_slice %1 {offsets = [2, 4, 0], sizes = [16, 16, 256], strides = [1, 1, 1]} : vector<20x20x256xbf16> to vector<16x16x256xbf16>
    %34 = vector.shape_cast %33 : vector<16x16x256xbf16> to vector<256x256xbf16>
    %c5 = arith.constant 5 : index
    %c0_20 = arith.constant 0 : index
    %c0_21 = arith.constant 0 : index
    %35 = vector.load %arg3[%c5, %c0_20, %c0_21] : memref<9x256x64xbf16, #tpu.memory_space<vmem>>, vector<1x256x64xbf16>
    %36 = vector.shape_cast %35 : vector<1x256x64xbf16> to vector<256x64xbf16>
    %cst_22 = arith.constant dense<0.000000e+00> : vector<256x64xf32>
    %37 = tpu.matmul %34, %36, %cst_22 {dimension_numbers = #tpu.dot_dimension_numbers<[1], [0], [0], [1], [0, 0, 1, 1], [], []>} : vector<256x256xbf16>, vector<256x64xbf16>, vector<256x64xf32> -> vector<256x64xf32>
    %38 = arith.addf %32, %37 : vector<256x64xf32>
    %39 = vector.extract_strided_slice %1 {offsets = [4, 0, 0], sizes = [16, 16, 256], strides = [1, 1, 1]} : vector<20x20x256xbf16> to vector<16x16x256xbf16>
    %40 = vector.shape_cast %39 : vector<16x16x256xbf16> to vector<256x256xbf16>
    %c6 = arith.constant 6 : index
    %c0_23 = arith.constant 0 : index
    %c0_24 = arith.constant 0 : index
    %41 = vector.load %arg3[%c6, %c0_23, %c0_24] : memref<9x256x64xbf16, #tpu.memory_space<vmem>>, vector<1x256x64xbf16>
    %42 = vector.shape_cast %41 : vector<1x256x64xbf16> to vector<256x64xbf16>
    %cst_25 = arith.constant dense<0.000000e+00> : vector<256x64xf32>
    %43 = tpu.matmul %40, %42, %cst_25 {dimension_numbers = #tpu.dot_dimension_numbers<[1], [0], [0], [1], [0, 0, 1, 1], [], []>} : vector<256x256xbf16>, vector<256x64xbf16>, vector<256x64xf32> -> vector<256x64xf32>
    %44 = arith.addf %38, %43 : vector<256x64xf32>
    %45 = vector.extract_strided_slice %1 {offsets = [4, 2, 0], sizes = [16, 16, 256], strides = [1, 1, 1]} : vector<20x20x256xbf16> to vector<16x16x256xbf16>
    %46 = vector.shape_cast %45 : vector<16x16x256xbf16> to vector<256x256xbf16>
    %c7 = arith.constant 7 : index
    %c0_26 = arith.constant 0 : index
    %c0_27 = arith.constant 0 : index
    %47 = vector.load %arg3[%c7, %c0_26, %c0_27] : memref<9x256x64xbf16, #tpu.memory_space<vmem>>, vector<1x256x64xbf16>
    %48 = vector.shape_cast %47 : vector<1x256x64xbf16> to vector<256x64xbf16>
    %cst_28 = arith.constant dense<0.000000e+00> : vector<256x64xf32>
    %49 = tpu.matmul %46, %48, %cst_28 {dimension_numbers = #tpu.dot_dimension_numbers<[1], [0], [0], [1], [0, 0, 1, 1], [], []>} : vector<256x256xbf16>, vector<256x64xbf16>, vector<256x64xf32> -> vector<256x64xf32>
    %50 = arith.addf %44, %49 : vector<256x64xf32>
    %51 = vector.extract_strided_slice %1 {offsets = [4, 4, 0], sizes = [16, 16, 256], strides = [1, 1, 1]} : vector<20x20x256xbf16> to vector<16x16x256xbf16>
    %52 = vector.shape_cast %51 : vector<16x16x256xbf16> to vector<256x256xbf16>
    %c8 = arith.constant 8 : index
    %c0_29 = arith.constant 0 : index
    %c0_30 = arith.constant 0 : index
    %53 = vector.load %arg3[%c8, %c0_29, %c0_30] : memref<9x256x64xbf16, #tpu.memory_space<vmem>>, vector<1x256x64xbf16>
    %54 = vector.shape_cast %53 : vector<1x256x64xbf16> to vector<256x64xbf16>
    %cst_31 = arith.constant dense<0.000000e+00> : vector<256x64xf32>
    %55 = tpu.matmul %52, %54, %cst_31 {dimension_numbers = #tpu.dot_dimension_numbers<[1], [0], [0], [1], [0, 0, 1, 1], [], []>} : vector<256x256xbf16>, vector<256x64xbf16>, vector<256x64xf32> -> vector<256x64xf32>
    %56 = arith.addf %50, %55 : vector<256x64xf32>
    %57 = vector.shape_cast %56 : vector<256x64xf32> to vector<1x1x256x64xf32>
    %58 = arith.truncf %57 : vector<1x1x256x64xf32> to vector<1x1x256x64xbf16>
    %c0_32 = arith.constant 0 : index
    %c0_33 = arith.constant 0 : index
    %c0_34 = arith.constant 0 : index
    %c0_35 = arith.constant 0 : index
    %59 = vector.load %arg4[%c0_32, %c0_33, %c0_34, %c0_35] : memref<1x1x256x64xbf16, #tpu.memory_space<vmem>>, vector<1x1x256x64xbf16>
    tpu.vector_store %arg4[%c0_32, %c0_33, %c0_34, %c0_35], %58 {strides = array<i32>} : memref<1x1x256x64xbf16, #tpu.memory_space<vmem>>, vector<1x1x256x64xbf16>,
    %cst_36 = arith.constant dense<0.000000e+00> : vector<64xf32>
    %60 = vector.multi_reduction <add>, %56, %cst_36 [0] : vector<256x64xf32> to vector<64xf32>
    %61 = vector.shape_cast %60 : vector<64xf32> to vector<1x1x1x64xf32>
    %c0_37 = arith.constant 0 : index
    %c0_38 = arith.constant 0 : index
    %c0_39 = arith.constant 0 : index
    %c0_40 = arith.constant 0 : index
    %62 = vector.load %arg5[%c0_37, %c0_38, %c0_39, %c0_40] : memref<1x1x1x64xf32, #tpu.memory_space<vmem>>, vector<1x1x1x64xf32>
    tpu.vector_store %arg5[%c0_37, %c0_38, %c0_39, %c0_40], %61 {strides = array<i32>} : memref<1x1x1x64xf32, #tpu.memory_space<vmem>>, vector<1x1x1x64xf32>,
    %63 = arith.mulf %56, %56 : vector<256x64xf32>
    %cst_41 = arith.constant dense<0.000000e+00> : vector<64xf32>
    %64 = vector.multi_reduction <add>, %63, %cst_41 [0] : vector<256x64xf32> to vector<64xf32>
    %65 = vector.shape_cast %64 : vector<64xf32> to vector<1x1x1x64xf32>
    %c0_42 = arith.constant 0 : index
    %c0_43 = arith.constant 0 : index
    %c0_44 = arith.constant 0 : index
    %c0_45 = arith.constant 0 : index
    %66 = vector.load %arg6[%c0_42, %c0_43, %c0_44, %c0_45] : memref<1x1x1x64xf32, #tpu.memory_space<vmem>>, vector<1x1x1x64xf32>
    tpu.vector_store %arg6[%c0_42, %c0_43, %c0_44, %c0_45], %65 {strides = array<i32>} : memref<1x1x1x64xf32, #tpu.memory_space<vmem>>, vector<1x1x1x64xf32>,
    return
  }
  func.func @transform_0(%arg0: i32, %arg1: i32) -> (i32, i32, i32, i32, i32) {
    %c0_i32 = arith.constant 0 : i32
    %c0_i32_0 = arith.constant 0 : i32
    %c0_i32_1 = arith.constant 0 : i32
    %c0_i32_2 = arith.constant 0 : i32
    return %arg0, %arg1, %c0_i32, %c0_i32_0, %c0_i32_1 : i32, i32, i32, i32, i32
  }
  func.func @transform_1(%arg0: i32, %arg1: i32) -> (i32, i32, i32) {
    %c0_i32 = arith.constant 0 : i32
    %c0_i32_0 = arith.constant 0 : i32
    %c0_i32_1 = arith.constant 0 : i32
    %c0_i32_2 = arith.constant 0 : i32
    return %c0_i32, %c0_i32_0, %c0_i32_1 : i32, i32, i32
  }
  func.func @transform_2(%arg0: i32, %arg1: i32) -> (i32, i32, i32, i32) {
    %c0_i32 = arith.constant 0 : i32
    %c0_i32_0 = arith.constant 0 : i32
    %c0_i32_1 = arith.constant 0 : i32
    return %arg0, %arg1, %c0_i32, %c0_i32_0 : i32, i32, i32, i32
  }
  func.func @transform_3(%arg0: i32, %arg1: i32) -> (i32, i32, i32, i32) {
    %c0_i32 = arith.constant 0 : i32
    %c0_i32_0 = arith.constant 0 : i32
    %c0_i32_1 = arith.constant 0 : i32
    return %arg0, %arg1, %c0_i32, %c0_i32_0 : i32, i32, i32, i32
  }
  func.func @transform_4(%arg0: i32, %arg1: i32) -> (i32, i32, i32, i32) {
    %c0_i32 = arith.constant 0 : i32
    %c0_i32_0 = arith.constant 0 : i32
    %c0_i32_1 = arith.constant 0 : i32
    return %arg0, %arg1, %c0_i32, %c0_i32_0 : i32, i32, i32, i32
  }
}

module attributes {stable_mosaic.version = 11 : i64} {
  func.func @_conv3x3_kernel(%arg0: i32, %arg1: i32, %arg2: memref<1x1x18x18x256xbf16, #tpu.memory_space<vmem>>, %arg3: memref<9x256x64xbf16, #tpu.memory_space<vmem>>, %arg4: memref<1x1x256x64xbf16, #tpu.memory_space<vmem>>, %arg5: memref<1x1x1x64xf32, #tpu.memory_space<vmem>>, %arg6: memref<1x1x1x64xf32, #tpu.memory_space<vmem>>) attributes {dimension_semantics = [#tpu.dimension_semantics<parallel>, #tpu.dimension_semantics<parallel>], iteration_bounds = array<i64: 2, 1>, scalar_prefetch = 0 : i64, scratch_operands = 0 : i64, tpu.core_type = #tpu.core_type<tc>, window_params = [{transform_indices = @transform_0, window_bounds = array<i64: 1, 1, 18, 18, 256>}, {pipeline_mode = #tpu.pipeline_mode<synchronous>, transform_indices = @transform_1, window_bounds = array<i64: 9, 256, 64>}, {transform_indices = @transform_2, window_bounds = array<i64: 1, 1, 256, 64>}, {transform_indices = @transform_3, window_bounds = array<i64: 1, 1, 1, 64>}, {transform_indices = @transform_4, window_bounds = array<i64: 1, 1, 1, 64>}]} {
    %c0 = arith.constant 0 : index
    %c0_0 = arith.constant 0 : index
    %c0_1 = arith.constant 0 : index
    %c0_2 = arith.constant 0 : index
    %c0_3 = arith.constant 0 : index
    %0 = vector.load %arg2[%c0, %c0_0, %c0_1, %c0_2, %c0_3] : memref<1x1x18x18x256xbf16, #tpu.memory_space<vmem>>, vector<1x1x18x18x256xbf16>
    %1 = vector.shape_cast %0 : vector<1x1x18x18x256xbf16> to vector<18x18x256xbf16>
    %cst = arith.constant 0.000000e+00 : f32
    %2 = vector.broadcast %cst : f32 to vector<256x64xf32>
    %3 = vector.extract_strided_slice %1 {offsets = [0, 0, 0], sizes = [16, 16, 256], strides = [1, 1, 1]} : vector<18x18x256xbf16> to vector<16x16x256xbf16>
    %4 = vector.shape_cast %3 : vector<16x16x256xbf16> to vector<256x256xbf16>
    %c0_4 = arith.constant 0 : index
    %c0_5 = arith.constant 0 : index
    %c0_6 = arith.constant 0 : index
    %5 = vector.load %arg3[%c0_4, %c0_5, %c0_6] : memref<9x256x64xbf16, #tpu.memory_space<vmem>>, vector<1x256x64xbf16>
    %6 = vector.shape_cast %5 : vector<1x256x64xbf16> to vector<256x64xbf16>
    %cst_7 = arith.constant dense<0.000000e+00> : vector<256x64xf32>
    %7 = tpu.matmul %4, %6, %cst_7 {dimension_numbers = #tpu.dot_dimension_numbers<[1], [0], [0], [1], [0, 0, 1, 1], [], []>} : vector<256x256xbf16>, vector<256x64xbf16>, vector<256x64xf32> -> vector<256x64xf32>
    %8 = arith.addf %2, %7 : vector<256x64xf32>
    %9 = vector.extract_strided_slice %1 {offsets = [0, 1, 0], sizes = [16, 16, 256], strides = [1, 1, 1]} : vector<18x18x256xbf16> to vector<16x16x256xbf16>
    %10 = vector.shape_cast %9 : vector<16x16x256xbf16> to vector<256x256xbf16>
    %c1 = arith.constant 1 : index
    %c0_8 = arith.constant 0 : index
    %c0_9 = arith.constant 0 : index
    %11 = vector.load %arg3[%c1, %c0_8, %c0_9] : memref<9x256x64xbf16, #tpu.memory_space<vmem>>, vector<1x256x64xbf16>
    %12 = vector.shape_cast %11 : vector<1x256x64xbf16> to vector<256x64xbf16>
    %cst_10 = arith.constant dense<0.000000e+00> : vector<256x64xf32>
    %13 = tpu.matmul %10, %12, %cst_10 {dimension_numbers = #tpu.dot_dimension_numbers<[1], [0], [0], [1], [0, 0, 1, 1], [], []>} : vector<256x256xbf16>, vector<256x64xbf16>, vector<256x64xf32> -> vector<256x64xf32>
    %14 = arith.addf %8, %13 : vector<256x64xf32>
    %15 = vector.extract_strided_slice %1 {offsets = [0, 2, 0], sizes = [16, 16, 256], strides = [1, 1, 1]} : vector<18x18x256xbf16> to vector<16x16x256xbf16>
    %16 = vector.shape_cast %15 : vector<16x16x256xbf16> to vector<256x256xbf16>
    %c2 = arith.constant 2 : index
    %c0_11 = arith.constant 0 : index
    %c0_12 = arith.constant 0 : index
    %17 = vector.load %arg3[%c2, %c0_11, %c0_12] : memref<9x256x64xbf16, #tpu.memory_space<vmem>>, vector<1x256x64xbf16>
    %18 = vector.shape_cast %17 : vector<1x256x64xbf16> to vector<256x64xbf16>
    %cst_13 = arith.constant dense<0.000000e+00> : vector<256x64xf32>
    %19 = tpu.matmul %16, %18, %cst_13 {dimension_numbers = #tpu.dot_dimension_numbers<[1], [0], [0], [1], [0, 0, 1, 1], [], []>} : vector<256x256xbf16>, vector<256x64xbf16>, vector<256x64xf32> -> vector<256x64xf32>
    %20 = arith.addf %14, %19 : vector<256x64xf32>
    %21 = vector.extract_strided_slice %1 {offsets = [1, 0, 0], sizes = [16, 16, 256], strides = [1, 1, 1]} : vector<18x18x256xbf16> to vector<16x16x256xbf16>
    %22 = vector.shape_cast %21 : vector<16x16x256xbf16> to vector<256x256xbf16>
    %c3 = arith.constant 3 : index
    %c0_14 = arith.constant 0 : index
    %c0_15 = arith.constant 0 : index
    %23 = vector.load %arg3[%c3, %c0_14, %c0_15] : memref<9x256x64xbf16, #tpu.memory_space<vmem>>, vector<1x256x64xbf16>
    %24 = vector.shape_cast %23 : vector<1x256x64xbf16> to vector<256x64xbf16>
    %cst_16 = arith.constant dense<0.000000e+00> : vector<256x64xf32>
    %25 = tpu.matmul %22, %24, %cst_16 {dimension_numbers = #tpu.dot_dimension_numbers<[1], [0], [0], [1], [0, 0, 1, 1], [], []>} : vector<256x256xbf16>, vector<256x64xbf16>, vector<256x64xf32> -> vector<256x64xf32>
    %26 = arith.addf %20, %25 : vector<256x64xf32>
    %27 = vector.extract_strided_slice %1 {offsets = [1, 1, 0], sizes = [16, 16, 256], strides = [1, 1, 1]} : vector<18x18x256xbf16> to vector<16x16x256xbf16>
    %28 = vector.shape_cast %27 : vector<16x16x256xbf16> to vector<256x256xbf16>
    %c4 = arith.constant 4 : index
    %c0_17 = arith.constant 0 : index
    %c0_18 = arith.constant 0 : index
    %29 = vector.load %arg3[%c4, %c0_17, %c0_18] : memref<9x256x64xbf16, #tpu.memory_space<vmem>>, vector<1x256x64xbf16>
    %30 = vector.shape_cast %29 : vector<1x256x64xbf16> to vector<256x64xbf16>
    %cst_19 = arith.constant dense<0.000000e+00> : vector<256x64xf32>
    %31 = tpu.matmul %28, %30, %cst_19 {dimension_numbers = #tpu.dot_dimension_numbers<[1], [0], [0], [1], [0, 0, 1, 1], [], []>} : vector<256x256xbf16>, vector<256x64xbf16>, vector<256x64xf32> -> vector<256x64xf32>
    %32 = arith.addf %26, %31 : vector<256x64xf32>
    %33 = vector.extract_strided_slice %1 {offsets = [1, 2, 0], sizes = [16, 16, 256], strides = [1, 1, 1]} : vector<18x18x256xbf16> to vector<16x16x256xbf16>
    %34 = vector.shape_cast %33 : vector<16x16x256xbf16> to vector<256x256xbf16>
    %c5 = arith.constant 5 : index
    %c0_20 = arith.constant 0 : index
    %c0_21 = arith.constant 0 : index
    %35 = vector.load %arg3[%c5, %c0_20, %c0_21] : memref<9x256x64xbf16, #tpu.memory_space<vmem>>, vector<1x256x64xbf16>
    %36 = vector.shape_cast %35 : vector<1x256x64xbf16> to vector<256x64xbf16>
    %cst_22 = arith.constant dense<0.000000e+00> : vector<256x64xf32>
    %37 = tpu.matmul %34, %36, %cst_22 {dimension_numbers = #tpu.dot_dimension_numbers<[1], [0], [0], [1], [0, 0, 1, 1], [], []>} : vector<256x256xbf16>, vector<256x64xbf16>, vector<256x64xf32> -> vector<256x64xf32>
    %38 = arith.addf %32, %37 : vector<256x64xf32>
    %39 = vector.extract_strided_slice %1 {offsets = [2, 0, 0], sizes = [16, 16, 256], strides = [1, 1, 1]} : vector<18x18x256xbf16> to vector<16x16x256xbf16>
    %40 = vector.shape_cast %39 : vector<16x16x256xbf16> to vector<256x256xbf16>
    %c6 = arith.constant 6 : index
    %c0_23 = arith.constant 0 : index
    %c0_24 = arith.constant 0 : index
    %41 = vector.load %arg3[%c6, %c0_23, %c0_24] : memref<9x256x64xbf16, #tpu.memory_space<vmem>>, vector<1x256x64xbf16>
    %42 = vector.shape_cast %41 : vector<1x256x64xbf16> to vector<256x64xbf16>
    %cst_25 = arith.constant dense<0.000000e+00> : vector<256x64xf32>
    %43 = tpu.matmul %40, %42, %cst_25 {dimension_numbers = #tpu.dot_dimension_numbers<[1], [0], [0], [1], [0, 0, 1, 1], [], []>} : vector<256x256xbf16>, vector<256x64xbf16>, vector<256x64xf32> -> vector<256x64xf32>
    %44 = arith.addf %38, %43 : vector<256x64xf32>
    %45 = vector.extract_strided_slice %1 {offsets = [2, 1, 0], sizes = [16, 16, 256], strides = [1, 1, 1]} : vector<18x18x256xbf16> to vector<16x16x256xbf16>
    %46 = vector.shape_cast %45 : vector<16x16x256xbf16> to vector<256x256xbf16>
    %c7 = arith.constant 7 : index
    %c0_26 = arith.constant 0 : index
    %c0_27 = arith.constant 0 : index
    %47 = vector.load %arg3[%c7, %c0_26, %c0_27] : memref<9x256x64xbf16, #tpu.memory_space<vmem>>, vector<1x256x64xbf16>
    %48 = vector.shape_cast %47 : vector<1x256x64xbf16> to vector<256x64xbf16>
    %cst_28 = arith.constant dense<0.000000e+00> : vector<256x64xf32>
    %49 = tpu.matmul %46, %48, %cst_28 {dimension_numbers = #tpu.dot_dimension_numbers<[1], [0], [0], [1], [0, 0, 1, 1], [], []>} : vector<256x256xbf16>, vector<256x64xbf16>, vector<256x64xf32> -> vector<256x64xf32>
    %50 = arith.addf %44, %49 : vector<256x64xf32>
    %51 = vector.extract_strided_slice %1 {offsets = [2, 2, 0], sizes = [16, 16, 256], strides = [1, 1, 1]} : vector<18x18x256xbf16> to vector<16x16x256xbf16>
    %52 = vector.shape_cast %51 : vector<16x16x256xbf16> to vector<256x256xbf16>
    %c8 = arith.constant 8 : index
    %c0_29 = arith.constant 0 : index
    %c0_30 = arith.constant 0 : index
    %53 = vector.load %arg3[%c8, %c0_29, %c0_30] : memref<9x256x64xbf16, #tpu.memory_space<vmem>>, vector<1x256x64xbf16>
    %54 = vector.shape_cast %53 : vector<1x256x64xbf16> to vector<256x64xbf16>
    %cst_31 = arith.constant dense<0.000000e+00> : vector<256x64xf32>
    %55 = tpu.matmul %52, %54, %cst_31 {dimension_numbers = #tpu.dot_dimension_numbers<[1], [0], [0], [1], [0, 0, 1, 1], [], []>} : vector<256x256xbf16>, vector<256x64xbf16>, vector<256x64xf32> -> vector<256x64xf32>
    %56 = arith.addf %50, %55 : vector<256x64xf32>
    %57 = vector.shape_cast %56 : vector<256x64xf32> to vector<1x1x256x64xf32>
    %58 = arith.truncf %57 : vector<1x1x256x64xf32> to vector<1x1x256x64xbf16>
    %c0_32 = arith.constant 0 : index
    %c0_33 = arith.constant 0 : index
    %c0_34 = arith.constant 0 : index
    %c0_35 = arith.constant 0 : index
    %59 = vector.load %arg4[%c0_32, %c0_33, %c0_34, %c0_35] : memref<1x1x256x64xbf16, #tpu.memory_space<vmem>>, vector<1x1x256x64xbf16>
    tpu.vector_store %arg4[%c0_32, %c0_33, %c0_34, %c0_35], %58 {strides = array<i32>} : memref<1x1x256x64xbf16, #tpu.memory_space<vmem>>, vector<1x1x256x64xbf16>,
    %cst_36 = arith.constant dense<0.000000e+00> : vector<64xf32>
    %60 = vector.multi_reduction <add>, %56, %cst_36 [0] : vector<256x64xf32> to vector<64xf32>
    %61 = vector.shape_cast %60 : vector<64xf32> to vector<1x1x1x64xf32>
    %c0_37 = arith.constant 0 : index
    %c0_38 = arith.constant 0 : index
    %c0_39 = arith.constant 0 : index
    %c0_40 = arith.constant 0 : index
    %62 = vector.load %arg5[%c0_37, %c0_38, %c0_39, %c0_40] : memref<1x1x1x64xf32, #tpu.memory_space<vmem>>, vector<1x1x1x64xf32>
    tpu.vector_store %arg5[%c0_37, %c0_38, %c0_39, %c0_40], %61 {strides = array<i32>} : memref<1x1x1x64xf32, #tpu.memory_space<vmem>>, vector<1x1x1x64xf32>,
    %63 = arith.mulf %56, %56 : vector<256x64xf32>
    %cst_41 = arith.constant dense<0.000000e+00> : vector<64xf32>
    %64 = vector.multi_reduction <add>, %63, %cst_41 [0] : vector<256x64xf32> to vector<64xf32>
    %65 = vector.shape_cast %64 : vector<64xf32> to vector<1x1x1x64xf32>
    %c0_42 = arith.constant 0 : index
    %c0_43 = arith.constant 0 : index
    %c0_44 = arith.constant 0 : index
    %c0_45 = arith.constant 0 : index
    %66 = vector.load %arg6[%c0_42, %c0_43, %c0_44, %c0_45] : memref<1x1x1x64xf32, #tpu.memory_space<vmem>>, vector<1x1x1x64xf32>
    tpu.vector_store %arg6[%c0_42, %c0_43, %c0_44, %c0_45], %65 {strides = array<i32>} : memref<1x1x1x64xf32, #tpu.memory_space<vmem>>, vector<1x1x1x64xf32>,
    return
  }
  func.func @transform_0(%arg0: i32, %arg1: i32) -> (i32, i32, i32, i32, i32) {
    %c0_i32 = arith.constant 0 : i32
    %c0_i32_0 = arith.constant 0 : i32
    %c0_i32_1 = arith.constant 0 : i32
    %c0_i32_2 = arith.constant 0 : i32
    return %arg0, %arg1, %c0_i32, %c0_i32_0, %c0_i32_1 : i32, i32, i32, i32, i32
  }
  func.func @transform_1(%arg0: i32, %arg1: i32) -> (i32, i32, i32) {
    %c0_i32 = arith.constant 0 : i32
    %c0_i32_0 = arith.constant 0 : i32
    %c0_i32_1 = arith.constant 0 : i32
    %c0_i32_2 = arith.constant 0 : i32
    return %c0_i32, %c0_i32_0, %c0_i32_1 : i32, i32, i32
  }
  func.func @transform_2(%arg0: i32, %arg1: i32) -> (i32, i32, i32, i32) {
    %c0_i32 = arith.constant 0 : i32
    %c0_i32_0 = arith.constant 0 : i32
    %c0_i32_1 = arith.constant 0 : i32
    return %arg0, %arg1, %c0_i32, %c0_i32_0 : i32, i32, i32, i32
  }
  func.func @transform_3(%arg0: i32, %arg1: i32) -> (i32, i32, i32, i32) {
    %c0_i32 = arith.constant 0 : i32
    %c0_i32_0 = arith.constant 0 : i32
    %c0_i32_1 = arith.constant 0 : i32
    return %arg0, %arg1, %c0_i32, %c0_i32_0 : i32, i32, i32, i32
  }
  func.func @transform_4(%arg0: i32, %arg1: i32) -> (i32, i32, i32, i32) {
    %c0_i32 = arith.constant 0 : i32
    %c0_i32_0 = arith.constant 0 : i32
    %c0_i32_1 = arith.constant 0 : i32
    return %arg0, %arg1, %c0_i32, %c0_i32_0 : i32, i32, i32, i32
  }
}

module attributes {stable_mosaic.version = 11 : i64} {
  func.func @_mm_stats_kernel(%arg0: i32, %arg1: memref<512x256xbf16, #tpu.memory_space<vmem>>, %arg2: memref<256x64xbf16, #tpu.memory_space<vmem>>, %arg3: memref<512x64xbf16, #tpu.memory_space<vmem>>, %arg4: memref<1x1x64xf32, #tpu.memory_space<vmem>>, %arg5: memref<1x1x64xf32, #tpu.memory_space<vmem>>) attributes {dimension_semantics = [#tpu.dimension_semantics<parallel>], iteration_bounds = array<i64: 1>, scalar_prefetch = 0 : i64, scratch_operands = 0 : i64, tpu.core_type = #tpu.core_type<tc>, window_params = [{transform_indices = @transform_0, window_bounds = array<i64: 512, 256>}, {pipeline_mode = #tpu.pipeline_mode<synchronous>, transform_indices = @transform_1, window_bounds = array<i64: 256, 64>}, {transform_indices = @transform_2, window_bounds = array<i64: 512, 64>}, {transform_indices = @transform_3, window_bounds = array<i64: 1, 1, 64>}, {transform_indices = @transform_4, window_bounds = array<i64: 1, 1, 64>}]} {
    %c0 = arith.constant 0 : index
    %c0_0 = arith.constant 0 : index
    %0 = vector.load %arg1[%c0, %c0_0] : memref<512x256xbf16, #tpu.memory_space<vmem>>, vector<512x256xbf16>
    %c0_1 = arith.constant 0 : index
    %c0_2 = arith.constant 0 : index
    %1 = vector.load %arg2[%c0_1, %c0_2] : memref<256x64xbf16, #tpu.memory_space<vmem>>, vector<256x64xbf16>
    %cst = arith.constant dense<0.000000e+00> : vector<512x64xf32>
    %2 = tpu.matmul %0, %1, %cst {dimension_numbers = #tpu.dot_dimension_numbers<[1], [0], [0], [1], [0, 0, 1, 1], [], []>} : vector<512x256xbf16>, vector<256x64xbf16>, vector<512x64xf32> -> vector<512x64xf32>
    %3 = arith.truncf %2 : vector<512x64xf32> to vector<512x64xbf16>
    %c0_3 = arith.constant 0 : index
    %c0_4 = arith.constant 0 : index
    %4 = vector.load %arg3[%c0_3, %c0_4] : memref<512x64xbf16, #tpu.memory_space<vmem>>, vector<512x64xbf16>
    tpu.vector_store %arg3[%c0_3, %c0_4], %3 {strides = array<i32>} : memref<512x64xbf16, #tpu.memory_space<vmem>>, vector<512x64xbf16>,
    %cst_5 = arith.constant dense<0.000000e+00> : vector<64xf32>
    %5 = vector.multi_reduction <add>, %2, %cst_5 [0] : vector<512x64xf32> to vector<64xf32>
    %6 = vector.shape_cast %5 : vector<64xf32> to vector<1x1x64xf32>
    %c0_6 = arith.constant 0 : index
    %c0_7 = arith.constant 0 : index
    %c0_8 = arith.constant 0 : index
    %7 = vector.load %arg4[%c0_6, %c0_7, %c0_8] : memref<1x1x64xf32, #tpu.memory_space<vmem>>, vector<1x1x64xf32>
    tpu.vector_store %arg4[%c0_6, %c0_7, %c0_8], %6 {strides = array<i32>} : memref<1x1x64xf32, #tpu.memory_space<vmem>>, vector<1x1x64xf32>,
    %8 = arith.mulf %2, %2 : vector<512x64xf32>
    %cst_9 = arith.constant dense<0.000000e+00> : vector<64xf32>
    %9 = vector.multi_reduction <add>, %8, %cst_9 [0] : vector<512x64xf32> to vector<64xf32>
    %10 = vector.shape_cast %9 : vector<64xf32> to vector<1x1x64xf32>
    %c0_10 = arith.constant 0 : index
    %c0_11 = arith.constant 0 : index
    %c0_12 = arith.constant 0 : index
    %11 = vector.load %arg5[%c0_10, %c0_11, %c0_12] : memref<1x1x64xf32, #tpu.memory_space<vmem>>, vector<1x1x64xf32>
    tpu.vector_store %arg5[%c0_10, %c0_11, %c0_12], %10 {strides = array<i32>} : memref<1x1x64xf32, #tpu.memory_space<vmem>>, vector<1x1x64xf32>,
    return
  }
  func.func @transform_0(%arg0: i32) -> (i32, i32) {
    %c0_i32 = arith.constant 0 : i32
    %c0_i32_0 = arith.constant 0 : i32
    return %arg0, %c0_i32 : i32, i32
  }
  func.func @transform_1(%arg0: i32) -> (i32, i32) {
    %c0_i32 = arith.constant 0 : i32
    %c0_i32_0 = arith.constant 0 : i32
    %c0_i32_1 = arith.constant 0 : i32
    return %c0_i32, %c0_i32_0 : i32, i32
  }
  func.func @transform_2(%arg0: i32) -> (i32, i32) {
    %c0_i32 = arith.constant 0 : i32
    %c0_i32_0 = arith.constant 0 : i32
    return %arg0, %c0_i32 : i32, i32
  }
  func.func @transform_3(%arg0: i32) -> (i32, i32, i32) {
    %c0_i32 = arith.constant 0 : i32
    %c0_i32_0 = arith.constant 0 : i32
    %c0_i32_1 = arith.constant 0 : i32
    return %arg0, %c0_i32, %c0_i32_0 : i32, i32, i32
  }
  func.func @transform_4(%arg0: i32) -> (i32, i32, i32) {
    %c0_i32 = arith.constant 0 : i32
    %c0_i32_0 = arith.constant 0 : i32
    %c0_i32_1 = arith.constant 0 : i32
    return %arg0, %c0_i32, %c0_i32_0 : i32, i32, i32
  }
}

module attributes {stable_mosaic.version = 11 : i64} {
  func.func @_mm_stats_kernel(%arg0: i32, %arg1: memref<512x4xbf16, #tpu.memory_space<vmem>>, %arg2: memref<4x128xbf16, #tpu.memory_space<vmem>>, %arg3: memref<512x128xf32, #tpu.memory_space<vmem>>, %arg4: memref<1x1x128xf32, #tpu.memory_space<vmem>>, %arg5: memref<1x1x128xf32, #tpu.memory_space<vmem>>) attributes {dimension_semantics = [#tpu.dimension_semantics<parallel>], iteration_bounds = array<i64: 1>, scalar_prefetch = 0 : i64, scratch_operands = 0 : i64, tpu.core_type = #tpu.core_type<tc>, window_params = [{transform_indices = @transform_0, window_bounds = array<i64: 512, 4>}, {pipeline_mode = #tpu.pipeline_mode<synchronous>, transform_indices = @transform_1, window_bounds = array<i64: 4, 128>}, {transform_indices = @transform_2, window_bounds = array<i64: 512, 128>}, {transform_indices = @transform_3, window_bounds = array<i64: 1, 1, 128>}, {transform_indices = @transform_4, window_bounds = array<i64: 1, 1, 128>}]} {
    %c0 = arith.constant 0 : index
    %c0_0 = arith.constant 0 : index
    %0 = vector.load %arg1[%c0, %c0_0] : memref<512x4xbf16, #tpu.memory_space<vmem>>, vector<512x4xbf16>
    %c0_1 = arith.constant 0 : index
    %c0_2 = arith.constant 0 : index
    %1 = vector.load %arg2[%c0_1, %c0_2] : memref<4x128xbf16, #tpu.memory_space<vmem>>, vector<4x128xbf16>
    %cst = arith.constant dense<0.000000e+00> : vector<512x128xf32>
    %2 = tpu.matmul %0, %1, %cst {dimension_numbers = #tpu.dot_dimension_numbers<[1], [0], [0], [1], [0, 0, 1, 1], [], []>} : vector<512x4xbf16>, vector<4x128xbf16>, vector<512x128xf32> -> vector<512x128xf32>
    %c0_3 = arith.constant 0 : index
    %c0_4 = arith.constant 0 : index
    %3 = vector.load %arg3[%c0_3, %c0_4] : memref<512x128xf32, #tpu.memory_space<vmem>>, vector<512x128xf32>
    tpu.vector_store %arg3[%c0_3, %c0_4], %2 {strides = array<i32>} : memref<512x128xf32, #tpu.memory_space<vmem>>, vector<512x128xf32>,
    %cst_5 = arith.constant dense<0.000000e+00> : vector<128xf32>
    %4 = vector.multi_reduction <add>, %2, %cst_5 [0] : vector<512x128xf32> to vector<128xf32>
    %5 = vector.shape_cast %4 : vector<128xf32> to vector<1x1x128xf32>
    %c0_6 = arith.constant 0 : index
    %c0_7 = arith.constant 0 : index
    %c0_8 = arith.constant 0 : index
    %6 = vector.load %arg4[%c0_6, %c0_7, %c0_8] : memref<1x1x128xf32, #tpu.memory_space<vmem>>, vector<1x1x128xf32>
    tpu.vector_store %arg4[%c0_6, %c0_7, %c0_8], %5 {strides = array<i32>} : memref<1x1x128xf32, #tpu.memory_space<vmem>>, vector<1x1x128xf32>,
    %7 = arith.mulf %2, %2 : vector<512x128xf32>
    %cst_9 = arith.constant dense<0.000000e+00> : vector<128xf32>
    %8 = vector.multi_reduction <add>, %7, %cst_9 [0] : vector<512x128xf32> to vector<128xf32>
    %9 = vector.shape_cast %8 : vector<128xf32> to vector<1x1x128xf32>
    %c0_10 = arith.constant 0 : index
    %c0_11 = arith.constant 0 : index
    %c0_12 = arith.constant 0 : index
    %10 = vector.load %arg5[%c0_10, %c0_11, %c0_12] : memref<1x1x128xf32, #tpu.memory_space<vmem>>, vector<1x1x128xf32>
    tpu.vector_store %arg5[%c0_10, %c0_11, %c0_12], %9 {strides = array<i32>} : memref<1x1x128xf32, #tpu.memory_space<vmem>>, vector<1x1x128xf32>,
    return
  }
  func.func @transform_0(%arg0: i32) -> (i32, i32) {
    %c0_i32 = arith.constant 0 : i32
    %c0_i32_0 = arith.constant 0 : i32
    return %arg0, %c0_i32 : i32, i32
  }
  func.func @transform_1(%arg0: i32) -> (i32, i32) {
    %c0_i32 = arith.constant 0 : i32
    %c0_i32_0 = arith.constant 0 : i32
    %c0_i32_1 = arith.constant 0 : i32
    return %c0_i32, %c0_i32_0 : i32, i32
  }
  func.func @transform_2(%arg0: i32) -> (i32, i32) {
    %c0_i32 = arith.constant 0 : i32
    %c0_i32_0 = arith.constant 0 : i32
    return %arg0, %c0_i32 : i32, i32
  }
  func.func @transform_3(%arg0: i32) -> (i32, i32, i32) {
    %c0_i32 = arith.constant 0 : i32
    %c0_i32_0 = arith.constant 0 : i32
    %c0_i32_1 = arith.constant 0 : i32
    return %arg0, %c0_i32, %c0_i32_0 : i32, i32, i32
  }
  func.func @transform_4(%arg0: i32) -> (i32, i32, i32) {
    %c0_i32 = arith.constant 0 : i32
    %c0_i32_0 = arith.constant 0 : i32
    %c0_i32_1 = arith.constant 0 : i32
    return %arg0, %c0_i32, %c0_i32_0 : i32, i32, i32
  }
}

module attributes {stable_mosaic.version = 11 : i64} {
  func.func @_mm_stats_kernel(%arg0: i32, %arg1: memref<512x128xbf16, #tpu.memory_space<vmem>>, %arg2: memref<128x6xbf16, #tpu.memory_space<vmem>>, %arg3: memref<512x6xf32, #tpu.memory_space<vmem>>, %arg4: memref<1x1x6xf32, #tpu.memory_space<vmem>>, %arg5: memref<1x1x6xf32, #tpu.memory_space<vmem>>) attributes {dimension_semantics = [#tpu.dimension_semantics<parallel>], iteration_bounds = array<i64: 1>, scalar_prefetch = 0 : i64, scratch_operands = 0 : i64, tpu.core_type = #tpu.core_type<tc>, window_params = [{transform_indices = @transform_0, window_bounds = array<i64: 512, 128>}, {pipeline_mode = #tpu.pipeline_mode<synchronous>, transform_indices = @transform_1, window_bounds = array<i64: 128, 6>}, {transform_indices = @transform_2, window_bounds = array<i64: 512, 6>}, {transform_indices = @transform_3, window_bounds = array<i64: 1, 1, 6>}, {transform_indices = @transform_4, window_bounds = array<i64: 1, 1, 6>}]} {
    %c0 = arith.constant 0 : index
    %c0_0 = arith.constant 0 : index
    %0 = vector.load %arg1[%c0, %c0_0] : memref<512x128xbf16, #tpu.memory_space<vmem>>, vector<512x128xbf16>
    %c0_1 = arith.constant 0 : index
    %c0_2 = arith.constant 0 : index
    %1 = vector.load %arg2[%c0_1, %c0_2] : memref<128x6xbf16, #tpu.memory_space<vmem>>, vector<128x6xbf16>
    %cst = arith.constant dense<0.000000e+00> : vector<512x6xf32>
    %2 = tpu.matmul %0, %1, %cst {dimension_numbers = #tpu.dot_dimension_numbers<[1], [0], [0], [1], [0, 0, 1, 1], [], []>} : vector<512x128xbf16>, vector<128x6xbf16>, vector<512x6xf32> -> vector<512x6xf32>
    %c0_3 = arith.constant 0 : index
    %c0_4 = arith.constant 0 : index
    %3 = vector.load %arg3[%c0_3, %c0_4] : memref<512x6xf32, #tpu.memory_space<vmem>>, vector<512x6xf32>
    tpu.vector_store %arg3[%c0_3, %c0_4], %2 {strides = array<i32>} : memref<512x6xf32, #tpu.memory_space<vmem>>, vector<512x6xf32>,
    %cst_5 = arith.constant dense<0.000000e+00> : vector<6xf32>
    %4 = vector.multi_reduction <add>, %2, %cst_5 [0] : vector<512x6xf32> to vector<6xf32>
    %5 = vector.shape_cast %4 : vector<6xf32> to vector<1x1x6xf32>
    %c0_6 = arith.constant 0 : index
    %c0_7 = arith.constant 0 : index
    %c0_8 = arith.constant 0 : index
    %6 = vector.load %arg4[%c0_6, %c0_7, %c0_8] : memref<1x1x6xf32, #tpu.memory_space<vmem>>, vector<1x1x6xf32>
    tpu.vector_store %arg4[%c0_6, %c0_7, %c0_8], %5 {strides = array<i32>} : memref<1x1x6xf32, #tpu.memory_space<vmem>>, vector<1x1x6xf32>,
    %7 = arith.mulf %2, %2 : vector<512x6xf32>
    %cst_9 = arith.constant dense<0.000000e+00> : vector<6xf32>
    %8 = vector.multi_reduction <add>, %7, %cst_9 [0] : vector<512x6xf32> to vector<6xf32>
    %9 = vector.shape_cast %8 : vector<6xf32> to vector<1x1x6xf32>
    %c0_10 = arith.constant 0 : index
    %c0_11 = arith.constant 0 : index
    %c0_12 = arith.constant 0 : index
    %10 = vector.load %arg5[%c0_10, %c0_11, %c0_12] : memref<1x1x6xf32, #tpu.memory_space<vmem>>, vector<1x1x6xf32>
    tpu.vector_store %arg5[%c0_10, %c0_11, %c0_12], %9 {strides = array<i32>} : memref<1x1x6xf32, #tpu.memory_space<vmem>>, vector<1x1x6xf32>,
    return
  }
  func.func @transform_0(%arg0: i32) -> (i32, i32) {
    %c0_i32 = arith.constant 0 : i32
    %c0_i32_0 = arith.constant 0 : i32
    return %arg0, %c0_i32 : i32, i32
  }
  func.func @transform_1(%arg0: i32) -> (i32, i32) {
    %c0_i32 = arith.constant 0 : i32
    %c0_i32_0 = arith.constant 0 : i32
    %c0_i32_1 = arith.constant 0 : i32
    return %c0_i32, %c0_i32_0 : i32, i32
  }
  func.func @transform_2(%arg0: i32) -> (i32, i32) {
    %c0_i32 = arith.constant 0 : i32
    %c0_i32_0 = arith.constant 0 : i32
    return %arg0, %c0_i32 : i32, i32
  }
  func.func @transform_3(%arg0: i32) -> (i32, i32, i32) {
    %c0_i32 = arith.constant 0 : i32
    %c0_i32_0 = arith.constant 0 : i32
    %c0_i32_1 = arith.constant 0 : i32
    return %arg0, %c0_i32, %c0_i32_0 : i32, i32, i32
  }
  func.func @transform_4(%arg0: i32) -> (i32, i32, i32) {
    %c0_i32 = arith.constant 0 : i32
    %c0_i32_0 = arith.constant 0 : i32
    %c0_i32_1 = arith.constant 0 : i32
    return %arg0, %c0_i32, %c0_i32_0 : i32, i32, i32
  }
}

module attributes {stable_mosaic.version = 11 : i64} {
  func.func @_bmm_kernel(%arg0: i32, %arg1: i32, %arg2: memref<1x256x256xbf16, #tpu.memory_space<vmem>>, %arg3: memref<1x256x128xbf16, #tpu.memory_space<vmem>>, %arg4: memref<1x256x128xf32, #tpu.memory_space<vmem>>) attributes {dimension_semantics = [#tpu.dimension_semantics<parallel>, #tpu.dimension_semantics<parallel>], iteration_bounds = array<i64: 2, 1>, scalar_prefetch = 0 : i64, scratch_operands = 0 : i64, tpu.core_type = #tpu.core_type<tc>, window_params = [{transform_indices = @transform_0, window_bounds = array<i64: 1, 256, 256>}, {transform_indices = @transform_1, window_bounds = array<i64: 1, 256, 128>}, {transform_indices = @transform_2, window_bounds = array<i64: 1, 256, 128>}]} {
    %c0 = arith.constant 0 : index
    %c0_0 = arith.constant 0 : index
    %c0_1 = arith.constant 0 : index
    %0 = vector.load %arg2[%c0, %c0_0, %c0_1] : memref<1x256x256xbf16, #tpu.memory_space<vmem>>, vector<1x256x256xbf16>
    %1 = vector.shape_cast %0 : vector<1x256x256xbf16> to vector<256x256xbf16>
    %c0_2 = arith.constant 0 : index
    %c0_3 = arith.constant 0 : index
    %c0_4 = arith.constant 0 : index
    %2 = vector.load %arg3[%c0_2, %c0_3, %c0_4] : memref<1x256x128xbf16, #tpu.memory_space<vmem>>, vector<1x256x128xbf16>
    %3 = vector.shape_cast %2 : vector<1x256x128xbf16> to vector<256x128xbf16>
    %cst = arith.constant dense<0.000000e+00> : vector<256x128xf32>
    %4 = tpu.matmul %1, %3, %cst {dimension_numbers = #tpu.dot_dimension_numbers<[1], [0], [0], [1], [0, 0, 1, 1], [], []>} : vector<256x256xbf16>, vector<256x128xbf16>, vector<256x128xf32> -> vector<256x128xf32>
    %c0_5 = arith.constant 0 : index
    %c0_6 = arith.constant 0 : index
    %c0_7 = arith.constant 0 : index
    %5 = vector.load %arg4[%c0_5, %c0_6, %c0_7] : memref<1x256x128xf32, #tpu.memory_space<vmem>>, vector<1x256x128xf32>
    %6 = vector.shape_cast %5 : vector<1x256x128xf32> to vector<256x128xf32>
    %7 = vector.shape_cast %4 : vector<256x128xf32> to vector<1x256x128xf32>
    tpu.vector_store %arg4[%c0_5, %c0_6, %c0_7], %7 {strides = array<i32>} : memref<1x256x128xf32, #tpu.memory_space<vmem>>, vector<1x256x128xf32>,
    return
  }
  func.func @transform_0(%arg0: i32, %arg1: i32) -> (i32, i32, i32) {
    %c0_i32 = arith.constant 0 : i32
    %c0_i32_0 = arith.constant 0 : i32
    return %arg0, %arg1, %c0_i32 : i32, i32, i32
  }
  func.func @transform_1(%arg0: i32, %arg1: i32) -> (i32, i32, i32) {
    %c0_i32 = arith.constant 0 : i32
    %c0_i32_0 = arith.constant 0 : i32
    %c0_i32_1 = arith.constant 0 : i32
    return %arg0, %c0_i32, %c0_i32_0 : i32, i32, i32
  }
  func.func @transform_2(%arg0: i32, %arg1: i32) -> (i32, i32, i32) {
    %c0_i32 = arith.constant 0 : i32
    %c0_i32_0 = arith.constant 0 : i32
    return %arg0, %arg1, %c0_i32 : i32, i32, i32
  }
}

</mosaic_0001>

<bundles_post_ra>
// kernel: tile.103
= control target key start
LH: loop header
LB: loop body
LE: loop exit
PB: predicated region body
PF: predicated region fallthrough
CT: control target
= control target key end

     0   :  { %s22_s0 = inlined_call_operand.vmem [shape: f32[64], index: 0, kind: input, shape index: {}]   ;;  %s23_s1 = inlined_call_operand.vmem [shape: f32[2,64], index: 1, kind: output, shape index: {}]  }
   0x1   :  { %v4_v0 = vld [vmem:[%s22_s0] ss:$0 sm:$0xff] }
   0x2   :  { %5 = vst [vmem:[%s23_s1] sm:$0x3] %v4_v0 }

// kernel: tile.108
= control target key start
LH: loop header
LB: loop body
LE: loop exit
PB: predicated region body
PF: predicated region fallthrough
CT: control target
= control target key end

     0   :  { %vm7_vm0 = vcmask 523264   ;;  %vm13_vm1 = vcmask 1048064   ;;  %s39_s0 = inlined_call_operand.vmem [shape: f32[2,64], index: 0, kind: input, shape index: {}]   ;;  %s40_s1 = inlined_call_operand.vmem [shape: f32[1,128], index: 1, kind: output, shape index: {}]  }
   0x1   :  { %v4_v0 = vld [vmem:[%s39_s0] sm:$0x3]  ;;  %s22_s0 = smov 64  }
   0x2   :  { %5 = vst [vmem:[#allocation1] sm:$0x3] %v4_v0 }
   0x9   :  { %v10_v1 = vld [vmem:[#allocation1 + $0x1] sm:$0x1]   ;;  %v6_v2 = vld [vmem:[#allocation1] sm:$0x1]  }
   0xa   :  { %11 = vrot.lane.b32.xlu0 %v10_v1, %s22_s0  ;;  %8 = vst.msk [vmem:[#allocation0] sm:$0x1] %vm7_vm0, %v6_v2  }
  0x7c   :  { %v12_v3 = vpop.permute.xlu0 %11  }
  0x7d   :  { %14 = vst.msk [vmem:[#allocation0] sm:$0x1] %vm13_vm1, %v12_v3  }
  0x84   :  { %v18_v4 = vld [vmem:[#allocation0] sm:$0x1] }
  0x85   :  { %20 = vst [vmem:[%s40_s1] sm:$0x1] %v18_v4 }

</bundles_post_ra>
